<compile_context>
chip_gen: v6e
topology: v6e:2x2x1
jax: 0.10.0
libtpu: 0.0.40
codegen_flags: <defaults>
</compile_context>

<pallas_src>
import functools

import jax
import jax.numpy as jnp
from jax.experimental import pallas as pl
from jax.experimental.pallas import tpu as pltpu


# ----------------------------------------------------------------------------
# Small helpers (tile sizing is generation-aware).
# ----------------------------------------------------------------------------
def _round_up(x, m):
    return ((x + m - 1) // m) * m


@functools.lru_cache(maxsize=None)
def _vmem_bytes():
    """Per-core VMEM capacity; conservative (v7x) fallback if unavailable."""
    try:
        info = pltpu.get_tpu_info()
        v = int(getattr(info, "vmem_capacity_bytes", 0))
        if v > 0:
            return v
    except Exception:
        pass
    return 64 * 1024 * 1024


def _pick_tm(M, K):
    """M-tile for the im2col matmul: big enough to amortise per-step overhead,
    small enough that double-buffered bf16 tiles stay well inside the default
    32 MiB scoped VMEM limit on every generation (v5e/v6e get up to 1024 rows,
    v7x up to 512)."""
    vmem = _vmem_bytes()
    cap = 1024 if vmem >= (96 << 20) else 512
    budget = min(vmem // 16, 4 << 20)          # bytes for one bf16 x-tile
    tm = max(8, min(cap, budget // (2 * K)))
    tm = (tm // 8) * 8
    return min(tm, _round_up(M, 8))


# ----------------------------------------------------------------------------
# Kernel A: fused 3x3 stride-1 conv.  One grid step per batch image; the nine
# shifted taps are read straight out of the padded NHWC activation in VMEM
# (no im2col patch tensor round-tripping through HBM).  bf16 MXU matmuls,
# f32 accumulator, bias + optional SiLU fused, 128-lane-padded output store.
# ----------------------------------------------------------------------------
def _conv3x3_tap_kernel(x_ref, w_ref, b_ref, o_ref, *, Ho, Wo, out_silu):
    npad = w_ref.shape[-1]
    acc = jnp.zeros((Ho * Wo, npad), jnp.float32)
    for dy in range(3):
        for dx in range(3):
            t = dy * 3 + dx
            xt = x_ref[0, dy:dy + Ho, dx:dx + Wo, :]          # (Ho, Wo, Cin) bf16
            acc = acc + jnp.dot(xt.reshape(Ho * Wo, -1), w_ref[t],
                                preferred_element_type=jnp.float32)
    acc = acc + b_ref[...]
    if out_silu:
        acc = acc * jax.nn.sigmoid(acc)
    o_ref[0] = acc.reshape(Ho, Wo, npad).astype(o_ref.dtype)


def _conv3x3_direct(xp, w_k, b_k, Ho, Wo, out_silu):
    B, Hp, Wp, Cin = xp.shape
    npad = w_k.shape[-1]
    kernel = functools.partial(_conv3x3_tap_kernel, Ho=Ho, Wo=Wo,
                               out_silu=out_silu)
    return pl.pallas_call(
        kernel,
        out_shape=jax.ShapeDtypeStruct((B, Ho, Wo, npad), jnp.float32),
        grid=(B,),
        in_specs=[
            pl.BlockSpec((1, Hp, Wp, Cin), lambda b: (b, 0, 0, 0)),
            pl.BlockSpec((9, Cin, npad), lambda b: (0, 0, 0)),
            pl.BlockSpec((1, npad), lambda b: (0, 0)),
        ],
        out_specs=pl.BlockSpec((1, Ho, Wo, npad), lambda b: (b, 0, 0, 0)),
        # batch images are independent -> shard across the v7x TensorCores
        compiler_params=pltpu.CompilerParams(dimension_semantics=("parallel",)),
    )(xp, w_k, b_k)


# ----------------------------------------------------------------------------
# Kernel B: (M, K) @ (K, Npad) + bias (+ SiLU).  M-tiled so the BlockSpec
# pipeline overlaps HBM<->VMEM DMA with MXU work and the grid can shard across
# cores.  K is kept whole (it is rarely a multiple of 128 here and the per-tile
# K slab always fits VMEM); Npad is a multiple of 128 -> unmasked lane-dense
# stores.
# ----------------------------------------------------------------------------
def _mm_bias_act_kernel(x_ref, w_ref, b_ref, o_ref, *, out_silu):
    acc = jnp.dot(x_ref[...], w_ref[...], preferred_element_type=jnp.float32)
    acc = acc + b_ref[...]
    if out_silu:
        acc = acc * jax.nn.sigmoid(acc)
    o_ref[...] = acc.astype(o_ref.dtype)


def _conv3x3_im2col(xp, w2d, b_k, Ho, Wo, stride, out_silu):
    B, Hp, Wp, Cin = xp.shape
    npad = w2d.shape[-1]
    # bf16 patches: at stride 2 the 3x3 window overlap is only ~2.25x (the 9x
    # blow-up case, stride 1, uses the direct tap kernel above instead).
    # TODO(synk): replace glue im2col with in-kernel halo DMA for very large
    # resolutions so the patch tensor never hits HBM at all.
    taps = []
    for dy in range(3):
        for dx in range(3):
            taps.append(xp[:, dy:dy + stride * (Ho - 1) + 1:stride,
                              dx:dx + stride * (Wo - 1) + 1:stride, :])
    patches = jnp.concatenate(taps, axis=-1)                   # (B, Ho, Wo, 9*Cin)
    M, K = B * Ho * Wo, 9 * Cin
    x2d = patches.reshape(M, K)

    tm = _pick_tm(M, K)
    M_pad = _round_up(M, tm)
    if M_pad != M:
        x2d = jnp.pad(x2d, ((0, M_pad - M), (0, 0)))

    kernel = functools.partial(_mm_bias_act_kernel, out_silu=out_silu)
    out2d = pl.pallas_call(
        kernel,
        out_shape=jax.ShapeDtypeStruct((M_pad, npad), jnp.float32),
        grid=(M_pad // tm,),
        in_specs=[
            pl.BlockSpec((tm, K), lambda i: (i, 0)),
            pl.BlockSpec((K, npad), lambda i: (0, 0)),
            pl.BlockSpec((1, npad), lambda i: (0, 0)),
        ],
        out_specs=pl.BlockSpec((tm, npad), lambda i: (i, 0)),
        compiler_params=pltpu.CompilerParams(dimension_semantics=("parallel",)),
    )(x2d, w2d, b_k)
    return out2d[:M].reshape(B, Ho, Wo, npad)


# ----------------------------------------------------------------------------
# Generic 3x3 conv, padding=1, stride in {1,2}.  x NHWC, w OIHW, bias (Cout,).
# ----------------------------------------------------------------------------
def _fits_direct(Hp, Wp, Cin, Ho, Wo, npad):
    x_b = Hp * Wp * Cin * 2                  # bf16 per-image input block
    w_b = 9 * Cin * npad * 2                 # bf16 weights (resident)
    o_b = Ho * Wo * npad * 4                 # f32 per-image output block
    need = 2 * (x_b + o_b) + w_b + npad * 4  # double-buffered I/O + weights
    return need <= _vmem_bytes() // 4


def conv2d_3x3(x_nhwc, w_oihw, bias, *, stride, out_silu=False):
    B, H, W, Cin = x_nhwc.shape
    Cout = w_oihw.shape[0]
    Ho = (H + 2 - 3) // stride + 1
    Wo = (W + 2 - 3) // stride + 1
    npad = _round_up(Cout, 128)              # lane-dense output

    # OIHW -> (tap = ky*3+kx, Cin, Cout), zero-padded to npad lanes, bf16.
    w_k = jnp.transpose(w_oihw, (2, 3, 1, 0)).reshape(9, Cin, Cout)
    w_k = jnp.pad(w_k, ((0, 0), (0, 0), (0, npad - Cout))).astype(jnp.bfloat16)
    b_k = jnp.pad(bias, (0, npad - Cout)).reshape(1, npad).astype(jnp.float32)

    xp = jnp.pad(x_nhwc.astype(jnp.bfloat16), ((0, 0), (1, 1), (1, 1), (0, 0)))

    if stride == 1 and _fits_direct(H + 2, W + 2, Cin, Ho, Wo, npad):
        out = _conv3x3_direct(xp, w_k, b_k, Ho, Wo, out_silu)
    else:
        out = _conv3x3_im2col(xp, w_k.reshape(9 * Cin, npad), b_k,
                              Ho, Wo, stride, out_silu)
    return out[..., :Cout]


# ----------------------------------------------------------------------------
# Parameter init (deterministic, synthetic — mirrors the nn.Module __init__).
# ----------------------------------------------------------------------------
def init_params(key, cond_emb_ch=8, cond_ch=3, boc=(16, 32, 96, 256)):
    def conv_p(k, cout, cin, scale=0.05):
        k1, k2 = jax.random.split(k)
        w = jax.random.normal(k1, (cout, cin, 3, 3), jnp.float32) * scale
        b = jax.random.normal(k2, (cout,), jnp.float32) * scale
        return w, b

    keys = jax.random.split(key, 16)
    params = {
        "seg_proj":    conv_p(keys[0], 256, 256),
        "fuse_block1": conv_p(keys[1], boc[1], 1),
        "fuse_block2": conv_p(keys[2], boc[-1], boc[1]),
        "conv_fuse":   conv_p(keys[3], cond_emb_ch, boc[-1] * 2),
        "conv_in":     conv_p(keys[4], boc[0], cond_ch),
    }
    blocks = []
    ki = 5
    for i in range(len(boc) - 1):
        blocks.append(conv_p(keys[ki], boc[i], boc[i])); ki += 1
        blocks.append(conv_p(keys[ki], boc[i + 1], boc[i])); ki += 1
    params["blocks"] = blocks
    # zero_module(conv_out)
    params["conv_out"] = (jnp.zeros((cond_emb_ch, boc[-1] * 2, 3, 3), jnp.float32),
                          jnp.zeros((cond_emb_ch,), jnp.float32))
    return params


# ----------------------------------------------------------------------------
# Forward pass — semantics identical to FuseFlowConditioningEmbeddingSVD.
# conditioning/depth/seg are NCHW; outputs are NCHW.
# ----------------------------------------------------------------------------
def forward(params, conditioning, depth, seg):
    cond = jnp.transpose(conditioning, (0, 2, 3, 1))
    dep  = jnp.transpose(depth,        (0, 2, 3, 1))
    segx = jnp.transpose(seg,          (0, 2, 3, 1))

    # fuse branch.  torch: fb1 -> silu -> fb2 -> cat(seg) -> silu -> conv_fuse.
    # silu(cat(a, b)) == cat(silu(a), silu(b)), so the post-cat SiLU is fused
    # into fb2's output and applied once to seg (never on replicated patches).
    f = conv2d_3x3(dep, *params["fuse_block1"], stride=2, out_silu=True)
    f = conv2d_3x3(f,   *params["fuse_block2"], stride=2, out_silu=True)
    f = jnp.concatenate([f, jax.nn.silu(segx)], axis=-1)
    fuse_feature = conv2d_3x3(f, *params["conv_fuse"], stride=2)

    # seg projection (no activation)
    seg_proj = conv2d_3x3(segx, *params["seg_proj"], stride=2)

    # embedding branch
    # TODO(synk): fuse the whole embedding-branch conv chain (conv_in + 6
    # blocks + conv_out) into a single VMEM-resident Pallas kernel to remove
    # the remaining per-conv launch + HBM round trips at these tiny activations.
    e = conv2d_3x3(cond, *params["conv_in"], stride=1, out_silu=True)
    for i, (w, b) in enumerate(params["blocks"]):
        s = 1 if i % 2 == 0 else 2
        e = conv2d_3x3(e, w, b, stride=s, out_silu=True)
    e = jnp.concatenate([e, seg_proj], axis=-1)
    embedding = conv2d_3x3(e, *params["conv_out"], stride=1)   # zero-init conv

    return (jnp.transpose(embedding,    (0, 3, 1, 2)),
            jnp.transpose(fuse_feature, (0, 3, 1, 2)))


# ----------------------------------------------------------------------------
# Pure-JAX reference (XLA conv) for correctness checks.
# ----------------------------------------------------------------------------
def _ref_conv(x, w, b, stride):
    y = jax.lax.conv_general_dilated(
        x, w, window_strides=(stride, stride), padding=((1, 1), (1, 1)),
        dimension_numbers=("NCHW", "OIHW", "NCHW"))
    return y + b[None, :, None, None]


def forward_ref(params, conditioning, depth, seg):
    silu = jax.nn.silu
    f = silu(_ref_conv(depth, *params["fuse_block1"], 2))
    f = _ref_conv(f, *params["fuse_block2"], 2)
    f = silu(jnp.concatenate([f, seg], axis=1))
    fuse_feature = _ref_conv(f, *params["conv_fuse"], 2)
    seg_proj = _ref_conv(seg, *params["seg_proj"], 2)
    e = silu(_ref_conv(conditioning, *params["conv_in"], 1))
    for i, (w, b) in enumerate(params["blocks"]):
        s = 1 if i % 2 == 0 else 2
        e = silu(_ref_conv(e, w, b, s))
    e = jnp.concatenate([e, seg_proj], axis=1)
    embedding = _ref_conv(e, *params["conv_out"], 1)
    return embedding, fuse_feature


def _check_conv(key, Cin, Cout, H, W, stride, out_silu):
    kx, kw, kb = jax.random.split(key, 3)
    x = jax.random.normal(kx, (2, Cin, H, W), jnp.float32)
    w = jax.random.normal(kw, (Cout, Cin, 3, 3), jnp.float32) * 0.05
    b = jax.random.normal(kb, (Cout,), jnp.float32) * 0.05
    got = conv2d_3x3(jnp.transpose(x, (0, 2, 3, 1)), w, b,
                     stride=stride, out_silu=out_silu)
    got = jnp.transpose(got, (0, 3, 1, 2))
    ref = _ref_conv(x, w, b, stride)
    if out_silu:
        ref = jax.nn.silu(ref)
    assert bool(jnp.allclose(got, ref, rtol=3e-2, atol=3e-2)), (stride, out_silu)


if __name__ == "__main__":
    key = jax.random.PRNGKey(0)
    kp, kc, kd, ks, kt = jax.random.split(key, 5)

    B, H, W = 2, 16, 16
    cond_emb_ch = 8
    params = init_params(kp, cond_emb_ch=cond_emb_ch)

    conditioning = jax.random.normal(kc, (B, 3, H, W), jnp.float32)            # NCHW
    depth        = jax.random.normal(kd, (B, 1, H, W), jnp.float32)            # NCHW
    seg          = jax.random.normal(ks, (B, 256, H // 4, W // 4), jnp.float32)  # NCHW

    # Unit checks: both kernel paths (direct stride-1 taps, tiled im2col matmul)
    # against the XLA conv reference (bf16 tolerance).
    _check_conv(kt, Cin=8, Cout=16, H=16, W=16, stride=1, out_silu=True)
    _check_conv(kt, Cin=8, Cout=16, H=16, W=16, stride=2, out_silu=False)

    fwd = jax.jit(forward)
    embedding, fuse_feature = fwd(params, conditioning, depth, seg)
    jax.block_until_ready((embedding, fuse_feature))

    assert embedding.shape == (B, cond_emb_ch, H // 8, W // 8), embedding.shape
    assert fuse_feature.shape == (B, cond_emb_ch, H // 8, W // 8), fuse_feature.shape

    # End-to-end numerical check against the pure-XLA reference forward.
    ref_emb, ref_fuse = jax.jit(forward_ref)(params, conditioning, depth, seg)
    assert bool(jnp.allclose(embedding, ref_emb, rtol=5e-2, atol=5e-2))
    assert bool(jnp.allclose(fuse_feature, ref_fuse, rtol=5e-2, atol=5e-2))

    print("KERNEL_OK")
</pallas_src>

<mosaic_0001>
module attributes {stable_mosaic.version = 11 : i64} {
  func.func @_conv3x3_tap_kernel(%arg0: i32, %arg1: memref<1x18x18x8xbf16, #tpu.memory_space<vmem>>, %arg2: memref<9x8x128xbf16, #tpu.memory_space<vmem>>, %arg3: memref<1x128xf32, #tpu.memory_space<vmem>>, %arg4: memref<1x16x16x128xf32, #tpu.memory_space<vmem>>) attributes {dimension_semantics = [#tpu.dimension_semantics<parallel>], iteration_bounds = array<i64: 2>, scalar_prefetch = 0 : i64, scratch_operands = 0 : i64, tpu.core_type = #tpu.core_type<tc>, window_params = [{transform_indices = @transform_0, window_bounds = array<i64: 1, 18, 18, 8>}, {pipeline_mode = #tpu.pipeline_mode<synchronous>, transform_indices = @transform_1, window_bounds = array<i64: 9, 8, 128>}, {pipeline_mode = #tpu.pipeline_mode<synchronous>, transform_indices = @transform_2, window_bounds = array<i64: 1, 128>}, {transform_indices = @transform_3, window_bounds = array<i64: 1, 16, 16, 128>}]} {
    %cst = arith.constant 0.000000e+00 : f32
    %0 = vector.broadcast %cst : f32 to vector<256x128xf32>
    %c0 = arith.constant 0 : index
    %c0_0 = arith.constant 0 : index
    %c0_1 = arith.constant 0 : index
    %c0_2 = arith.constant 0 : index
    %1 = vector.load %arg1[%c0, %c0_0, %c0_1, %c0_2] : memref<1x18x18x8xbf16, #tpu.memory_space<vmem>>, vector<1x16x16x8xbf16>
    %2 = vector.shape_cast %1 : vector<1x16x16x8xbf16> to vector<16x16x8xbf16>
    %3 = vector.shape_cast %2 : vector<16x16x8xbf16> to vector<256x8xbf16>
    %c0_3 = arith.constant 0 : index
    %c0_4 = arith.constant 0 : index
    %c0_5 = arith.constant 0 : index
    %4 = vector.load %arg2[%c0_3, %c0_4, %c0_5] : memref<9x8x128xbf16, #tpu.memory_space<vmem>>, vector<1x8x128xbf16>
    %5 = vector.shape_cast %4 : vector<1x8x128xbf16> to vector<8x128xbf16>
    %cst_6 = arith.constant dense<0.000000e+00> : vector<256x128xf32>
    %6 = tpu.matmul %3, %5, %cst_6 {dimension_numbers = #tpu.dot_dimension_numbers<[1], [0], [0], [1], [0, 0, 1, 1], [], []>} : vector<256x8xbf16>, vector<8x128xbf16>, vector<256x128xf32> -> vector<256x128xf32>
    %7 = arith.addf %0, %6 : vector<256x128xf32>
    %c0_7 = arith.constant 0 : index
    %c0_8 = arith.constant 0 : index
    %c1 = arith.constant 1 : index
    %c0_9 = arith.constant 0 : index
    %8 = vector.load %arg1[%c0_7, %c0_8, %c1, %c0_9] : memref<1x18x18x8xbf16, #tpu.memory_space<vmem>>, vector<1x16x16x8xbf16>
    %9 = vector.shape_cast %8 : vector<1x16x16x8xbf16> to vector<16x16x8xbf16>
    %10 = vector.shape_cast %9 : vector<16x16x8xbf16> to vector<256x8xbf16>
    %c1_10 = arith.constant 1 : index
    %c0_11 = arith.constant 0 : index
    %c0_12 = arith.constant 0 : index
    %11 = vector.load %arg2[%c1_10, %c0_11, %c0_12] : memref<9x8x128xbf16, #tpu.memory_space<vmem>>, vector<1x8x128xbf16>
    %12 = vector.shape_cast %11 : vector<1x8x128xbf16> to vector<8x128xbf16>
    %cst_13 = arith.constant dense<0.000000e+00> : vector<256x128xf32>
    %13 = tpu.matmul %10, %12, %cst_13 {dimension_numbers = #tpu.dot_dimension_numbers<[1], [0], [0], [1], [0, 0, 1, 1], [], []>} : vector<256x8xbf16>, vector<8x128xbf16>, vector<256x128xf32> -> vector<256x128xf32>
    %14 = arith.addf %7, %13 : vector<256x128xf32>
    %c0_14 = arith.constant 0 : index
    %c0_15 = arith.constant 0 : index
    %c2 = arith.constant 2 : index
    %c0_16 = arith.constant 0 : index
    %15 = vector.load %arg1[%c0_14, %c0_15, %c2, %c0_16] : memref<1x18x18x8xbf16, #tpu.memory_space<vmem>>, vector<1x16x16x8xbf16>
    %16 = vector.shape_cast %15 : vector<1x16x16x8xbf16> to vector<16x16x8xbf16>
    %17 = vector.shape_cast %16 : vector<16x16x8xbf16> to vector<256x8xbf16>
    %c2_17 = arith.constant 2 : index
    %c0_18 = arith.constant 0 : index
    %c0_19 = arith.constant 0 : index
    %18 = vector.load %arg2[%c2_17, %c0_18, %c0_19] : memref<9x8x128xbf16, #tpu.memory_space<vmem>>, vector<1x8x128xbf16>
    %19 = vector.shape_cast %18 : vector<1x8x128xbf16> to vector<8x128xbf16>
    %cst_20 = arith.constant dense<0.000000e+00> : vector<256x128xf32>
    %20 = tpu.matmul %17, %19, %cst_20 {dimension_numbers = #tpu.dot_dimension_numbers<[1], [0], [0], [1], [0, 0, 1, 1], [], []>} : vector<256x8xbf16>, vector<8x128xbf16>, vector<256x128xf32> -> vector<256x128xf32>
    %21 = arith.addf %14, %20 : vector<256x128xf32>
    %c0_21 = arith.constant 0 : index
    %c1_22 = arith.constant 1 : index
    %c0_23 = arith.constant 0 : index
    %c0_24 = arith.constant 0 : index
    %22 = vector.load %arg1[%c0_21, %c1_22, %c0_23, %c0_24] : memref<1x18x18x8xbf16, #tpu.memory_space<vmem>>, vector<1x16x16x8xbf16>
    %23 = vector.shape_cast %22 : vector<1x16x16x8xbf16> to vector<16x16x8xbf16>
    %24 = vector.shape_cast %23 : vector<16x16x8xbf16> to vector<256x8xbf16>
    %c3 = arith.constant 3 : index
    %c0_25 = arith.constant 0 : index
    %c0_26 = arith.constant 0 : index
    %25 = vector.load %arg2[%c3, %c0_25, %c0_26] : memref<9x8x128xbf16, #tpu.memory_space<vmem>>, vector<1x8x128xbf16>
    %26 = vector.shape_cast %25 : vector<1x8x128xbf16> to vector<8x128xbf16>
    %cst_27 = arith.constant dense<0.000000e+00> : vector<256x128xf32>
    %27 = tpu.matmul %24, %26, %cst_27 {dimension_numbers = #tpu.dot_dimension_numbers<[1], [0], [0], [1], [0, 0, 1, 1], [], []>} : vector<256x8xbf16>, vector<8x128xbf16>, vector<256x128xf32> -> vector<256x128xf32>
    %28 = arith.addf %21, %27 : vector<256x128xf32>
    %c0_28 = arith.constant 0 : index
    %c1_29 = arith.constant 1 : index
    %c1_30 = arith.constant 1 : index
    %c0_31 = arith.constant 0 : index
    %29 = vector.load %arg1[%c0_28, %c1_29, %c1_30, %c0_31] : memref<1x18x18x8xbf16, #tpu.memory_space<vmem>>, vector<1x16x16x8xbf16>
    %30 = vector.shape_cast %29 : vector<1x16x16x8xbf16> to vector<16x16x8xbf16>
    %31 = vector.shape_cast %30 : vector<16x16x8xbf16> to vector<256x8xbf16>
    %c4 = arith.constant 4 : index
    %c0_32 = arith.constant 0 : index
    %c0_33 = arith.constant 0 : index
    %32 = vector.load %arg2[%c4, %c0_32, %c0_33] : memref<9x8x128xbf16, #tpu.memory_space<vmem>>, vector<1x8x128xbf16>
    %33 = vector.shape_cast %32 : vector<1x8x128xbf16> to vector<8x128xbf16>
    %cst_34 = arith.constant dense<0.000000e+00> : vector<256x128xf32>
    %34 = tpu.matmul %31, %33, %cst_34 {dimension_numbers = #tpu.dot_dimension_numbers<[1], [0], [0], [1], [0, 0, 1, 1], [], []>} : vector<256x8xbf16>, vector<8x128xbf16>, vector<256x128xf32> -> vector<256x128xf32>
    %35 = arith.addf %28, %34 : vector<256x128xf32>
    %c0_35 = arith.constant 0 : index
    %c1_36 = arith.constant 1 : index
    %c2_37 = arith.constant 2 : index
    %c0_38 = arith.constant 0 : index
    %36 = vector.load %arg1[%c0_35, %c1_36, %c2_37, %c0_38] : memref<1x18x18x8xbf16, #tpu.memory_space<vmem>>, vector<1x16x16x8xbf16>
    %37 = vector.shape_cast %36 : vector<1x16x16x8xbf16> to vector<16x16x8xbf16>
    %38 = vector.shape_cast %37 : vector<16x16x8xbf16> to vector<256x8xbf16>
    %c5 = arith.constant 5 : index
    %c0_39 = arith.constant 0 : index
    %c0_40 = arith.constant 0 : index
    %39 = vector.load %arg2[%c5, %c0_39, %c0_40] : memref<9x8x128xbf16, #tpu.memory_space<vmem>>, vector<1x8x128xbf16>
    %40 = vector.shape_cast %39 : vector<1x8x128xbf16> to vector<8x128xbf16>
    %cst_41 = arith.constant dense<0.000000e+00> : vector<256x128xf32>
    %41 = tpu.matmul %38, %40, %cst_41 {dimension_numbers = #tpu.dot_dimension_numbers<[1], [0], [0], [1], [0, 0, 1, 1], [], []>} : vector<256x8xbf16>, vector<8x128xbf16>, vector<256x128xf32> -> vector<256x128xf32>
    %42 = arith.addf %35, %41 : vector<256x128xf32>
    %c0_42 = arith.constant 0 : index
    %c2_43 = arith.constant 2 : index
    %c0_44 = arith.constant 0 : index
    %c0_45 = arith.constant 0 : index
    %43 = vector.load %arg1[%c0_42, %c2_43, %c0_44, %c0_45] : memref<1x18x18x8xbf16, #tpu.memory_space<vmem>>, vector<1x16x16x8xbf16>
    %44 = vector.shape_cast %43 : vector<1x16x16x8xbf16> to vector<16x16x8xbf16>
    %45 = vector.shape_cast %44 : vector<16x16x8xbf16> to vector<256x8xbf16>
    %c6 = arith.constant 6 : index
    %c0_46 = arith.constant 0 : index
    %c0_47 = arith.constant 0 : index
    %46 = vector.load %arg2[%c6, %c0_46, %c0_47] : memref<9x8x128xbf16, #tpu.memory_space<vmem>>, vector<1x8x128xbf16>
    %47 = vector.shape_cast %46 : vector<1x8x128xbf16> to vector<8x128xbf16>
    %cst_48 = arith.constant dense<0.000000e+00> : vector<256x128xf32>
    %48 = tpu.matmul %45, %47, %cst_48 {dimension_numbers = #tpu.dot_dimension_numbers<[1], [0], [0], [1], [0, 0, 1, 1], [], []>} : vector<256x8xbf16>, vector<8x128xbf16>, vector<256x128xf32> -> vector<256x128xf32>
    %49 = arith.addf %42, %48 : vector<256x128xf32>
    %c0_49 = arith.constant 0 : index
    %c2_50 = arith.constant 2 : index
    %c1_51 = arith.constant 1 : index
    %c0_52 = arith.constant 0 : index
    %50 = vector.load %arg1[%c0_49, %c2_50, %c1_51, %c0_52] : memref<1x18x18x8xbf16, #tpu.memory_space<vmem>>, vector<1x16x16x8xbf16>
    %51 = vector.shape_cast %50 : vector<1x16x16x8xbf16> to vector<16x16x8xbf16>
    %52 = vector.shape_cast %51 : vector<16x16x8xbf16> to vector<256x8xbf16>
    %c7 = arith.constant 7 : index
    %c0_53 = arith.constant 0 : index
    %c0_54 = arith.constant 0 : index
    %53 = vector.load %arg2[%c7, %c0_53, %c0_54] : memref<9x8x128xbf16, #tpu.memory_space<vmem>>, vector<1x8x128xbf16>
    %54 = vector.shape_cast %53 : vector<1x8x128xbf16> to vector<8x128xbf16>
    %cst_55 = arith.constant dense<0.000000e+00> : vector<256x128xf32>
    %55 = tpu.matmul %52, %54, %cst_55 {dimension_numbers = #tpu.dot_dimension_numbers<[1], [0], [0], [1], [0, 0, 1, 1], [], []>} : vector<256x8xbf16>, vector<8x128xbf16>, vector<256x128xf32> -> vector<256x128xf32>
    %56 = arith.addf %49, %55 : vector<256x128xf32>
    %c0_56 = arith.constant 0 : index
    %c2_57 = arith.constant 2 : index
    %c2_58 = arith.constant 2 : index
    %c0_59 = arith.constant 0 : index
    %57 = vector.load %arg1[%c0_56, %c2_57, %c2_58, %c0_59] : memref<1x18x18x8xbf16, #tpu.memory_space<vmem>>, vector<1x16x16x8xbf16>
    %58 = vector.shape_cast %57 : vector<1x16x16x8xbf16> to vector<16x16x8xbf16>
    %59 = vector.shape_cast %58 : vector<16x16x8xbf16> to vector<256x8xbf16>
    %c8 = arith.constant 8 : index
    %c0_60 = arith.constant 0 : index
    %c0_61 = arith.constant 0 : index
    %60 = vector.load %arg2[%c8, %c0_60, %c0_61] : memref<9x8x128xbf16, #tpu.memory_space<vmem>>, vector<1x8x128xbf16>
    %61 = vector.shape_cast %60 : vector<1x8x128xbf16> to vector<8x128xbf16>
    %cst_62 = arith.constant dense<0.000000e+00> : vector<256x128xf32>
    %62 = tpu.matmul %59, %61, %cst_62 {dimension_numbers = #tpu.dot_dimension_numbers<[1], [0], [0], [1], [0, 0, 1, 1], [], []>} : vector<256x8xbf16>, vector<8x128xbf16>, vector<256x128xf32> -> vector<256x128xf32>
    %63 = arith.addf %56, %62 : vector<256x128xf32>
    %c0_63 = arith.constant 0 : index
    %c0_64 = arith.constant 0 : index
    %64 = vector.load %arg3[%c0_63, %c0_64] : memref<1x128xf32, #tpu.memory_space<vmem>>, vector<1x128xf32>
    %65 = vector.broadcast %64 : vector<1x128xf32> to vector<256x128xf32>
    %66 = arith.addf %63, %65 : vector<256x128xf32>
    %67 = arith.negf %66 : vector<256x128xf32>
    %68 = math.exp %67 : vector<256x128xf32>
    %cst_65 = arith.constant 1.000000e+00 : f32
    %69 = vector.broadcast %cst_65 : f32 to vector<256x128xf32>
    %70 = arith.addf %69, %68 : vector<256x128xf32>
    %71 = arith.divf %69, %70 : vector<256x128xf32>
    %72 = arith.mulf %66, %71 : vector<256x128xf32>
    %73 = vector.shape_cast %72 : vector<256x128xf32> to vector<16x16x128xf32>
    %c0_66 = arith.constant 0 : index
    %c0_67 = arith.constant 0 : index
    %c0_68 = arith.constant 0 : index
    %c0_69 = arith.constant 0 : index
    %74 = vector.load %arg4[%c0_66, %c0_67, %c0_68, %c0_69] : memref<1x16x16x128xf32, #tpu.memory_space<vmem>>, vector<1x16x16x128xf32>
    %75 = vector.shape_cast %74 : vector<1x16x16x128xf32> to vector<16x16x128xf32>
    %76 = vector.shape_cast %73 : vector<16x16x128xf32> to vector<1x16x16x128xf32>
    tpu.vector_store %arg4[%c0_66, %c0_67, %c0_68, %c0_69], %76 {strides = array<i32>} : memref<1x16x16x128xf32, #tpu.memory_space<vmem>>, vector<1x16x16x128xf32>,
    return
  }
  func.func @transform_0(%arg0: i32) -> (i32, i32, i32, i32) {
    %c0_i32 = arith.constant 0 : i32
    %c0_i32_0 = arith.constant 0 : i32
    %c0_i32_1 = arith.constant 0 : i32
    %c0_i32_2 = arith.constant 0 : i32
    return %arg0, %c0_i32, %c0_i32_0, %c0_i32_1 : i32, i32, i32, i32
  }
  func.func @transform_1(%arg0: i32) -> (i32, i32, i32) {
    %c0_i32 = arith.constant 0 : i32
    %c0_i32_0 = arith.constant 0 : i32
    %c0_i32_1 = arith.constant 0 : i32
    %c0_i32_2 = arith.constant 0 : i32
    return %c0_i32, %c0_i32_0, %c0_i32_1 : i32, i32, i32
  }
  func.func @transform_2(%arg0: i32) -> (i32, i32) {
    %c0_i32 = arith.constant 0 : i32
    %c0_i32_0 = arith.constant 0 : i32
    %c0_i32_1 = arith.constant 0 : i32
    return %c0_i32, %c0_i32_0 : i32, i32
  }
  func.func @transform_3(%arg0: i32) -> (i32, i32, i32, i32) {
    %c0_i32 = arith.constant 0 : i32
    %c0_i32_0 = arith.constant 0 : i32
    %c0_i32_1 = arith.constant 0 : i32
    %c0_i32_2 = arith.constant 0 : i32
    return %arg0, %c0_i32, %c0_i32_0, %c0_i32_1 : i32, i32, i32, i32
  }
}

</mosaic_0001>

<bundles_post_ra>
// kernel: tpu_custom_call.1
= control target key start
LH: loop header
LB: loop body
LE: loop exit
PB: predicated region body
PF: predicated region fallthrough
CT: control target
= control target key end

     0   :  { %8 = vsyncpa [#allocation3], 0  ;;  %s9361_s0 = inlined_call_operand.vmem [shape: bf16[2,18,18,8], index: 0, kind: input, shape index: {}]   ;;  %s9362_s1 = inlined_call_operand.vmem [shape: bf16[9,8,128], index: 1, kind: input, shape index: {}]   ;;  %s9363_s2 = inlined_call_operand.vmem [shape: f32[1,128], index: 2, kind: input, shape index: {}]   ;;  %s9364_s3 = inlined_call_operand.hbm [shape: f32[2,16,16,128], index: 3, kind: output, shape index: {}]  }
   0x1   :  { %10 = vsyncpa [#allocation3 + $0x1], 0  ;;  %s6457_s12 = smov 0   ;;  %s6459_s13 = smov 0  }
   0x2   :  { %s6461_s14 = smov 0   ;;  %s6463_s15 = smov 0  }
   0x3 LB: > { %s6478_s16 = sadd.s32 4294967295, %s6432_s15   ;;  %s5100_s17 = sadd.s32 4294967294, %s6432_s15   ;;  %s6432_s15 = sphi %s6463_s15, %s9644_s15   ;;  %s6428_s14 = sphi %s6461_s14, %s9643_s14   ;;  %s6424_s13 = sphi %s6459_s13, %s9642_s13   ;;  %s6420_s12 = sphi %s6457_s12, %s9641_s12  }
   0x4   : > { %s6482_s18 = sadd.s32 1, %s6432_s15   ;;  %s91_s19 = sadd.s32 1, %s6428_s14 }
   0x5   : > { %s88_s20 = ssub.s32 %s6432_s15, %s6482_s18  ;;  %p101_p0 = scmp.ne.s32.totalorder %s6428_s14, %s6424_s13 }
   0x6   : > { %p89_p1 = scmp.eq.s32.totalorder %s88_s20, 0  ;;  %p102_p2 = scmp.eq.s32.totalorder %s6478_s16, 1 }
   0x7   : > { %p107_p3 = scmp.ne.s32.totalorder %s6424_s13, %s6420_s12  ;;  %p108_p4 = scmp.eq.s32.totalorder %s5100_s17, 1 }
   0x8   : > { %s6493_s21 = scalar_select %p89_p1, %s6428_s14, %s91_s19  }
   0x9   : > { %p6495_p5 = por %p102_p2, %p101_p0  ;;  %p6499_p6 = por %p108_p4, %p107_p3 }
   0xa   : > { %p5103_p7 = scmp.ge.s32.totalorder %s6432_s15, 1  ;;  %p140_p8 = scmp.lt.s32.totalorder %s6432_s15, 3 }
   0xc   : > { %p141_p9 = pnand %p5103_p7, %p140_p8 }
   0xe   : > { %144 = sbr.rel (%p141_p9) target bundleno = 615 (0x267), region = 32 }
  0x13   : > { %v5106_v0 = vld [vmem:[%s9362_s1 + $0x4] sm:$0xf]  ;;  %vm705_vm0 = vcmask 1043456   ;;  %p164_p10 = scmp.lt.s32.totalorder %s6478_s16, 1  ;;  %v202_v2 = vld [vmem:[%s9362_s1] sm:$0xf] }
  0x14   : > { %6143 = vmatprep.subr.msk.bf16.mxu1 %vm705_vm0, %v5106_v0  ;;  %6142 = vmatprep.subr.msk.bf16.mxu0 %vm705_vm0, %v5106_v0  ;;  %v707_v1 = vsel %vm705_vm0, %v5106_v0, 0  ;;  %v5187_v3 = vld [vmem:[%s9362_s1 + $0x8] sm:$0xf]  ;;  %vm219_vm1 = vsmask.f32 3328  ;;  %v6527_v4 = vsel %vm705_vm0, %v202_v2, 0 }
  0x15   : > { %6141 = vmatpush3.bf16.msra.mxu1 %v707_v1  ;;  %5835 = vmatpush3.bf16.msra.mxu0 %v707_v1  ;;  %s165_s28 = scalar_select %p164_p10, %s6478_s16, 1  ;;  %vm220_vm2 = vsmask.f32 7440  ;;  %vm656_vm3 = vcmask 64512   ;;  %v6553_v16 = vsel %vm705_vm0, %v5187_v3, 0  ;;  %vm1210_vm5 = vcmask 1042432  }
  0x16   : > { %6144 = vmatprep.subr.msk.bf16.mxu1 %vm705_vm0, %v202_v2  ;;  %6145 = vmatprep.subr.msk.bf16.mxu0 %vm705_vm0, %v5187_v3  ;;  %vm6568_vm4 = vmor %vm219_vm1, %vm220_vm2  ;;  %vm1211_vm6 = vcmask 1046532   ;;  %s6434_s19 = smov [#allocation2]  }
  0x17   : > { %s6152_s4 = smul.u32 216, %s165_s28  ;;  %vm6854_vm7 = vmor %vm1210_vm5, %vm1211_vm6  ;;  %s6376_s20 = sshll.u32 %s6434_s19, 4  ;;  %s6377_s20 = int_to_ptr.vmem [resolvable:$false] %s6376_s20 }
  0x18   : > { %s6378_s24 = scalar_lea.vmem %s6377_s20, 8192 }
  0x19   : > { %s6524_s7 = scalar_lea.vmem %s9361_s0, %s6152_s4  ;;  %s161_s4 = sand.u32 1, %s6424_s13  }
  0x1a   : > { %v6530_v5 = vld [vmem:[%s6524_s7] sm:$0xf]  ;;  %v6533_v6 = vld [vmem:[%s6524_s7 + $0x4] sm:$0xf]  ;;  %v6536_v7 = vld [vmem:[%s6524_s7 + $0x8] sm:$0x1] }
  0x1b   : > { %v223_v8 = vshrl.u32 %v6530_v5, 16  ;;  %v226_v9 = vshll.u32 %v6530_v5, 16  ;;  %v232_v10 = vshll.u32 %v6533_v6, 16  ;;  %v236_v11 = vshrl.u32 %v6533_v6, 16  ;;  %v6543_v12 = vld [vmem:[%s6524_s7 + $0x60] sm:$0xf] }
  0x1c   : > { %v242_v13 = vshll.u32 %v6536_v7, 16  ;;  %v6547_v14 = vld [vmem:[%s6524_s7 + $0x64] sm:$0xf]  ;;  %v6550_v15 = vld [vmem:[%s6524_s7 + $0x68] sm:$0x1]  ;;  %v415_v22 = vshrl.u32 %v6543_v12, 16 }
  0x1d   : > { %v225_v17 = vrot.slane %v223_v8, 4  ;;  %v228_v18 = vrot.slane %v226_v9, 5  ;;  %v234_v19 = vrot.slane %v232_v10, 5  ;;  %v238_v20 = vrot.slane %v236_v11, 4  ;;  %v6561_v29 = vld [vmem:[%s6524_s7 + $0xc] sm:$0xf] }
  0x1e   : > { %v244_v21 = vrot.slane %v242_v13, 5  ;;  %v418_v23 = vshll.u32 %v6543_v12, 16  ;;  %v424_v24 = vshll.u32 %v6547_v14, 16  ;;  %v428_v27 = vshrl.u32 %v6547_v14, 16  ;;  %v6564_v30 = vld [vmem:[%s6524_s7 + $0x10] sm:$0xf] }
  0x1f   : > { %v229_v25 = vor.u32 %v228_v18, %v225_v17  ;;  %v239_v26 = vor.u32 %v238_v20, %v234_v19  ;;  %v434_v28 = vshll.u32 %v6550_v15, 16  ;;  %v417_v33 = vrot.slane %v415_v22, 4  ;;  %v6574_v41 = vld [vmem:[%s6524_s7 + $0x14] sm:$0x1]  ;;  %v6585_v53 = vld [vmem:[%s6524_s7 + $0x6c] sm:$0xf] }
  0x20   : > { %v420_v34 = vrot.slane %v418_v23, 5  ;;  %v426_v35 = vrot.slane %v424_v24, 5  ;;  %v430_v38 = vrot.slane %v428_v27, 4  ;;  %v247_v42 = vshrl.u32 %v6561_v29, 16  ;;  %v6589_v58 = vld [vmem:[%s6524_s7 + $0x70] sm:$0xf] }
  0x21   : > { %v230_v36 = vrot.slane %v229_v25, 4  ;;  %v240_v37 = vrot.slane %v239_v26, 4  ;;  %v436_v39 = vrot.slane %v434_v28, 5  ;;  %v250_v43 = vshll.u32 %v6561_v29, 16  ;;  %v6597_v63 = vld [vmem:[%s6524_s7 + $0x74] sm:$0x1] }
  0x22   : > { %v421_v40 = vor.u32 %v420_v34, %v417_v33  ;;  %v256_v44 = vshll.u32 %v6564_v30, 16  ;;  %v431_v47 = vor.u32 %v430_v38, %v426_v35  ;;  %v260_v48 = vshrl.u32 %v6564_v30, 16  ;;  %v6603_v8 = vld [vmem:[%s6524_s7 + $0x18] sm:$0xf]  ;;  %v6616_v25 = vld [vmem:[%s6524_s7 + $0x20] sm:$0x1] }
  0x23   : > { %v235_v45 = vsel %vm6568_vm4, %v230_v36, %v234_v19  ;;  %v245_v46 = vsel %vm6568_vm4, %v240_v37, %v244_v21  ;;  %v249_v51 = vrot.slane %v247_v42, 4  ;;  %v252_v52 = vrot.slane %v250_v43, 5  ;;  %v6610_v21 = vld [vmem:[%s6524_s7 + $0x1c] sm:$0xf]  ;;  %s9146_s5 = sshll.u32 %s161_s4, 8 }
  0x24   : > { %v5107_v49 = vcombine.low %v235_v45, %v245_v46  ;;  %v422_v50 = vrot.slane %v421_v40, 4  ;;  %v432_v54 = vrot.slane %v431_v47, 4  ;;  %v258_v55 = vrot.slane %v256_v44, 5  ;;  %v6629_v40 = vld [vmem:[%s9362_s1 + $0x10] sm:$0xf]  ;;  %s9171_s6 = scalar_lea.vmem [#allocation2], %s9146_s5 }
  0x25   : > { %v262_v56 = vrot.slane %v260_v48, 4  ;;  %v266_v57 = vshll.u32 %v6574_v41, 16  ;;  %v253_v60 = vor.u32 %v252_v52, %v249_v51  ;;  %v439_v3 = vshrl.u32 %v6585_v53, 16  ;;  %v6634_v46 = vld [vmem:[%s6524_s7 + $0x7c] sm:$0xf]  ;;  %s5038_s8 = sshll.u32 %s9171_s6, 4  ;;  %s9315_s8 = int_to_ptr.vmem [resolvable:$true] %s5038_s8 }
  0x26   : > { %5836 = vmatprep.mubr.msk.bf16.mxu0 %vm656_vm3, %v5107_v49  ;;  %v427_v59 = vsel %vm6568_vm4, %v422_v50, %v426_v35  ;;  %v437_v0 = vsel %vm6568_vm4, %v432_v54, %v436_v39  ;;  %v442_v11 = vshll.u32 %v6585_v53, 16  ;;  %v448_v13 = vshll.u32 %v6589_v58, 16  ;;  %v6623_v35 = vld [vmem:[%s6524_s7 + $0x78] sm:$0xf]  ;;  %s6372_s17 = scalar_lea.vmem %s9315_s8, 4096  ;;  %p6379_p0 = scmp.lt.s32.totalorder %s9315_s8, %s6377_s20 }
  0x27   : > { %v263_v1 = vor.u32 %v262_v56, %v258_v55  ;;  %v268_v2 = vrot.slane %v266_v57, 5  ;;  %v5115_v9 = vcombine.low %v427_v59, %v437_v0  ;;  %v254_v10 = vrot.slane %v253_v60, 4  ;;  %v6641_v56 = vld [vmem:[%s6524_s7 + $0x80] sm:$0x1]  ;;  %p6373_p11 = scmp.ne.s32.totalorder %s9315_s8, %s6372_s17  ;;  %p6380_p1 = scmp.lt.s32.totalorder %s6378_s24, %s6372_s17 }
  0x28   : > { %v441_v18 = vrot.slane %v439_v3, 4  ;;  %v452_v19 = vshrl.u32 %v6589_v58, 16  ;;  %v458_v20 = vshll.u32 %v6597_v63, 16  ;;  %v444_v23 = vrot.slane %v442_v11, 5  ;;  %9402 = vst [vmem:[#allocation5_spill] sm:$0xff] %v6641_v56 }
  0x29   : > { %v264_v17 = vrot.slane %v263_v1, 4  ;;  %5852 = vmatprep.mubr.msk.bf16.mxu1 %vm656_vm3, %v5115_v9  ;;  %v259_v22 = vsel %vm6568_vm4, %v254_v10, %v258_v55  ;;  %v450_v24 = vrot.slane %v448_v13, 5  ;;  %v271_v26 = vshrl.u32 %v6603_v8, 16  ;;  %v6647_v1 = vld [vmem:[%s6524_s7 + $0x24] sm:$0xf]  ;;  %p6374_p12 = pnand %p6373_p11, %p6495_p5  ;;  %p6381_p2 = por %p6380_p1, %p6379_p0 }
  0x2a   : > { %v454_v28 = vrot.slane %v452_v19, 4  ;;  %v460_v33 = vrot.slane %v458_v20, 5  ;;  %v274_v34 = vshll.u32 %v6603_v8, 16  ;;  %v445_v37 = vor.u32 %v444_v23, %v441_v18  ;;  %v6655_v10 = vld [vmem:[%s6524_s7 + $0x28] sm:$0xf] }
  0x2b   : > { %v269_v27 = vsel %vm6568_vm4, %v264_v17, %v268_v2  ;;  %v273_v38 = vrot.slane %v271_v26, 4  ;;  %v280_v39 = vshll.u32 %v6610_v21, 16  ;;  %v284_v44 = vshrl.u32 %v6610_v21, 16  ;;  %v6661_v19 = vld [vmem:[%s9362_s1 + $0xc] sm:$0xf]  ;;  %p6375_p13 = pneg %p6374_p12 }
  0x2c   : > { %v5108_v36 = vcombine.low %v259_v22, %v269_v27  ;;  %v455_v42 = vor.u32 %v454_v28, %v450_v24  ;;  %v276_v43 = vrot.slane %v274_v34, 5  ;;  %v290_v45 = vshll.u32 %v6616_v25, 16 }
  0x2d   : > { %v446_v47 = vrot.slane %v445_v37, 4  ;;  %v282_v48 = vrot.slane %v280_v39, 5  ;;  %v463_v49 = vshrl.u32 %v6623_v35, 16  ;;  %v466_v50 = vshll.u32 %v6623_v35, 16  ;;  %p6382_p3 = pnand %p6381_p2, %p6375_p13 }
  0x2e   : > { %5837 = vmatmul.mubr.msk.bf16.vlgmr.msra.gmra.mxu0 %vm656_vm3, %v5108_v36  ;;  %v456_v51 = vrot.slane %v455_v42, 4  ;;  %v277_v52 = vor.u32 %v276_v43, %v273_v38  ;;  %v286_v54 = vrot.slane %v284_v44, 4  ;;  %v292_v55 = vrot.slane %v290_v45, 5  ;;  %v6673_v36 = vld [vmem:[%s6524_s7 + $0x84] sm:$0xf] }
  0x2f   : > { %5903 = vmatpush3.bf16.msra.mxu0 %v6553_v16  ;;  %v451_v57 = vsel %vm6568_vm4, %v446_v47, %v450_v24  ;;  %v465_v59 = vrot.slane %v463_v49, 4  ;;  %v468_v60 = vrot.slane %v466_v50, 5  ;;  %v472_v0 = vshll.u32 %v6634_v46, 16  ;;  %v6666_v24 = vld [vmem:[%s6524_s7 + $0x2c] sm:$0x1] }
  0x30   : > { %6147 = vmatprep.subr.msk.bf16.mxu0 %vm705_vm0, %v6629_v40  ;;  %v461_v16 = vsel %vm6568_vm4, %v456_v51, %v460_v33  ;;  %v278_v2 = vrot.slane %v277_v52, 4  ;;  %v287_v3 = vor.u32 %v286_v54, %v282_v48  ;;  %v476_v9 = vshrl.u32 %v6634_v46, 16  ;;  %v6680_v43 = vld [vmem:[%s6524_s7 + $0x88] sm:$0xf]  ;;  %v6688_v51 = vld [vmem:[%s6524_s7 + $0x8c] sm:$0x1] }
  0x31   : > { %v5116_v11 = vcombine.low %v451_v57, %v461_v16  ;;  %v469_v13 = vor.u32 %v468_v60, %v465_v59  ;;  %v474_v17 = vrot.slane %v472_v0, 5  ;;  %v482_v18 = vshll.u32 %v6641_v56, 16  ;;  %9403 = vst [vmem:[#allocation6_spill] sm:$0xff] %v6688_v51  ;;  %v6696_v60 = vld [vmem:[%s6524_s7 + $0x30] sm:$0xf] }
  0x32   : > { %v283_v20 = vsel %vm6568_vm4, %v278_v2, %v282_v48  ;;  %v288_v22 = vrot.slane %v287_v3, 4  ;;  %v478_v23 = vrot.slane %v476_v9, 4  ;;  %v295_v26 = vshrl.u32 %v6647_v1, 16  ;;  %v6701_v9 = vld [vmem:[%s6524_s7 + $0x34] sm:$0xf] }
  0x33   : > { %5853 = vmatmul.mubr.msk.bf16.vlgmr.msra.gmra.mxu1 %vm656_vm3, %v5116_v11  ;;  %v470_v27 = vrot.slane %v469_v13, 4  ;;  %v484_v28 = vrot.slane %v482_v18, 5  ;;  %v298_v33 = vshll.u32 %v6647_v1, 16  ;;  %v304_v34 = vshll.u32 %v6655_v10, 16 }
  0x34   : > { %5869 = vmatpush3.bf16.msra.mxu1 %v6527_v4  ;;  %v293_v37 = vsel %vm6568_vm4, %v288_v22, %v292_v55  ;;  %v479_v38 = vor.u32 %v478_v23, %v474_v17  ;;  %v297_v39 = vrot.slane %v295_v26, 4  ;;  %v308_v42 = vshrl.u32 %v6655_v10, 16 }
  0x35   : > { %v5109_v44 = vcombine.low %v283_v20, %v293_v37  ;;  %v475_v45 = vsel %vm6568_vm4, %v470_v27, %v474_v17  ;;  %v300_v47 = vrot.slane %v298_v33, 5  ;;  %v306_v48 = vrot.slane %v304_v34, 5  ;;  %6146 = vmatprep.subr.msk.bf16.mxu1 %vm705_vm0, %v6661_v19  ;;  %v6709_v33 = vld [vmem:[%s6524_s7 + $0x38] sm:$0x1] }
  0x36   : > { %v480_v4 = vrot.slane %v479_v38, 4  ;;  %v310_v49 = vrot.slane %v308_v42, 4  ;;  %v314_v50 = vshll.u32 %v6666_v24, 16  ;;  %v487_v52 = vshrl.u32 %v6673_v36, 16  ;;  %v6714_v38 = vld [vmem:[%s6524_s7 + $0x90] sm:$0xf] }
  0x37   : > { %5840 = vmatprep.mubr.msk.bf16.mxu0 %vm656_vm3, %v5109_v44  ;;  %v301_v54 = vor.u32 %v300_v47, %v297_v39  ;;  %v490_v55 = vshll.u32 %v6673_v36, 16  ;;  %v496_v57 = vshll.u32 %v6680_v43, 16  ;;  %v500_v59 = vshrl.u32 %v6680_v43, 16  ;;  %9404 = vst [vmem:[#allocation7_spill] sm:$0xff] %v6714_v38  ;;  %v6719_v47 = vld [vmem:[%s6524_s7 + $0x94] sm:$0xf] }
  0x38   : > { %v485_v0 = vsel %vm6568_vm4, %v480_v4, %v484_v28  ;;  %v311_v16 = vor.u32 %v310_v49, %v306_v48  ;;  %v316_v2 = vrot.slane %v314_v50, 5  ;;  %v489_v3 = vrot.slane %v487_v52, 4  ;;  %9405 = vst [vmem:[#allocation8_spill] sm:$0xff] %v6719_v47 }
  0x39   : > { %v5117_v11 = vcombine.low %v475_v45, %v485_v0  ;;  %v302_v13 = vrot.slane %v301_v54, 4  ;;  %v492_v17 = vrot.slane %v490_v55, 5  ;;  %v498_v18 = vrot.slane %v496_v57, 5 }
  0x3a   : > { %v312_v20 = vrot.slane %v311_v16, 4  ;;  %v502_v22 = vrot.slane %v500_v59, 4  ;;  %v506_v23 = vshll.u32 %v6688_v51, 16  ;;  %v319_v26 = vshrl.u32 %v6696_v60, 16  ;;  %v6728_v16 = vld [vmem:[%s6524_s7 + $0x98] sm:$0x1] }
  0x3b   : > { %5856 = vmatprep.mubr.msk.bf16.mxu1 %vm656_vm3, %v5117_v11  ;;  %v307_v27 = vsel %vm6568_vm4, %v302_v13, %v306_v48  ;;  %v493_v28 = vor.u32 %v492_v17, %v489_v3  ;;  %v322_v34 = vshll.u32 %v6696_v60, 16  ;;  %v328_v37 = vshll.u32 %v6701_v9, 16  ;;  %9406 = vst [vmem:[#allocation9_spill] sm:$0xff] %v6728_v16  ;;  %v6733_v11 = vld [vmem:[%s6524_s7 + $0x3c] sm:$0xf] }
  0x3c   : > { %v317_v39 = vsel %vm6568_vm4, %v312_v20, %v316_v2  ;;  %v503_v42 = vor.u32 %v502_v22, %v498_v18  ;;  %v508_v44 = vrot.slane %v506_v23, 5  ;;  %v321_v45 = vrot.slane %v319_v26, 4  ;;  %v6738_v23 = vld [vmem:[%s6524_s7 + $0x40] sm:$0xf]  ;;  %v1163_v51 = vld [vmem:[%s6524_s7 + $0xc] sm:$0xe] }
  0x3d   : > { %v5110_v48 = vcombine.low %v307_v27, %v317_v39  ;;  %v494_v4 = vrot.slane %v493_v28, 4  ;;  %v324_v49 = vrot.slane %v322_v34, 5  ;;  %v330_v50 = vrot.slane %v328_v37, 5 }
  0x3e   : > { %v504_v52 = vrot.slane %v503_v42, 4  ;;  %v332_v54 = vshrl.u32 %v6701_v9, 16  ;;  %v338_v55 = vshll.u32 %v6709_v33, 16  ;;  %v511_v57 = vshrl.u32 %v6714_v38, 16 }
  0x3f   : > { %5841 = vmatmul.mubr.msk.bf16.gmra.mxu0 %vm656_vm3, %v5110_v48  ;;  %v499_v59 = vsel %vm6568_vm4, %v494_v4, %v498_v18  ;;  %v325_v0 = vor.u32 %v324_v49, %v321_v45  ;;  %v514_v2 = vshll.u32 %v6714_v38, 16  ;;  %v520_v3 = vshll.u32 %v6719_v47, 16  ;;  %v6747_v48 = vld [vmem:[%s6524_s7 + $0x44] sm:$0x1] }
  0x40   : > { %v509_v13 = vsel %vm6568_vm4, %v504_v52, %v508_v44  ;;  %v334_v17 = vrot.slane %v332_v54, 4  ;;  %v340_v20 = vrot.slane %v338_v55, 5  ;;  %v513_v22 = vrot.slane %v511_v57, 4  ;;  %v6752_v52 = vld [vmem:[%s6524_s7 + $0x9c] sm:$0xf] }
  0x41   : > { %v5118_v18 = vcombine.low %v499_v59, %v509_v13  ;;  %v326_v26 = vrot.slane %v325_v0, 4  ;;  %v516_v27 = vrot.slane %v514_v2, 5  ;;  %v522_v28 = vrot.slane %v520_v3, 5  ;;  %9407 = vst [vmem:[#allocation10_spill] sm:$0xff] %v6752_v52  ;;  %v6756_v13 = vld [vmem:[%s6524_s7 + $0xa0] sm:$0xf] }
  0x42   : > { %v335_v34 = vor.u32 %v334_v17, %v330_v50  ;;  %v524_v37 = vshrl.u32 %v6719_v47, 16  ;;  %v530_v39 = vshll.u32 %v6728_v16, 16  ;;  %v343_v42 = vshrl.u32 %v6733_v11, 16  ;;  %9408 = vst [vmem:[#allocation11_spill] sm:$0xff] %v6756_v13 }
  0x43   : > { %5857 = vmatmul.mubr.msk.bf16.gmra.mxu1 %vm656_vm3, %v5118_v18  ;;  %v331_v44 = vsel %vm6568_vm4, %v326_v26, %v330_v50  ;;  %v517_v45 = vor.u32 %v516_v27, %v513_v22  ;;  %v346_v4 = vshll.u32 %v6733_v11, 16  ;;  %v352_v49 = vshll.u32 %v6738_v23, 16  ;;  %v6762_v26 = vld [vmem:[%s6524_s7 + $0xa4] sm:$0x1] }
  0x44   : > { %v336_v54 = vrot.slane %v335_v34, 4  ;;  %v526_v55 = vrot.slane %v524_v37, 4  ;;  %v532_v57 = vrot.slane %v530_v39, 5  ;;  %v345_v59 = vrot.slane %v343_v42, 4  ;;  %9409 = vst [vmem:[#allocation12_spill] sm:$0xff] %v6762_v26 }
  0x45   : > { %v518_v0 = vrot.slane %v517_v45, 4  ;;  %v348_v2 = vrot.slane %v346_v4, 5  ;;  %v354_v3 = vrot.slane %v352_v49, 5  ;;  %v356_v50 = vshrl.u32 %v6738_v23, 16  ;;  %v6766_v34 = vld [vmem:[%s6524_s7 + $0x48] sm:$0xf] }
  0x46   : > { %v341_v17 = vsel %vm6568_vm4, %v336_v54, %v340_v20  ;;  %v527_v22 = vor.u32 %v526_v55, %v522_v28  ;;  %v362_v18 = vshll.u32 %v6747_v48, 16  ;;  %v535_v27 = vshrl.u32 %v6752_v52, 16 }
  0x47   : > { %v5111_v37 = vcombine.low %v331_v44, %v341_v17  ;;  %v523_v39 = vsel %vm6568_vm4, %v518_v0, %v522_v28  ;;  %v349_v42 = vor.u32 %v348_v2, %v345_v59  ;;  %v358_v45 = vrot.slane %v356_v50, 4  ;;  %v6775_v17 = vld [vmem:[%s6524_s7 + $0x4c] sm:$0xf]  ;;  %v6781_v2 = vld [vmem:[%s6524_s7 + $0x50] sm:$0x1] }
  0x48   : > { %v528_v4 = vrot.slane %v527_v22, 4  ;;  %v364_v49 = vrot.slane %v362_v18, 5  ;;  %v537_v20 = vrot.slane %v535_v27, 4  ;;  %v538_v54 = vshll.u32 %v6752_v52, 16 }
  0x49   : > { %5844 = vmatprep.mubr.msk.bf16.mxu0 %vm656_vm3, %v5111_v37  ;;  %v350_v55 = vrot.slane %v349_v42, 4  ;;  %v359_v62 = vor.u32 %v358_v45, %v354_v3  ;;  %v544_v32 = vshll.u32 %v6756_v13, 16  ;;  %v548_v44 = vshrl.u32 %v6756_v13, 16  ;;  %v6787_v42 = vld [vmem:[%s6524_s7 + $0xa8] sm:$0xf] }
  0x4a   : > { %v533_v28 = vsel %vm6568_vm4, %v528_v4, %v532_v57  ;;  %v540_v59 = vrot.slane %v538_v54, 5  ;;  %v554_v0 = vshll.u32 %v6762_v26, 16  ;;  %v367_v50 = vshrl.u32 %v6766_v34, 16  ;;  %9410 = vst [vmem:[#allocation13_spill] sm:$0xff] %v6787_v42 }
  0x4b   : > { %v5119_v22 = vcombine.low %v523_v39, %v533_v28  ;;  %v355_v18 = vsel %vm6568_vm4, %v350_v55, %v354_v3  ;;  %v360_v27 = vrot.slane %v359_v62, 4  ;;  %v546_v37 = vrot.slane %v544_v32, 5 }
  0x4c   : > { %v541_v45 = vor.u32 %v540_v59, %v537_v20  ;;  %v550_v61 = vrot.slane %v548_v44, 4  ;;  %v556_v57 = vrot.slane %v554_v0, 5  ;;  %v369_v4 = vrot.slane %v367_v50, 4  ;;  %v6797_v44 = vld [vmem:[%s6524_s7 + $0xac] sm:$0xf] }
  0x4d   : > { %5860 = vmatprep.mubr.msk.bf16.mxu1 %vm656_vm3, %v5119_v22  ;;  %v365_v54 = vsel %vm6568_vm4, %v360_v27, %v364_v49  ;;  %v370_v39 = vshll.u32 %v6766_v34, 16  ;;  %v376_v28 = vshll.u32 %v6775_v17, 16  ;;  %v380_v62 = vshrl.u32 %v6775_v17, 16  ;;  %9411 = vst [vmem:[#allocation14_spill] sm:$0xff] %v6797_v44  ;;  %v6800_v22 = vld [vmem:[%s6524_s7 + $0xb0] sm:$0x1] }
  0x4e   : > { %v5112_v3 = vcombine.low %v355_v18, %v365_v54  ;;  %v542_v32 = vrot.slane %v541_v45, 4  ;;  %v551_v55 = vor.u32 %v550_v61, %v546_v37  ;;  %v386_v20 = vshll.u32 %v6781_v2, 16  ;;  %9412 = vst [vmem:[#allocation15_spill] sm:$0xff] %v6800_v22 }
  0x4f   : > { %v372_v59 = vrot.slane %v370_v39, 5  ;;  %v378_v0 = vrot.slane %v376_v28, 5  ;;  %v382_v50 = vrot.slane %v380_v62, 4  ;;  %v559_v49 = vshrl.u32 %v6787_v42, 16  ;;  %v6809_v62 = vld [vmem:[%s6524_s7 + $0x54] sm:$0xf] }
  0x50   : > { %5845 = vmatmul.mubr.msk.bf16.gmra.mxu0 %vm656_vm3, %v5112_v3  ;;  %v547_v18 = vsel %vm6568_vm4, %v542_v32, %v546_v37  ;;  %v552_v27 = vrot.slane %v551_v55, 4  ;;  %v388_v61 = vrot.slane %v386_v20, 5  ;;  %v562_v45 = vshll.u32 %v6787_v42, 16  ;;  %v6816_v55 = vld [vmem:[%s6524_s7 + $0x58] sm:$0xf] }
  0x51   : > { %v373_v54 = vor.u32 %v372_v59, %v369_v4  ;;  %v383_v56 = vor.u32 %v382_v50, %v378_v0  ;;  %v561_v39 = vrot.slane %v559_v49, 4  ;;  %v568_v28 = vshll.u32 %v6797_v44, 16  ;;  %v6819_v49 = vld [vmem:[%s6524_s7 + $0x5c] sm:$0x1] }
  0x52   : > { %v557_v3 = vsel %vm6568_vm4, %v552_v27, %v556_v57  ;;  %v564_v26 = vrot.slane %v562_v45, 5  ;;  %v572_v37 = vshrl.u32 %v6797_v44, 16  ;;  %v578_v32 = vshll.u32 %v6800_v22, 16  ;;  %v1162_v22 = vld [vmem:[%s6524_s7] sm:$0xe] }
  0x53   : > { %v5120_v4 = vcombine.low %v547_v18, %v557_v3  ;;  %v374_v20 = vrot.slane %v373_v54, 4  ;;  %v384_v59 = vrot.slane %v383_v56, 4  ;;  %v570_v50 = vrot.slane %v568_v28, 5  ;;  %v6830_v54 = vld [vmem:[%s6524_s7 + $0xb4] sm:$0xf] }
  0x54   : > { %v565_v42 = vor.u32 %v564_v26, %v561_v39  ;;  %v574_v52 = vrot.slane %v572_v37, 4  ;;  %v580_v13 = vrot.slane %v578_v32, 5  ;;  %v391_v57 = vshrl.u32 %v6809_v62, 16  ;;  %9413 = vst [vmem:[#allocation16_spill] sm:$0xff] %v6830_v54  ;;  %v6833_v37 = vld [vmem:[%s6524_s7 + $0xb8] sm:$0xf] }
  0x55   : > { %5861 = vmatmul.mubr.msk.bf16.gmra.mxu1 %vm656_vm3, %v5120_v4  ;;  %v379_v27 = vsel %vm6568_vm4, %v374_v20, %v378_v0  ;;  %v389_v18 = vsel %vm6568_vm4, %v384_v59, %v388_v61  ;;  %v394_v56 = vshll.u32 %v6809_v62, 16  ;;  %v400_v45 = vshll.u32 %v6816_v55, 16  ;;  %v6838_v61 = vld [vmem:[%s6524_s7 + $0xbc] sm:$0x1] }
  0x56   : > { %v5113_v26 = vcombine.low %v379_v27, %v389_v18  ;;  %v566_v39 = vrot.slane %v565_v42, 4  ;;  %v575_v28 = vor.u32 %v574_v52, %v570_v50  ;;  %v393_v3 = vrot.slane %v391_v57, 4 }
  0x57   : > { %v396_v32 = vrot.slane %v394_v56, 5  ;;  %v402_v4 = vrot.slane %v400_v45, 5  ;;  %v404_v0 = vshrl.u32 %v6816_v55, 16  ;;  %v410_v20 = vshll.u32 %v6819_v49, 16 }
  0x58   : > { %5848 = vmatprep.mubr.msk.bf16.mxu0 %vm656_vm3, %v5113_v26  ;;  %v571_v59 = vsel %vm6568_vm4, %v566_v39, %v570_v50  ;;  %v576_v27 = vrot.slane %v575_v28, 4  ;;  %v583_v52 = vshrl.u32 %v6830_v54, 16  ;;  %v586_v42 = vshll.u32 %v6830_v54, 16 }
  0x59   : > { %v397_v57 = vor.u32 %v396_v32, %v393_v3  ;;  %v406_v18 = vrot.slane %v404_v0, 4  ;;  %v412_v56 = vrot.slane %v410_v20, 5  ;;  %v592_v45 = vshll.u32 %v6833_v37, 16 }
  0x5a   : > { %v581_v44 = vsel %vm6568_vm4, %v576_v27, %v580_v13  ;;  %v585_v16 = vrot.slane %v583_v52, 4  ;;  %v588_v26 = vrot.slane %v586_v42, 5  ;;  %v596_v38 = vshrl.u32 %v6833_v37, 16 }
  0x5b   : > { %v5121_v50 = vcombine.low %v571_v59, %v581_v44  ;;  %v398_v39 = vrot.slane %v397_v57, 4  ;;  %v407_v28 = vor.u32 %v406_v18, %v402_v4  ;;  %v594_v47 = vrot.slane %v592_v45, 5  ;;  %v1164_v57 = vld [vmem:[%s6524_s7 + $0x18] sm:$0xe] }
  0x5c   : > { %v589_v54 = vor.u32 %v588_v26, %v585_v16  ;;  %v598_v3 = vrot.slane %v596_v38, 4  ;;  %v602_v32 = vshll.u32 %v6838_v61, 16  ;;  %v5171_v13 = vrot.slane %v1162_v22, 9 }
  0x5d   : > { %5864 = vmatprep.mubr.msk.bf16.mxu1 %vm656_vm3, %v5121_v50  ;;  %v403_v44 = vsel %vm6568_vm4, %v398_v39, %v402_v4  ;;  %v408_v20 = vrot.slane %v407_v28, 4  ;;  %v1215_v59 = vrot.slane %v6533_v6, 5  ;;  %v5140_v38 = vcombine.low %v6561_v29, %v6564_v30 }
  0x5e   : > { %v590_v16 = vrot.slane %v589_v54, 4  ;;  %v599_v27 = vor.u32 %v598_v3, %v594_v47  ;;  %v604_v52 = vrot.slane %v602_v32, 5  ;;  %v5172_v42 = vrot.slane %v1163_v51, 9 }
  0x5f   : > { %v413_v18 = vsel %vm6568_vm4, %v408_v20, %v412_v56  ;;  %v1216_v22 = vsel %vm6854_vm7, %v5171_v13, %v1215_v59  ;;  %v1217_v45 = vrot.slane %v1215_v59, 4  ;;  %v9416_v4 = vrot.slane %v6564_v30, 5 }
  0x60   : > { %v5114_v50 = vcombine.low %v403_v44, %v413_v18  ;;  %v595_v54 = vsel %vm6568_vm4, %v590_v16, %v594_v47  ;;  %v600_v39 = vrot.slane %v599_v27, 4  ;;  %v5139_v51 = vcombine.low %v6530_v5, %v6533_v6  ;;  %v1165_v27 = vld [vmem:[%s6524_s7 + $0x24] sm:$0xe] }
  0x61   : > { %v1224_v26 = vrot.slane %v9416_v4, 4  ;;  %v9417_v28 = vrot.slane %v6536_v7, 5  ;;  %v9418_v3 = vmov %v9416_v4  ;;  %v5141_v13 = vcombine.low %v6603_v8, %v6610_v21  ;;  %v1167_v4 = vld [vmem:[%s6524_s7 + $0x3c] sm:$0xe] }
  0x62   : > { %v1223_v32 = vsel %vm6854_vm7, %v5172_v42, %v9418_v3  ;;  %v5173_v44 = vrot.slane %v1164_v57, 9  ;;  %5849 = vmatmul.mubr.msk.bf16.gmra.mxu0 %vm656_vm3, %v5114_v50  ;;  %v605_v47 = vsel %vm6568_vm4, %v600_v39, %v604_v52  ;;  %v9419_v6 = vrot.slane %v6574_v41, 5  ;;  %v1166_v42 = vld [vmem:[%s6524_s7 + $0x30] sm:$0xe]  ;;  %v1168_v39 = vld [vmem:[%s6524_s7 + $0x48] sm:$0xe] }
  0x63   : > { %v1219_v56 = vsel %vm6854_vm7, %v1217_v45, %v9417_v28  ;;  %v1229_v20 = vrot.slane %v6610_v21, 5  ;;  %v5122_v59 = vcombine.low %v595_v54, %v605_v47  ;;  %v1232_v16 = vrot.slane %v6616_v25, 5  ;;  %v1169_v47 = vld [vmem:[%s6524_s7 + $0x54] sm:$0xe]  ;;  %v7149_v21 = vld [vmem:[%s6524_s7 + $0x2c] sm:$0x1] }
  0x64   : > { %v5188_v5 = vcombine.low %v1216_v22, %v1219_v56  ;;  %v1226_v7 = vsel %vm6854_vm7, %v1224_v26, %v9419_v6  ;;  %v1783_v52 = vsel %vm705_vm0, %v6661_v19, 0  ;;  %v1236_v18 = vrot.slane %v6655_v10, 5 }
  0x65   : > { %v1230_v41 = vsel %vm6854_vm7, %v5173_v44, %v1229_v20  ;;  %v1231_v57 = vrot.slane %v1229_v20, 4  ;;  %5865 = vmatmul.mubr.msk.bf16.gmra.mxu1 %vm656_vm3, %v5122_v59  ;;  %v5189_v22 = vcombine.low %v1223_v32, %v1226_v7  ;;  %v2509_v25 = vsel %vm705_vm0, %v6629_v40, 0 }
  0x66   : > { %5904 = vmatprep.mubr.msk.bf16.mxu0 %vm656_vm3, %v5188_v5  ;;  %v1243_v45 = vrot.slane %v6701_v9, 5  ;;  %5870 = vmatprep.mubr.msk.bf16.mxu1 %vm656_vm3, %v5139_v51  ;;  %v5174_v26 = vrot.slane %v1165_v27, 9  ;;  %v1239_v50 = vrot.slane %v6666_v24, 5  ;;  %v5175_v54 = vrot.slane %v1166_v42, 9  ;;  %v6921_v24 = vld [vmem:[%s9362_s1 + $0x18] sm:$0xf] }
  0x67   : > { %v1233_v19 = vsel %vm6854_vm7, %v1231_v57, %v1232_v16  ;;  %v1238_v56 = vrot.slane %v1236_v18, 4  ;;  %v1246_v32 = vrot.slane %v6709_v33, 5  ;;  %v5176_v44 = vrot.slane %v1167_v4, 9 }
  0x68   : > { %v5190_v28 = vcombine.low %v1230_v41, %v1233_v19  ;;  %v1245_v3 = vrot.slane %v1243_v45, 4  ;;  %v1250_v40 = vrot.slane %v6738_v23, 5  ;;  %v1274_v5 = vrot.slane %v6550_v15, 5 }
  0x69   : > { %v1253_v51 = vrot.slane %v6747_v48, 5  ;;  %v5177_v6 = vrot.slane %v1168_v39, 9  ;;  %v1257_v7 = vrot.slane %v6775_v17, 5  ;;  %v5142_v33 = vcombine.low %v6647_v1, %v6655_v10  ;;  %v1170_v1 = vld [vmem:[%s6524_s7 + $0x60] sm:$0xe] }
  0x6a   : > { %5905 = vmatmul.mubr.msk.bf16.vlgmr.msra.gmra.mxu0 %vm656_vm3, %v5189_v22  ;;  %v1237_v20 = vsel %vm6854_vm7, %v5174_v26, %v1236_v18  ;;  %v1252_v59 = vrot.slane %v1250_v40, 4  ;;  %v1260_v16 = vrot.slane %v6781_v2, 5  ;;  %v1240_v48 = vsel %vm6854_vm7, %v1238_v56, %v1239_v50  ;;  %v6949_v22 = vld [vmem:[%s9362_s1 + $0x14] sm:$0xf]  ;;  %v6974_v50 = vld [vmem:[%s6524_s7 + $0x6c] sm:$0xe] }
  0x6b   : > { %5971 = vmatpush3.bf16.msra.mxu0 %v2509_v25  ;;  %5908 = vmatprep.mubr.msk.bf16.mxu0 %vm656_vm3, %v5190_v28  ;;  %v1244_v27 = vsel %vm6854_vm7, %v5175_v54, %v1243_v45  ;;  %v1247_v42 = vsel %vm6854_vm7, %v1245_v3, %v1246_v32  ;;  %v1259_v41 = vrot.slane %v1257_v7, 4  ;;  %v6939_v10 = vsel %vm6854_vm7, %v5176_v44, %v1250_v40  ;;  %v1173_v39 = vld [vmem:[%s6524_s7 + $0x84] sm:$0xe]  ;;  %v7003_v44 = vld [vmem:[%s6524_s7 + $0x78] sm:$0xe] }
  0x6c   : > { %v6943_v2 = vsel %vm6854_vm7, %v5177_v6, %v1257_v7  ;;  %v5178_v57 = vrot.slane %v1169_v47, 9  ;;  %v1264_v18 = vrot.slane %v6816_v55, 5  ;;  %6149 = vmatprep.subr.msk.bf16.mxu0 %vm705_vm0, %v6921_v24  ;;  %v6959_v25 = vsel %vm6854_vm7, %v1252_v59, %v1253_v51  ;;  %v1174_v40 = vld [vmem:[%s6524_s7 + $0x90] sm:$0xe] }
  0x6d   : > { %5871 = vmatmul.mubr.msk.bf16.vlgmr.msra.gmra.mxu1 %vm656_vm3, %v5140_v38  ;;  %v6963_v45 = vsel %vm6854_vm7, %v1259_v41, %v1260_v16  ;;  %v1267_v4 = vrot.slane %v6819_v49, 5  ;;  %v1271_v19 = vrot.slane %v6547_v14, 5  ;;  %v5191_v29 = vcombine.low %v1237_v20, %v1240_v48  ;;  %v9420_v48 = vld [vmem:[#allocation6_spill] sm:$0xff] }
  0x6e   : > { %5937 = vmatpush3.bf16.msra.mxu1 %v1783_v52  ;;  %5874 = vmatprep.mubr.msk.bf16.mxu1 %vm656_vm3, %v5141_v13  ;;  %v5143_v30 = vcombine.low %v6696_v60, %v6701_v9  ;;  %v1266_v38 = vrot.slane %v1264_v18, 4  ;;  %v5179_v26 = vrot.slane %v1170_v1, 9  ;;  %v5192_v49 = vcombine.low %v1244_v27, %v1247_v42  ;;  %v1175_v42 = vld [vmem:[%s6524_s7 + $0x9c] sm:$0xe] }
  0x6f   : > { %v5144_v52 = vcombine.low %v6733_v11, %v6738_v23  ;;  %v5145_v8 = vcombine.low %v6766_v34, %v6775_v17  ;;  %6148 = vmatprep.subr.msk.bf16.mxu1 %vm705_vm0, %v6949_v22  ;;  %v5193_v60 = vcombine.low %v6939_v10, %v6959_v25  ;;  %v5194_v9 = vcombine.low %v6943_v2, %v6963_v45  ;;  %v9421_v10 = vld [vmem:[#allocation8_spill] sm:$0xff]  ;;  %v9422_v2 = vld [vmem:[#allocation7_spill] sm:$0xff] }
  0x70   : > { %v1273_v54 = vrot.slane %v1271_v19, 4  ;;  %v6993_v28 = vsel %vm6854_vm7, %v5178_v57, %v1264_v18  ;;  %v6997_v56 = vsel %vm6854_vm7, %v1266_v38, %v1267_v4  ;;  %v5180_v32 = vrot.slane %v6974_v50, 9  ;;  %v1176_v18 = vld [vmem:[%s6524_s7 + $0xa8] sm:$0xe]  ;;  %v9424_v38 = vld [vmem:[#allocation11_spill] sm:$0xff] }
  0x71   : > { %v7009_v47 = vsel %vm6854_vm7, %v5179_v26, %v1271_v19  ;;  %v1278_v51 = vrot.slane %v6589_v58, 5  ;;  %v1281_v6 = vrot.slane %v6597_v63, 5  ;;  %v5182_v59 = vrot.slane %v1173_v39, 9  ;;  %v9423_v19 = vld [vmem:[#allocation9_spill] sm:$0xff]  ;;  %v9425_v26 = vld [vmem:[#allocation10_spill] sm:$0xff] }
  0x72   : > { %5909 = vmatmul.mubr.msk.bf16.gmra.mxu0 %vm656_vm3, %v5191_v29  ;;  %v1292_v16 = vrot.slane %v6680_v43, 5  ;;  %v1295_v27 = vrot.slane %v9420_v48, 5  ;;  %v5195_v41 = vcombine.low %v6993_v28, %v6997_v56  ;;  %v7027_v63 = vsel %vm6854_vm7, %v1273_v54, %v1274_v5  ;;  %v9427_v48 = vld [vmem:[#allocation14_spill] sm:$0xff] }
  0x73   : > { %5912 = vmatprep.mubr.msk.bf16.mxu0 %vm656_vm3, %v5192_v49  ;;  %v5181_v1 = vrot.slane %v7003_v44, 9  ;;  %v5183_v4 = vrot.slane %v1174_v40, 9  ;;  %v1299_v15 = vrot.slane %v9421_v10, 5  ;;  %v1280_v5 = vrot.slane %v1278_v51, 4  ;;  %v5285_v57 = vld [vmem:[%s6524_s7 + $0xc] sm:$0xf] }
  0x74   : > { %v7036_v25 = vsel %vm6854_vm7, %v5182_v59, %v1292_v16  ;;  %v1294_v45 = vrot.slane %v1292_v16, 4  ;;  %v1302_v29 = vrot.slane %v9423_v19, 5  ;;  %v5184_v49 = vrot.slane %v1175_v42, 9  ;;  %v9426_v59 = vld [vmem:[#allocation12_spill] sm:$0xff]  ;;  %v9428_v42 = vld [vmem:[#allocation13_spill] sm:$0xff] }
  0x75   : > { %5875 = vmatmul.mubr.msk.bf16.gmra.mxu1 %vm656_vm3, %v5142_v33  ;;  %v1285_v33 = vrot.slane %v6634_v46, 5  ;;  %v7050_v39 = vsel %vm6854_vm7, %v5183_v4, %v1299_v15  ;;  %v1301_v44 = vrot.slane %v1299_v15, 4  ;;  %v1306_v40 = vrot.slane %v9424_v38, 5  ;;  %v9429_v15 = vld [vmem:[#allocation15_spill] sm:$0xff] }
  0x76   : > { %5878 = vmatprep.mubr.msk.bf16.mxu1 %vm656_vm3, %v5143_v30  ;;  %v7046_v54 = vsel %vm6854_vm7, %v1294_v45, %v1295_v27  ;;  %v1309_v16 = vrot.slane %v9426_v59, 5  ;;  %v5185_v45 = vrot.slane %v1176_v18, 9  ;;  %v1313_v4 = vrot.slane %v9427_v48, 5 }
  0x77   : > { %v7060_v27 = vsel %vm6854_vm7, %v1301_v44, %v1302_v29  ;;  %v1316_v50 = vrot.slane %v9429_v15, 5  ;;  %v7070_v19 = vsel %vm6854_vm7, %v5184_v49, %v1306_v40  ;;  %v1308_v7 = vrot.slane %v1306_v40, 4  ;;  %v9430_v29 = vld [vmem:[#allocation16_spill] sm:$0xff]  ;;  %v9431_v15 = vld [vmem:[#allocation5_spill] sm:$0xff]  ;;  %v7085_v49 = vld [vmem:[%s6524_s7 + $0x10] sm:$0xf] }
  0x78   : > { %v7077_v18 = vsel %vm6854_vm7, %v5180_v32, %v1278_v51  ;;  %v7082_v59 = vsel %vm6854_vm7, %v5185_v45, %v1313_v4  ;;  %v1315_v30 = vrot.slane %v1313_v4, 4  ;;  %v5288_v40 = vld [vmem:[%s6524_s7 + $0x18] sm:$0xf]  ;;  %v1287_v20 = vrot.slane %v1285_v33, 4 }
  0x79   : > { %v2027_v44 = vshrl.u32 %v5285_v57, 16  ;;  %v2030_v32 = vshll.u32 %v5285_v57, 16  ;;  %v5196_v51 = vcombine.low %v7009_v47, %v7027_v63  ;;  %v7100_v45 = vsel %vm6854_vm7, %v1280_v5, %v1281_v6  ;;  %v1177_v57 = vld [vmem:[%s6524_s7 + $0xb4] sm:$0xe]  ;;  %v7121_v47 = vld [vmem:[%s6524_s7 + $0x14] sm:$0x1] }
  0x7a   : > { %5913 = vmatmul.mubr.msk.bf16.gmra.mxu0 %vm656_vm3, %v5193_v60  ;;  %v1288_v60 = vrot.slane %v9431_v15, 5  ;;  %v7115_v11 = vsel %vm6854_vm7, %v5181_v1, %v1285_v33  ;;  %v2036_v6 = vshll.u32 %v7085_v49, 16  ;;  %v5289_v63 = vld [vmem:[%s6524_s7 + $0x1c] sm:$0xf]  ;;  %v2040_v17 = vshrl.u32 %v7085_v49, 16 }
  0x7b   : > { %5916 = vmatprep.mubr.msk.bf16.mxu0 %vm656_vm3, %v5194_v9  ;;  %v7090_v9 = vsel %vm6854_vm7, %v1308_v7, %v1309_v16  ;;  %v7106_v7 = vsel %vm6854_vm7, %v1315_v30, %v1316_v50  ;;  %v2029_v5 = vrot.slane %v2027_v44, 4  ;;  %v2032_v34 = vrot.slane %v2030_v32, 5  ;;  %v5291_v15 = vld [vmem:[%s6524_s7 + $0x24] sm:$0xf]  ;;  %v7134_v44 = vld [vmem:[%s6524_s7 + $0x28] sm:$0xf] }
  0x7c   : > { %v2051_v50 = vshrl.u32 %v5288_v40, 16  ;;  %v1289_v1 = vsel %vm6854_vm7, %v1287_v20, %v1288_v60  ;;  %v5186_v33 = vrot.slane %v1177_v57, 9  ;;  %v7129_v30 = vrot.slane %v2036_v6, 5 }
  0x7d   : > { %5879 = vmatmul.mubr.msk.bf16.gmra.mxu1 %vm656_vm3, %v5144_v52  ;;  %v1320_v52 = vrot.slane %v6833_v37, 5  ;;  %v2054_v16 = vshll.u32 %v5288_v40, 16  ;;  %v1323_v23 = vrot.slane %v6838_v61, 5  ;;  %v2042_v4 = vrot.slane %v2040_v17, 4 }
  0x7e   : > { %5882 = vmatprep.mubr.msk.bf16.mxu1 %vm656_vm3, %v5145_v8  ;;  %v5290_v8 = vld [vmem:[%s6524_s7 + $0x20] sm:$0x1]  ;;  %v2053_v3 = vrot.slane %v2051_v50, 4  ;;  %v2060_v13 = vshll.u32 %v5289_v63, 16  ;;  %v2046_v20 = vshll.u32 %v7121_v47, 16  ;;  %v2064_v57 = vshrl.u32 %v5289_v63, 16 }
  0x7f   : > { %v1322_v32 = vrot.slane %v1320_v52, 4  ;;  %v2056_v60 = vrot.slane %v2054_v16, 5  ;;  %v5197_v61 = vcombine.low %v7077_v18, %v7100_v45  ;;  %v5198_v40 = vcombine.low %v7115_v11, %v1289_v1 }
  0x80   : > { %v2033_v6 = vor.u32 %v2032_v34, %v2029_v5  ;;  %v7145_v17 = vrot.slane %v2060_v13, 5  ;;  %v2043_v28 = vor.u32 %v2042_v4, %v7129_v30  ;;  %v2070_v50 = vshll.u32 %v5290_v8, 16  ;;  %v7172_v5 = vld [vmem:[%s6524_s7 + $0x34] sm:$0xf] }
  0x81   : > { %v2057_v56 = vor.u32 %v2056_v60, %v2053_v3  ;;  %v7157_v18 = vsel %vm6854_vm7, %v5186_v33, %v1320_v52  ;;  %v2075_v13 = vshrl.u32 %v5291_v15, 16  ;;  %v2078_v45 = vshll.u32 %v5291_v15, 16  ;;  %v5294_v52 = vld [vmem:[%s6524_s7 + $0x30] sm:$0xf] }
  0x82   : > { %5917 = vmatmul.mubr.msk.bf16.gmra.mxu0 %vm656_vm3, %v5195_v41  ;;  %v2066_v41 = vrot.slane %v2064_v57, 4  ;;  %v2084_v11 = vshll.u32 %v7134_v44, 16  ;;  %v9433_v3 = vcombine.low %v6543_v12, %v6547_v14  ;;  %v7166_v4 = vsel %vm6854_vm7, %v1322_v32, %v1323_v23 }
  0x83   : > { %5920 = vmatprep.mubr.msk.bf16.mxu0 %vm656_vm3, %v5196_v51  ;;  %v9432_v51 = vcombine.low %v6809_v62, %v6816_v55  ;;  %v2048_v62 = vrot.slane %v2046_v20, 5  ;;  %v2088_v63 = vshrl.u32 %v7134_v44, 16  ;;  %v2034_v34 = vrot.slane %v2033_v6, 4 }
  0x84   : > { %v2067_v55 = vor.u32 %v2066_v41, %v7145_v17  ;;  %v2077_v8 = vrot.slane %v2075_v13, 4  ;;  %v2080_v1 = vrot.slane %v2078_v45, 5  ;;  %v7174_v33 = vrot.slane %v2084_v11, 5  ;;  %v7180_v41 = vld [vmem:[%s6524_s7 + $0x38] sm:$0x1] }
  0x85   : > { %5883 = vmatmul.mubr.msk.bf16.gmra.mxu1 %vm656_vm3, %v9432_v51  ;;  %v2044_v12 = vrot.slane %v2043_v28, 4  ;;  %v2058_v14 = vrot.slane %v2057_v56, 4  ;;  %v2072_v16 = vrot.slane %v2070_v50, 5  ;;  %v2090_v23 = vrot.slane %v2088_v63, 4  ;;  %v5297_v13 = vld [vmem:[%s6524_s7 + $0x3c] sm:$0xf] }
  0x86   : > { %5886 = vmatprep.mubr.msk.bf16.mxu1 %vm656_vm3, %v9433_v3  ;;  %v2068_v15 = vrot.slane %v2067_v55, 4  ;;  %v2094_v32 = vshll.u32 %v7149_v21, 16  ;;  %v2099_v20 = vshrl.u32 %v5294_v52, 16  ;;  %v2102_v60 = vshll.u32 %v5294_v52, 16 }
  0x87   : > { %v2081_v57 = vor.u32 %v2080_v1, %v2077_v8  ;;  %v2091_v6 = vor.u32 %v2090_v23, %v7174_v33  ;;  %v2108_v28 = vshll.u32 %v7172_v5, 16  ;;  %v2112_v56 = vshrl.u32 %v7172_v5, 16  ;;  %v5300_v8 = vld [vmem:[%s6524_s7 + $0x48] sm:$0xf]  ;;  %v7207_v1 = vld [vmem:[%s6524_s7 + $0x4c] sm:$0xf] }
  0x88   : > { %v2101_v50 = vrot.slane %v2099_v20, 4  ;;  %v2104_v51 = vrot.slane %v2102_v60, 5  ;;  %v9434_v3 = vcombine.low %v6585_v53, %v6589_v58  ;;  %v5203_v55 = vcombine.low %v7157_v18, %v7166_v4 }
  0x89   : > { %v7186_v45 = vrot.slane %v2108_v28, 5  ;;  %v2114_v11 = vrot.slane %v2112_v56, 4  ;;  %v2049_v63 = vsel %vm6568_vm4, %v2044_v12, %v2048_v62  ;;  %v2063_v52 = vsel %vm6568_vm4, %v2058_v14, %v7145_v17 }
  0x8a   : > { %5921 = vmatmul.mubr.msk.bf16.gmra.mxu0 %vm656_vm3, %v5197_v61  ;;  %v7189_v61 = vld [vmem:[%s6524_s7 + $0x40] sm:$0xf]  ;;  %v9435_v53 = vcombine.low %v6623_v35, %v6634_v46  ;;  %v2073_v58 = vsel %vm6568_vm4, %v2068_v15, %v2072_v16  ;;  %v2082_v23 = vrot.slane %v2081_v57, 4  ;;  %v2105_v20 = vor.u32 %v2104_v51, %v2101_v50  ;;  %v7241_v50 = vld [vmem:[%s6524_s7 + $0x44] sm:$0x1] }
  0x8b   : > { %5924 = vmatprep.mubr.msk.bf16.mxu0 %vm656_vm3, %v5198_v40  ;;  %v2039_v40 = vsel %vm6568_vm4, %v2034_v34, %v7129_v30  ;;  %v2092_v30 = vrot.slane %v2091_v6, 4  ;;  %v2096_v34 = vrot.slane %v2094_v32, 5  ;;  %v2118_v62 = vshll.u32 %v7180_v41, 16  ;;  %v5303_v51 = vld [vmem:[%s6524_s7 + $0x54] sm:$0xf] }
  0x8c   : > { %v2123_v12 = vshrl.u32 %v5297_v13, 16  ;;  %v2126_v17 = vshll.u32 %v5297_v13, 16  ;;  %v7218_v14 = vsel %vm705_vm0, %v6949_v22, 0  ;;  %v2115_v35 = vor.u32 %v2114_v11, %v7186_v45 }
  0x8d   : > { %5887 = vmatmul.mubr.msk.bf16.gmra.mxu1 %vm656_vm3, %v9434_v3  ;;  %v2132_v46 = vshll.u32 %v7189_v61, 16  ;;  %v2136_v16 = vshrl.u32 %v7189_v61, 16  ;;  %v7223_v15 = vcombine.low %v2039_v40, %v2049_v63  ;;  %v7227_v32 = vsel %vm705_vm0, %v6921_v24, 0  ;;  %v7250_v40 = vld [vmem:[%s6524_s7 + $0x58] sm:$0xf] }
  0x8e   : > { %5890 = vmatprep.mubr.msk.bf16.mxu1 %vm656_vm3, %v9435_v53  ;;  %v2147_v60 = vshrl.u32 %v5300_v8, 16  ;;  %v2150_v57 = vshll.u32 %v5300_v8, 16  ;;  %v9436_v6 = vcombine.low %v7036_v25, %v7046_v54  ;;  %v7233_v22 = vcombine.low %v2063_v52, %v2073_v58  ;;  %v7255_v8 = vld [vmem:[%s6524_s7 + $0x50] sm:$0x1] }
  0x8f   : > { %v2087_v28 = vsel %vm6568_vm4, %v2082_v23, %v7174_v33  ;;  %v2097_v56 = vsel %vm6568_vm4, %v2092_v30, %v2096_v34  ;;  %v2156_v24 = vshll.u32 %v7207_v1, 16  ;;  %v9437_v25 = vcombine.low %v7050_v39, %v7060_v27  ;;  %v5306_v34 = vld [vmem:[%s6524_s7 + $0x60] sm:$0xf] }
  0x90   : > { %v2106_v54 = vrot.slane %v2105_v20, 4  ;;  %v2120_v13 = vrot.slane %v2118_v62, 5  ;;  %v2125_v11 = vrot.slane %v2123_v12, 4  ;;  %v2128_v3 = vrot.slane %v2126_v17, 5 }
  0x91   : > { %v2116_v33 = vrot.slane %v2115_v35, 4  ;;  %v7252_v63 = vrot.slane %v2132_v46, 5  ;;  %v2138_v52 = vrot.slane %v2136_v16, 4  ;;  %v2160_v53 = vshrl.u32 %v7207_v1, 16  ;;  %v7272_v35 = vld [vmem:[%s6524_s7 + $0x5c] sm:$0x1] }
  0x92   : > { %5925 = vmatmul.mubr.msk.bf16.gmra.mxu0 %vm656_vm3, %v9436_v6  ;;  %v9438_v39 = vcombine.low %v6673_v36, %v6680_v43  ;;  %v2149_v27 = vrot.slane %v2147_v60, 4  ;;  %v2152_v58 = vrot.slane %v2150_v57, 5  ;;  %v2171_v23 = vshrl.u32 %v5303_v51, 16 }
  0x93   : > { %5928 = vmatprep.mubr.msk.bf16.mxu0 %vm656_vm3, %v9437_v25  ;;  %v2174_v30 = vshll.u32 %v5303_v51, 16  ;;  %v9439_v20 = vcombine.low %v9422_v2, %v9421_v10  ;;  %v7267_v62 = vcombine.low %v2087_v28, %v2097_v56  ;;  %v7269_v12 = vrot.slane %v2156_v24, 5  ;;  %v7285_v28 = vld [vmem:[%s6524_s7 + $0x64] sm:$0xf] }
  0x94   : > { %v2162_v17 = vrot.slane %v2160_v53, 4  ;;  %v2180_v36 = vshll.u32 %v7250_v40, 16  ;;  %v2142_v43 = vshll.u32 %v7241_v50, 16  ;;  %v2173_v46 = vrot.slane %v2171_v23, 4 }
  0x95   : > { %5891 = vmatmul.mubr.msk.bf16.gmra.mxu1 %vm656_vm3, %v9438_v39  ;;  %v2176_v16 = vrot.slane %v2174_v30, 5  ;;  %v2184_v60 = vshrl.u32 %v7250_v40, 16  ;;  %v2111_v10 = vsel %vm6568_vm4, %v2106_v54, %v7186_v45  ;;  %v2121_v2 = vsel %vm6568_vm4, %v2116_v33, %v2120_v13  ;;  %v7307_v30 = vld [vmem:[%s6524_s7 + $0x68] sm:$0x1] }
  0x96   : > { %5894 = vmatprep.mubr.msk.bf16.mxu1 %vm656_vm3, %v9439_v20  ;;  %v2129_v57 = vor.u32 %v2128_v3, %v2125_v11  ;;  %v7282_v6 = vrot.slane %v2180_v36, 5  ;;  %v2139_v56 = vor.u32 %v2138_v52, %v7252_v63  ;;  %v2153_v24 = vor.u32 %v2152_v58, %v2149_v27  ;;  %v5309_v3 = vld [vmem:[%s6524_s7 + $0x6c] sm:$0xf]  ;;  %v7304_v27 = vld [vmem:[%s6524_s7 + $0x70] sm:$0xf] }
  0x97   : > { %v2166_v51 = vshll.u32 %v7255_v8, 16  ;;  %v2186_v25 = vrot.slane %v2184_v60, 4  ;;  %v9440_v53 = vcombine.low %v7070_v19, %v7090_v9  ;;  %v2163_v45 = vor.u32 %v2162_v17, %v7269_v12 }
  0x98   : > { %v2177_v54 = vor.u32 %v2176_v16, %v2173_v46  ;;  %v2195_v13 = vshrl.u32 %v5306_v34, 16  ;;  %v2198_v11 = vshll.u32 %v5306_v34, 16  ;;  %v9441_v33 = vcombine.low %v7082_v59, %v7106_v7  ;;  %v5312_v16 = vld [vmem:[%s6524_s7 + $0x78] sm:$0xf] }
  0x99   : > { %v2187_v52 = vor.u32 %v2186_v25, %v7282_v6  ;;  %v2190_v39 = vshll.u32 %v7272_v35, 16  ;;  %v2204_v19 = vshll.u32 %v7285_v28, 16  ;;  %v2208_v9 = vshrl.u32 %v7285_v28, 16 }
  0x9a   : > { %5929 = vmatmul.mubr.msk.bf16.gmra.mxu0 %vm656_vm3, %v9440_v53  ;;  %v2130_v58 = vrot.slane %v2129_v57, 4  ;;  %v2144_v23 = vrot.slane %v2142_v43, 5  ;;  %v2197_v34 = vrot.slane %v2195_v13, 4  ;;  %v2200_v20 = vrot.slane %v2198_v11, 5 }
  0x9b   : > { %5932 = vmatprep.mubr.msk.bf16.mxu0 %vm656_vm3, %v9441_v33  ;;  %v9442_v59 = vcombine.low %v9425_v26, %v9424_v38  ;;  %v7313_v7 = vcombine.low %v2111_v10, %v2121_v2  ;;  %v2140_v17 = vrot.slane %v2139_v56, 4  ;;  %v2154_v36 = vrot.slane %v2153_v24, 4  ;;  %v7323_v2 = vld [vmem:[%s6524_s7 + $0x7c] sm:$0xf] }
  0x9c   : > { %v7315_v46 = vrot.slane %v2204_v19, 5  ;;  %v9443_v43 = vcombine.low %v9428_v42, %v9427_v48  ;;  %v2164_v60 = vrot.slane %v2163_v45, 4  ;;  %v2168_v57 = vrot.slane %v2166_v51, 5  ;;  %9444 = vst [vmem:[#allocation6_spill] sm:$0xff] %v7323_v2  ;;  %v5315_v19 = vld [vmem:[%s6524_s7 + $0x84] sm:$0xf] }
  0x9d   : > { %5895 = vmatmul.mubr.msk.bf16.gmra.mxu1 %vm656_vm3, %v9442_v59  ;;  %v2178_v25 = vrot.slane %v2177_v54, 4  ;;  %v2210_v38 = vrot.slane %v2208_v9, 4  ;;  %v2188_v26 = vrot.slane %v2187_v52, 4  ;;  %v2192_v53 = vrot.slane %v2190_v39, 5 }
  0x9e   : > { %5898 = vmatprep.mubr.msk.bf16.mxu1 %vm656_vm3, %v9443_v43  ;;  %v2201_v13 = vor.u32 %v2200_v20, %v2197_v34  ;;  %v2219_v10 = vshrl.u32 %v5309_v3, 16  ;;  %v2135_v56 = vsel %vm6568_vm4, %v2130_v58, %v7252_v63  ;;  %v2222_v24 = vshll.u32 %v5309_v3, 16  ;;  %v6210_v63 = vld [vmem:[%s6524_s7 + $0xc] sm:$0xff]   ;;  %v7357_v34 = vld [vmem:[%s6524_s7 + $0x88] sm:$0xf] }
  0x9f   : > { %v2228_v48 = vshll.u32 %v7304_v27, 16  ;;  %v2232_v42 = vshrl.u32 %v7304_v27, 16  ;;  %v2145_v51 = vsel %vm6568_vm4, %v2140_v17, %v2144_v23  ;;  %v2159_v45 = vsel %vm6568_vm4, %v2154_v36, %v7269_v12  ;;  %9445 = vst [vmem:[#allocation8_spill] sm:$0xff] %v7357_v34  ;;  %v7366_v36 = vld [vmem:[%s6524_s7 + $0x74] sm:$0x1] }
  0xa0   : > { %v2211_v54 = vor.u32 %v2210_v38, %v7315_v46  ;;  %v2214_v11 = vshll.u32 %v7307_v30, 16  ;;  %v2169_v3 = vsel %vm6568_vm4, %v2164_v60, %v2168_v57  ;;  %v2183_v33 = vsel %vm6568_vm4, %v2178_v25, %v7282_v6  ;;  %9447 = vst [vmem:[#allocation7_spill] sm:$0xff] %v7366_v36  ;;  %v7376_v38 = vld [vmem:[%s6524_s7 + $0x80] sm:$0x1] }
  0xa1   : > { %v2243_v52 = vshrl.u32 %v5312_v16, 16  ;;  %v2246_v12 = vshll.u32 %v5312_v16, 16  ;;  %v2193_v18 = vsel %vm6568_vm4, %v2188_v26, %v2192_v53  ;;  %v2202_v4 = vrot.slane %v2201_v13, 4  ;;  %9448 = vst [vmem:[#allocation9_spill] sm:$0xff] %v7376_v38  ;;  %v7379_v26 = vld [vmem:[%s6524_s7 + $0x8c] sm:$0x1] }
  0xa2   : > { %5933 = vmatmul.mubr.msk.bf16.gmra.mxu0 %vm656_vm3, %v5203_v55  ;;  %v2221_v55 = vrot.slane %v2219_v10, 4  ;;  %v2252_v39 = vshll.u32 %v7323_v2, 16  ;;  %v2224_v9 = vrot.slane %v2222_v24, 5  ;;  %v7353_v58 = vrot.slane %v2228_v48, 5  ;;  %9449 = vst [vmem:[#allocation11_spill] sm:$0xff] %v7379_v26  ;;  %v6211_v10 = vld [vmem:[%s6524_s7 + $0x18] sm:$0xff]  }
  0xa3   : > { %5972 = vmatprep.mubr.msk.bf16.mxu0 %vm656_vm3, %v7223_v15  ;;  %v2234_v23 = vrot.slane %v2232_v42, 4  ;;  %v2256_v6 = vshrl.u32 %v7323_v2, 16  ;;  %v9446_v15 = vcombine.low %v9430_v29, %v6833_v37  ;;  %v7363_v20 = vcombine.low %v2135_v56, %v2145_v51  ;;  %v5318_v51 = vld [vmem:[%s6524_s7 + $0x90] sm:$0xf] }
  0xa4   : > { %v2212_v59 = vrot.slane %v2211_v54, 4  ;;  %v2216_v17 = vrot.slane %v2214_v11, 5  ;;  %v2245_v16 = vrot.slane %v2243_v52, 4  ;;  %v2248_v43 = vrot.slane %v2246_v12, 5 }
  0xa5   : > { %5899 = vmatmul.mubr.msk.bf16.gmra.mxu1 %vm656_vm3, %v9446_v15  ;;  %v7369_v60 = vrot.slane %v2252_v39, 5  ;;  %v2258_v57 = vrot.slane %v2256_v6, 4  ;;  %v2267_v25 = vshrl.u32 %v5315_v19, 16  ;;  %v7371_v37 = vcombine.low %v2159_v45, %v2169_v3  ;;  %v7390_v45 = vld [vmem:[%s6524_s7 + $0x94] sm:$0xf] }
  0xa6   : > { %5938 = vmatprep.mubr.msk.bf16.mxu1 %vm656_vm3, %v6210_v63  ;;  %v7373_v29 = vcombine.low %v2183_v33, %v2193_v18  ;;  %v2270_v53 = vshll.u32 %v5315_v19, 16  ;;  %v2276_v13 = vshll.u32 %v7357_v34, 16  ;;  %v2207_v56 = vsel %vm6568_vm4, %v2202_v4, %v7315_v46  ;;  %9450 = vst [vmem:[#allocation10_spill] sm:$0xff] %v7390_v45  ;;  %v7398_v33 = vld [vmem:[%s9362_s1 + $0x20] sm:$0xf]  ;;  %v6212_v46 = vld [vmem:[%s6524_s7 + $0x24] sm:$0xff]  }
  0xa7   : > { %v2225_v24 = vor.u32 %v2224_v9, %v2221_v55  ;;  %v2235_v48 = vor.u32 %v2234_v23, %v7353_v58  ;;  %v2238_v42 = vshll.u32 %v7366_v36, 16  ;;  %v2269_v54 = vrot.slane %v2267_v25, 4  ;;  %9451 = vst [vmem:[#allocation12_spill] sm:$0xff] %v7398_v33 }
  0xa8   : > { %v2272_v11 = vrot.slane %v2270_v53, 5  ;;  %v7392_v63 = vrot.slane %v2276_v13, 5  ;;  %v2280_v3 = vshrl.u32 %v7357_v34, 16  ;;  %v2217_v52 = vsel %vm6568_vm4, %v2212_v59, %v2216_v17 }
  0xa9   : > { %v2249_v12 = vor.u32 %v2248_v43, %v2245_v16  ;;  %v2259_v18 = vor.u32 %v2258_v57, %v7369_v60  ;;  %v2262_v4 = vshll.u32 %v7376_v38, 16  ;;  %v2291_v19 = vshrl.u32 %v5318_v51, 16  ;;  %v7432_v57 = vld [vmem:[%s6524_s7 + $0xa0] sm:$0xf] }
  0xaa   : > { %5973 = vmatmul.mubr.msk.bf16.vlgmr.msra.gmra.mxu0 %vm656_vm3, %v7233_v22  ;;  %v2273_v55 = vor.u32 %v2272_v11, %v2269_v54  ;;  %v2282_v39 = vrot.slane %v2280_v3, 4  ;;  %v2294_v9 = vshll.u32 %v5318_v51, 16  ;;  %v5321_v22 = vld [vmem:[%s6524_s7 + $0x9c] sm:$0xf]  ;;  %v7411_v23 = vrot.slane %v2225_v24, 4  ;;  %9453 = vst [vmem:[#allocation13_spill] sm:$0xff] %v7432_v57 }
  0xab   : > { %6039 = vmatpush3.bf16.msra.mxu0 %v7227_v32  ;;  %5976 = vmatprep.mubr.msk.bf16.mxu0 %vm656_vm3, %v7267_v62  ;;  %v7413_v6 = vrot.slane %v2238_v42, 5  ;;  %v2286_v15 = vshll.u32 %v7379_v26, 16  ;;  %v2300_v59 = vshll.u32 %v7390_v45, 16  ;;  %v7420_v32 = vld [vmem:[%s9362_s1 + $0x1c] sm:$0xf]  ;;  %v7425_v62 = vcombine.low %v2207_v56, %v2217_v52 }
  0xac   : > { %9452 = vst [vmem:[#allocation14_spill] sm:$0xff] %v7420_v32  ;;  %6151 = vmatprep.subr.msk.bf16.mxu0 %vm705_vm0, %v7398_v33  ;;  %v7427_v17 = vrot.slane %v2235_v48, 4  ;;  %v2283_v16 = vor.u32 %v2282_v39, %v7392_v63  ;;  %v2304_v43 = vshrl.u32 %v7390_v45, 16  ;;  %v7436_v25 = vrot.slane %v2249_v12, 4  ;;  %v7445_v56 = vld [vmem:[%s6524_s7 + $0x98] sm:$0x1] }
  0xad   : > { %5939 = vmatmul.mubr.msk.bf16.vlgmr.msra.gmra.mxu1 %vm656_vm3, %v6211_v10  ;;  %v7438_v53 = vrot.slane %v2259_v18, 4  ;;  %v7440_v13 = vrot.slane %v2262_v4, 5  ;;  %v7442_v10 = vrot.slane %v2273_v55, 4  ;;  %9454 = vst [vmem:[#allocation15_spill] sm:$0xff] %v7445_v56  ;;  %v2293_v24 = vrot.slane %v2291_v19, 4  ;;  %v6214_v19 = vld [vmem:[%s6524_s7 + $0x3c] sm:$0xff]  }
  0xae   : > { %6005 = vmatpush3.bf16.msra.mxu1 %v7218_v14  ;;  %5942 = vmatprep.mubr.msk.bf16.mxu1 %vm656_vm3, %v6212_v46  ;;  %v2296_v48 = vrot.slane %v2294_v9, 5  ;;  %v2315_v42 = vshrl.u32 %v5321_v22, 16  ;;  %v2318_v51 = vshll.u32 %v5321_v22, 16  ;;  %v6213_v14 = vld [vmem:[%s6524_s7 + $0x30] sm:$0xff]   ;;  %v7454_v11 = vrot.slane %v2286_v15, 5 }
  0xaf   : > { %6150 = vmatprep.subr.msk.bf16.mxu1 %vm705_vm0, %v7420_v32  ;;  %v7456_v3 = vrot.slane %v2300_v59, 5  ;;  %v2324_v46 = vshll.u32 %v7432_v57, 16  ;;  %v5324_v52 = vld [vmem:[%s6524_s7 + $0xa8] sm:$0xf]  ;;  %v7460_v12 = vrot.slane %v2283_v16, 4  ;;  %v2306_v18 = vrot.slane %v2304_v43, 4 }
  0xb0   : > { %v2310_v4 = vshll.u32 %v7445_v56, 16  ;;  %v2328_v55 = vshrl.u32 %v7432_v57, 16  ;;  %v7465_v39 = vld [vmem:[%s6524_s7 + $0xac] sm:$0xf]  ;;  %v2297_v59 = vor.u32 %v2296_v48, %v2293_v24  ;;  %v7489_v16 = vld [vmem:[%s6524_s7 + $0xa4] sm:$0x1] }
  0xb1   : > { %9455 = vst [vmem:[#allocation16_spill] sm:$0xff] %v7465_v39  ;;  %9456 = vst [vmem:[#allocation5_spill] sm:$0xff] %v7489_v16  ;;  %v2317_v43 = vrot.slane %v2315_v42, 4  ;;  %v2320_v22 = vrot.slane %v2318_v51, 5  ;;  %v2339_v54 = vshrl.u32 %v5324_v52, 16  ;;  %v7491_v9 = vrot.slane %v2324_v46, 5 }
  0xb2   : > { %5977 = vmatmul.mubr.msk.bf16.gmra.mxu0 %vm656_vm3, %v7313_v7  ;;  %v2330_v32 = vrot.slane %v2328_v55, 4  ;;  %v2342_v15 = vshll.u32 %v5324_v52, 16  ;;  %v2348_v33 = vshll.u32 %v7465_v39, 16  ;;  %v5327_v57 = vld [vmem:[%s6524_s7 + $0xb4] sm:$0xf]  ;;  %v2307_v24 = vor.u32 %v2306_v18, %v7456_v3 }
  0xb3   : > { %5980 = vmatprep.mubr.msk.bf16.mxu0 %vm656_vm3, %v7363_v20  ;;  %v2289_v20 = vsel %vm6568_vm4, %v7460_v12, %v7454_v11  ;;  %v7501_v48 = vrot.slane %v2310_v4, 5  ;;  %v7504_v42 = vld [vmem:[%s6524_s7 + $0xb0] sm:$0x1]  ;;  %v2341_v51 = vrot.slane %v2339_v54, 4  ;;  %v7507_v46 = vld [vmem:[%s6524_s7 + $0xb8] sm:$0xf]  ;;  %v2321_v18 = vor.u32 %v2320_v22, %v2317_v43 }
  0xb4   : > { %9457 = vst [vmem:[#allocation17_spill] sm:$0xff] %v7504_v42  ;;  %9458 = vst [vmem:[#allocation18_spill] sm:$0xff] %v7507_v46  ;;  %v2344_v52 = vrot.slane %v2342_v15, 5  ;;  %v7511_v55 = vrot.slane %v2348_v33, 5  ;;  %v2352_v11 = vshrl.u32 %v7465_v39, 16  ;;  %v7514_v12 = vrot.slane %v2297_v59, 4 }
  0xb5   : > { %5943 = vmatmul.mubr.msk.bf16.gmra.mxu1 %vm656_vm3, %v6213_v14  ;;  %v2334_v14 = vshll.u32 %v7489_v16, 16  ;;  %v7517_v4 = vld [vmem:[%s6524_s7 + $0xbc] sm:$0x1]  ;;  %v2363_v54 = vshrl.u32 %v5327_v57, 16  ;;  %v2366_v7 = vshll.u32 %v5327_v57, 16  ;;  %v2331_v56 = vor.u32 %v2330_v32, %v7491_v9  ;;  %v6215_v16 = vld [vmem:[%s6524_s7 + $0x48] sm:$0xff]  }
  0xb6   : > { %5946 = vmatprep.mubr.msk.bf16.mxu1 %vm656_vm3, %v6214_v19  ;;  %v2354_v45 = vrot.slane %v2352_v11, 4  ;;  %v2358_v19 = vshll.u32 %v7504_v42, 16  ;;  %v2372_v15 = vshll.u32 %v7507_v46, 16  ;;  %v5330_v33 = vld [vmem:[%s6524_s7 + $0xc0] sm:$0xf]  ;;  %v2345_v26 = vor.u32 %v2344_v52, %v2341_v51  ;;  %v6216_v57 = vld [vmem:[%s6524_s7 + $0x54] sm:$0xff]  }
  0xb7   : > { %v2365_v39 = vrot.slane %v2363_v54, 4  ;;  %v2368_v34 = vrot.slane %v2366_v7, 5  ;;  %v2376_v59 = vshrl.u32 %v7507_v46, 16  ;;  %v7526_v22 = vld [vmem:[%s6524_s7 + $0xc4] sm:$0xf]  ;;  %v2308_v43 = vrot.slane %v2307_v24, 4 }
  0xb8   : > { %v2336_v32 = vrot.slane %v2334_v14, 5  ;;  %v2355_v11 = vor.u32 %v2354_v45, %v7511_v55  ;;  %v2374_v42 = vrot.slane %v2372_v15, 5  ;;  %v2382_v7 = vshll.u32 %v7517_v4, 16  ;;  %v7538_v45 = vld [vmem:[%s6524_s7 + $0xc8] sm:$0x1] }
  0xb9   : > { %v2369_v51 = vor.u32 %v2368_v34, %v2365_v39  ;;  %v2378_v52 = vrot.slane %v2376_v59, 4  ;;  %v2387_v54 = vshrl.u32 %v5330_v33, 16  ;;  %v2322_v46 = vrot.slane %v2321_v18, 4 }
  0xba   : > { %5981 = vmatmul.mubr.msk.bf16.gmra.mxu0 %vm656_vm3, %v7371_v37  ;;  %v2332_v38 = vrot.slane %v2331_v56, 4  ;;  %v2390_v2 = vshll.u32 %v5330_v33, 16  ;;  %v2396_v37 = vshll.u32 %v7526_v22, 16  ;;  %v2346_v24 = vrot.slane %v2345_v26, 4 }
  0xbb   : > { %5984 = vmatprep.mubr.msk.bf16.mxu0 %vm656_vm3, %v7373_v29  ;;  %v2360_v14 = vrot.slane %v2358_v19, 5  ;;  %v2379_v36 = vor.u32 %v2378_v52, %v2374_v42  ;;  %v2389_v15 = vrot.slane %v2387_v54, 4  ;;  %v2356_v34 = vrot.slane %v2355_v11, 4 }
  0xbc   : > { %v2392_v29 = vrot.slane %v2390_v2, 5  ;;  %v7541_v39 = vrot.slane %v2396_v37, 5  ;;  %v2400_v56 = vshrl.u32 %v7526_v22, 16  ;;  %v9459_v26 = vsel %vm6568_vm4, %v7427_v17, %v7413_v6 }
  0xbd   : > { %5947 = vmatmul.mubr.msk.bf16.gmra.mxu1 %vm656_vm3, %v6215_v16  ;;  %v9460_v16 = vsel %vm6568_vm4, %v7411_v23, %v7353_v58  ;;  %v2370_v19 = vrot.slane %v2369_v51, 4  ;;  %v2380_v33 = vrot.slane %v2379_v36, 4  ;;  %v2384_v2 = vrot.slane %v2382_v7, 5  ;;  %v6217_v23 = vld [vmem:[%s6524_s7 + $0x60] sm:$0xff]  }
  0xbe   : > { %5950 = vmatprep.mubr.msk.bf16.mxu1 %vm656_vm3, %v6216_v57  ;;  %v5342_v18 = vcombine.low %v9460_v16, %v9459_v26  ;;  %v9461_v59 = vsel %vm6568_vm4, %v7438_v53, %v7440_v13  ;;  %v9462_v6 = vsel %vm6568_vm4, %v7436_v25, %v7369_v60  ;;  %v2393_v57 = vor.u32 %v2392_v29, %v2389_v15  ;;  %v5368_v13 = vld [vmem:[%s6524_s7 + $0x24] sm:$0xe]  ;;  %v5371_v26 = vld [vmem:[%s6524_s7 + $0x48] sm:$0xe] }
  0xbf   : > { %v5343_v17 = vcombine.low %v9462_v6, %v9461_v59  ;;  %v2402_v11 = vrot.slane %v2400_v56, 4  ;;  %v2406_v58 = vshll.u32 %v7538_v45, 16  ;;  %v9463_v36 = vsel %vm6568_vm4, %v7442_v10, %v7392_v63  ;;  %v6218_v63 = vld [vmem:[%s6524_s7 + $0x6c] sm:$0xff]   ;;  %v5372_v6 = vld [vmem:[%s6524_s7 + $0x54] sm:$0xe] }
  0xc0   : > { %v5344_v51 = vcombine.low %v9463_v36, %v2289_v20  ;;  %v2303_v53 = vsel %vm6568_vm4, %v7514_v12, %v7456_v3  ;;  %v2313_v60 = vsel %vm6568_vm4, %v2308_v43, %v7501_v48  ;;  %v2327_v25 = vsel %vm6568_vm4, %v2322_v46, %v7491_v9  ;;  %v7594_v12 = vld [vmem:[%s6524_s7 + $0xc] sm:$0xe] }
  0xc1   : > { %v2337_v10 = vsel %vm6568_vm4, %v2332_v38, %v2336_v32  ;;  %v2351_v3 = vsel %vm6568_vm4, %v2346_v24, %v7511_v55  ;;  %v2361_v20 = vsel %vm6568_vm4, %v2356_v34, %v2360_v14  ;;  %v2403_v48 = vor.u32 %v2402_v11, %v7541_v39  ;;  %v5369_v55 = vld [vmem:[%s6524_s7 + $0x30] sm:$0xe]  ;;  %v5370_v14 = vld [vmem:[%s6524_s7 + $0x3c] sm:$0xe] }
  0xc2   : > { %5985 = vmatmul.mubr.msk.bf16.gmra.mxu0 %vm656_vm3, %v7425_v62  ;;  %v2375_v62 = vsel %vm6568_vm4, %v2370_v19, %v2374_v42  ;;  %v2385_v38 = vsel %vm6568_vm4, %v2380_v33, %v2384_v2  ;;  %v7601_v9 = vrot.slane %v2393_v57, 4  ;;  %v2770_v46 = vrot.slane %v7085_v49, 5  ;;  %v6219_v57 = vld [vmem:[%s6524_s7 + $0x78] sm:$0xff]  }
  0xc3   : > { %5988 = vmatprep.mubr.msk.bf16.mxu0 %vm656_vm3, %v5342_v18  ;;  %v7605_v43 = vcombine.low %v2303_v53, %v2313_v60  ;;  %v7607_v32 = vrot.slane %v2403_v48, 4  ;;  %v7609_v52 = vrot.slane %v2406_v58, 5  ;;  %v5384_v7 = vrot.slane %v5368_v13, 9  ;;  %v6220_v53 = vld [vmem:[%s6524_s7 + $0x84] sm:$0xff]   ;;  %v5373_v13 = vld [vmem:[%s6524_s7 + $0x60] sm:$0xe] }
  0xc4   : > { %v7612_v54 = vcombine.low %v2327_v25, %v2337_v10  ;;  %v7614_v42 = vcombine.low %v2351_v3, %v2361_v20  ;;  %v5382_v37 = vrot.slane %v7594_v12, 9  ;;  %v2784_v24 = vrot.slane %v7134_v44, 5  ;;  %v6226_v49 = vld [vmem:[%s6524_s7 + $0x18] sm:$0xff]  }
  0xc5   : > { %5951 = vmatmul.mubr.msk.bf16.gmra.mxu1 %vm656_vm3, %v6217_v23  ;;  %v7620_v15 = vcombine.low %v2375_v62, %v2385_v38  ;;  %v2773_v34 = vrot.slane %v7121_v47, 5  ;;  %v2787_v29 = vrot.slane %v7149_v21, 5  ;;  %v5385_v56 = vrot.slane %v5369_v55, 9  ;;  %v5375_v55 = vld [vmem:[%s6524_s7 + $0x78] sm:$0xe] }
  0xc6   : > { %5954 = vmatprep.mubr.msk.bf16.mxu1 %vm656_vm3, %v6218_v63  ;;  %v2399_v16 = vsel %vm6568_vm4, %v7601_v9, %v7541_v39  ;;  %v7631_v44 = vrot.slane %v2770_v46, 4  ;;  %v7635_v18 = vsel %vm6854_vm7, %v5384_v7, %v2784_v24  ;;  %v2786_v19 = vrot.slane %v2784_v24, 4 }
  0xc7   : > { %v2409_v21 = vsel %vm6568_vm4, %v7607_v32, %v7609_v52  ;;  %v2791_v33 = vrot.slane %v7172_v5, 5  ;;  %v2794_v2 = vrot.slane %v7180_v41, 5  ;;  %v5386_v59 = vrot.slane %v5370_v14, 9  ;;  %v6225_v52 = vld [vmem:[%s6524_s7 + $0xc0] sm:$0xff]  }
  0xc8   : > { %v7647_v11 = vsel %vm6854_vm7, %v2786_v19, %v2787_v29  ;;  %v2798_v58 = vrot.slane %v7189_v61, 5  ;;  %v2801_v23 = vrot.slane %v7241_v50, 5  ;;  %v5387_v36 = vrot.slane %v5371_v26, 9  ;;  %v5376_v19 = vld [vmem:[%s6524_s7 + $0x84] sm:$0xe] }
  0xc9   : > { %v5401_v5 = vcombine.low %v7635_v18, %v7647_v11  ;;  %v7657_v41 = vsel %vm6854_vm7, %v5385_v56, %v2791_v33  ;;  %v2793_v60 = vrot.slane %v2791_v33, 4  ;;  %v2805_v25 = vrot.slane %v7207_v1, 5 }
  0xca   : > { %5989 = vmatmul.mubr.msk.bf16.gmra.mxu0 %vm656_vm3, %v5343_v17  ;;  %v7664_v61 = vsel %vm6854_vm7, %v5386_v59, %v2798_v58  ;;  %v2800_v50 = vrot.slane %v2798_v58, 4  ;;  %v2808_v17 = vrot.slane %v7255_v8, 5  ;;  %v5388_v63 = vrot.slane %v5372_v6, 9  ;;  %v9464_v59 = vld [vmem:[#allocation7_spill] sm:$0xff] }
  0xcb   : > { %5992 = vmatprep.mubr.msk.bf16.mxu0 %vm656_vm3, %v5344_v51  ;;  %v7669_v10 = vsel %vm6854_vm7, %v2793_v60, %v2794_v2  ;;  %v7673_v3 = vsel %vm6854_vm7, %v5387_v36, %v2805_v25  ;;  %v2807_v1 = vrot.slane %v2805_v25, 4  ;;  %v2812_v20 = vrot.slane %v7250_v40, 5  ;;  %v5374_v51 = vld [vmem:[%s6524_s7 + $0x6c] sm:$0xe]  ;;  %v6221_v58 = vld [vmem:[%s6524_s7 + $0x90] sm:$0xff]  }
  0xcc   : > { %v5402_v48 = vcombine.low %v7657_v41, %v7669_v10  ;;  %v7682_v8 = vsel %vm6854_vm7, %v2800_v50, %v2801_v23  ;;  %v2815_v62 = vrot.slane %v7272_v35, 5  ;;  %v5389_v38 = vrot.slane %v5373_v13, 9  ;;  %v9465_v36 = vld [vmem:[#allocation6_spill] sm:$0xff]  ;;  %v5377_v60 = vld [vmem:[%s6524_s7 + $0x90] sm:$0xe]  ;;  %v9466_v50 = vld [vmem:[#allocation9_spill] sm:$0xff] }
  0xcd   : > { %5955 = vmatmul.mubr.msk.bf16.gmra.mxu1 %vm656_vm3, %v6219_v57  ;;  %v5403_v40 = vcombine.low %v7664_v61, %v7682_v8  ;;  %v7691_v7 = vsel %vm6854_vm7, %v2807_v1, %v2808_v17  ;;  %v7695_v24 = vsel %vm6854_vm7, %v5388_v63, %v2812_v20  ;;  %v2814_v14 = vrot.slane %v2812_v20, 4 }
  0xce   : > { %5958 = vmatprep.mubr.msk.bf16.mxu1 %vm656_vm3, %v6220_v53  ;;  %v5404_v35 = vcombine.low %v7673_v3, %v7691_v7  ;;  %v2819_v29 = vrot.slane %v7285_v28, 5  ;;  %v2822_v56 = vrot.slane %v7307_v30, 5  ;;  %v5390_v26 = vrot.slane %v5374_v51, 9  ;;  %v9467_v51 = vld [vmem:[#allocation8_spill] sm:$0xff]  ;;  %v5508_v3 = vld [vmem:[%s6524_s7 + $0x48] sm:$0xf] }
  0xcf   : > { %v7704_v33 = vsel %vm6854_vm7, %v2814_v14, %v2815_v62  ;;  %v2826_v2 = vrot.slane %v7304_v27, 5  ;;  %v2829_v6 = vrot.slane %v9464_v59, 5  ;;  %v5391_v57 = vrot.slane %v5375_v55, 9  ;;  %v6222_v27 = vld [vmem:[%s6524_s7 + $0x9c] sm:$0xff]   ;;  %v9475_v55 = vld [vmem:[#allocation18_spill] sm:$0xff] }
  0xd0   : > { %v5405_v23 = vcombine.low %v7695_v24, %v7704_v33  ;;  %v7713_v28 = vsel %vm6854_vm7, %v5389_v38, %v2819_v29  ;;  %v2821_v30 = vrot.slane %v2819_v29, 4  ;;  %v2833_v53 = vrot.slane %v9465_v36, 5  ;;  %v5378_v38 = vld [vmem:[%s6524_s7 + $0x9c] sm:$0xe]  ;;  %v9470_v36 = vld [vmem:[#allocation15_spill] sm:$0xff] }
  0xd1   : > { %v7722_v25 = vsel %vm6854_vm7, %v5390_v26, %v2826_v2  ;;  %v2828_v13 = vrot.slane %v2826_v2, 4  ;;  %v2836_v17 = vrot.slane %v9466_v50, 5  ;;  %v5392_v63 = vrot.slane %v5376_v19, 9  ;;  %v5379_v26 = vld [vmem:[%s6524_s7 + $0xa8] sm:$0xe] }
  0xd2   : > { %5993 = vmatmul.mubr.msk.bf16.gmra.mxu0 %vm656_vm3, %v7605_v43  ;;  %v7729_v1 = vsel %vm6854_vm7, %v2821_v30, %v2822_v56  ;;  %v7733_v43 = vsel %vm6854_vm7, %v5391_v57, %v2833_v53  ;;  %v2835_v20 = vrot.slane %v2833_v53, 4  ;;  %v2840_v62 = vrot.slane %v9467_v51, 5  ;;  %v5381_v57 = vld [vmem:[%s6524_s7 + $0xc0] sm:$0xe]  ;;  %v6223_v19 = vld [vmem:[%s6524_s7 + $0xa8] sm:$0xff]  }
  0xd3   : > { %5996 = vmatprep.mubr.msk.bf16.mxu0 %vm656_vm3, %v7612_v54  ;;  %v7741_v14 = vsel %vm6854_vm7, %v2828_v13, %v2829_v6  ;;  %v9468_v54 = vld [vmem:[#allocation11_spill] sm:$0xff]  ;;  %v5393_v56 = vrot.slane %v5377_v60, 9  ;;  %v2850_v53 = vrot.slane %v9470_v36, 5  ;;  %v5394_v60 = vrot.slane %v5378_v38, 9  ;;  %v9473_v38 = vld [vmem:[#allocation16_spill] sm:$0xff] }
  0xd4   : > { %v2843_v29 = vrot.slane %v9468_v54, 5  ;;  %v7750_v2 = vsel %vm6854_vm7, %v2835_v20, %v2836_v17  ;;  %v7754_v59 = vsel %vm6854_vm7, %v5392_v63, %v2840_v62  ;;  %v2842_v6 = vrot.slane %v2840_v62, 4  ;;  %v5380_v13 = vld [vmem:[%s6524_s7 + $0xb4] sm:$0xe]  ;;  %v9471_v17 = vld [vmem:[#allocation13_spill] sm:$0xff] }
  0xd5   : > { %5959 = vmatmul.mubr.msk.bf16.gmra.mxu1 %vm656_vm3, %v6221_v58  ;;  %v9469_v58 = vld [vmem:[#allocation10_spill] sm:$0xff]  ;;  %v2854_v63 = vrot.slane %v9471_v17, 5  ;;  %v9472_v20 = vld [vmem:[#allocation5_spill] sm:$0xff]  ;;  %v5395_v62 = vrot.slane %v5379_v26, 9  ;;  %v2861_v36 = vrot.slane %v9473_v38, 5  ;;  %v5396_v26 = vrot.slane %v5380_v13, 9 }
  0xd6   : > { %5962 = vmatprep.mubr.msk.bf16.mxu1 %vm656_vm3, %v6222_v27  ;;  %v2847_v30 = vrot.slane %v9469_v58, 5  ;;  %v7764_v50 = vsel %vm6854_vm7, %v2842_v6, %v2843_v29  ;;  %v2857_v51 = vrot.slane %v9472_v20, 5  ;;  %v9474_v17 = vld [vmem:[#allocation17_spill] sm:$0xff]  ;;  %v6224_v27 = vld [vmem:[%s6524_s7 + $0xb4] sm:$0xff]   ;;  %v2774_v39 = vsel %vm6854_vm7, %v7631_v44, %v2773_v34  ;;  %v7981_v7 = vld [vmem:[%s6524_s7 + $0x4c] sm:$0xf] }
  0xd7   : > { %v7779_v29 = vsel %vm6854_vm7, %v5394_v60, %v2854_v63  ;;  %v2856_v6 = vrot.slane %v2854_v63, 4  ;;  %v2864_v20 = vrot.slane %v9474_v17, 5  ;;  %v2863_v38 = vrot.slane %v2861_v36, 4  ;;  %v6371_v44 = vld [vmem:[%s6524_s7 + $0x20] sm:$0x1] }
  0xd8   : > { %v7772_v54 = vsel %vm6854_vm7, %v5393_v56, %v2847_v30  ;;  %v2849_v58 = vrot.slane %v2847_v30, 4  ;;  %v7791_v30 = vsel %vm6854_vm7, %v5395_v62, %v2861_v36  ;;  %v2868_v60 = vrot.slane %v9475_v55, 5 }
  0xd9   : > { %v5397_v63 = vrot.slane %v5381_v57, 9  ;;  %v7807_v55 = vsel %vm6854_vm7, %v2863_v38, %v2864_v20  ;;  %v2875_v57 = vrot.slane %v7526_v22, 5  ;;  %v2771_v22 = vsel %vm6854_vm7, %v5382_v37, %v2770_v46  ;;  %v6228_v38 = vld [vmem:[%s6524_s7 + $0x30] sm:$0xff]  }
  0xda   : > { %5997 = vmatmul.mubr.msk.bf16.gmra.mxu0 %vm656_vm3, %v7614_v42  ;;  %v7787_v56 = vsel %vm6854_vm7, %v2849_v58, %v2850_v53  ;;  %v7800_v42 = vsel %vm6854_vm7, %v2856_v6, %v2857_v51  ;;  %v2871_v53 = vrot.slane %v7517_v4, 5  ;;  %v2870_v58 = vrot.slane %v2868_v60, 4 }
  0xdb   : > { %6000 = vmatprep.mubr.msk.bf16.mxu0 %vm656_vm3, %v7620_v15  ;;  %v7811_v15 = vsel %vm6854_vm7, %v5396_v26, %v2868_v60  ;;  %v2878_v51 = vrot.slane %v7538_v45, 5  ;;  %v5367_v45 = vld [vmem:[%s6524_s7 + $0x18] sm:$0xe]  ;;  %v7851_v9 = vsel %vm6854_vm7, %v5397_v63, %v2875_v57  ;;  %v2877_v46 = vrot.slane %v2875_v57, 4  ;;  %v6227_v26 = vld [vmem:[%s6524_s7 + $0x24] sm:$0xff]  }
  0xdc   : > { %v7839_v32 = vsel %vm6854_vm7, %v2870_v58, %v2871_v53  ;;  %v5383_v37 = vrot.slane %v5367_v45, 9  ;;  %v5399_v34 = vcombine.low %v2771_v22, %v2774_v39  ;;  %v9476_v60 = vld [vmem:[#allocation12_spill] sm:$0xff] }
  0xdd   : > { %5963 = vmatmul.mubr.msk.bf16.gmra.mxu1 %vm656_vm3, %v6223_v19  ;;  %v5349_v19 = vcombine.low %v2399_v16, %v2409_v21  ;;  %v7856_v47 = vsel %vm6854_vm7, %v2877_v46, %v2878_v51  ;;  %v2780_v21 = vrot.slane %v6371_v44, 5  ;;  %v4534_v53 = vsel %vm705_vm0, %v9476_v60, 0  ;;  %v5496_v63 = vld [vmem:[%s6524_s7 + $0x18] sm:$0xf]  ;;  %v5497_v57 = vld [vmem:[%s6524_s7 + $0x1c] sm:$0xf] }
  0xde   : > { %5966 = vmatprep.mubr.msk.bf16.mxu1 %vm656_vm3, %v6224_v27  ;;  %v6370_v27 = vld [vmem:[%s6524_s7 + $0x1c] sm:$0xf]  ;;  %v5499_v51 = vld [vmem:[%s6524_s7 + $0x24] sm:$0xf]  ;;  %v3582_v45 = vshrl.u32 %v5496_v63, 16  ;;  %v3591_v39 = vshll.u32 %v5497_v57, 16 }
  0xdf   : > { %v2777_v36 = vrot.slane %v6370_v27, 5  ;;  %v3585_v27 = vshll.u32 %v5496_v63, 16  ;;  %v3606_v46 = vshrl.u32 %v5499_v51, 16  ;;  %v6230_v44 = vld [vmem:[%s6524_s7 + $0x48] sm:$0xff]   ;;  %v5577_v60 = vld [vmem:[%s6524_s7 + $0x18] sm:$0xe] }
  0xe0   : > { %v7897_v63 = vld [vmem:[%s6524_s7 + $0x2c] sm:$0x1] }
  0xe1   : > { %v2779_v16 = vrot.slane %v2777_v36, 4  ;;  %v2778_v17 = vsel %vm6854_vm7, %v5383_v37, %v2777_v36  ;;  %v7881_v36 = vld [vmem:[%s6524_s7 + $0x28] sm:$0xf]  ;;  %v6229_v37 = vld [vmem:[%s6524_s7 + $0x3c] sm:$0xff]   ;;  %v3608_v18 = vrot.slane %v3606_v46, 4 }
  0xe2   : > { %6001 = vmatmul.mubr.msk.bf16.gmra.mxu0 %vm656_vm3, %v5349_v19  ;;  %v9477_v19 = vld [vmem:[#allocation14_spill] sm:$0xff] }
  0xe3   : > { %6040 = vmatprep.mubr.msk.bf16.mxu0 %vm656_vm3, %v6226_v49  ;;  %v2781_v20 = vsel %vm6854_vm7, %v2779_v16, %v2780_v21  ;;  %v4064_v22 = vsel %vm705_vm0, %v9477_v19, 0  ;;  %v3595_v49 = vshrl.u32 %v5497_v57, 16  ;;  %v3619_v16 = vshrl.u32 %v7881_v36, 16  ;;  %v5498_v21 = vld [vmem:[%s6524_s7 + $0x20] sm:$0x1] }
  0xe4   : > { %v5400_v58 = vcombine.low %v2778_v17, %v2781_v20  ;;  %v3584_v17 = vrot.slane %v3582_v45, 4  ;;  %v3587_v20 = vrot.slane %v3585_v27, 5  ;;  %v5502_v19 = vld [vmem:[%s6524_s7 + $0x30] sm:$0xf]  ;;  %v3601_v45 = vshll.u32 %v5498_v21, 16 }
  0xe5   : > { %5967 = vmatmul.mubr.msk.bf16.gmra.mxu1 %vm656_vm3, %v6225_v52  ;;  %v3609_v52 = vshll.u32 %v5499_v51, 16  ;;  %v3621_v51 = vrot.slane %v3619_v16, 4  ;;  %v5593_v27 = vrot.slane %v5577_v60, 9  ;;  %v4328_v46 = vrot.slane %v5498_v21, 5  ;;  %v5578_v16 = vld [vmem:[%s6524_s7 + $0x24] sm:$0xe] }
  0xe6   : > { %6006 = vmatprep.mubr.msk.bf16.mxu1 %vm656_vm3, %v5399_v34  ;;  %v3615_v34 = vshll.u32 %v7881_v36, 16  ;;  %v6231_v21 = vld [vmem:[%s6524_s7 + $0x54] sm:$0xff]   ;;  %v3633_v10 = vshll.u32 %v5502_v19, 16  ;;  %v6232_v60 = vld [vmem:[%s6524_s7 + $0x60] sm:$0xff]  }
  0xe7   : > { %v3611_v11 = vrot.slane %v3609_v52, 5  ;;  %v3625_v52 = vshll.u32 %v7897_v63, 16 }
  0xea   : > { %6041 = vmatmul.mubr.msk.bf16.vlgmr.msra.gmra.mxu0 %vm656_vm3, %v6227_v26  ;;  %v7893_v26 = vrot.slane %v3591_v39, 5 }
  0xeb   : > { %6107 = vmatpush3.bf16.msra.mxu0 %v4534_v53  ;;  %6044 = vmatprep.mubr.msk.bf16.mxu0 %vm656_vm3, %v6228_v38  ;;  %v3597_v38 = vrot.slane %v3595_v49, 4  ;;  %v4325_v53 = vrot.slane %v5497_v57, 5  ;;  %v7907_v57 = vld [vmem:[%s6524_s7 + $0x34] sm:$0xf] }
  0xed   : > { %6007 = vmatmul.mubr.msk.bf16.vlgmr.msra.gmra.mxu1 %vm656_vm3, %v5400_v58  ;;  %v7902_v58 = vrot.slane %v3615_v34, 5  ;;  %v3598_v39 = vor.u32 %v3597_v38, %v7893_v26  ;;  %v4327_v49 = vrot.slane %v4325_v53, 4  ;;  %v3612_v34 = vor.u32 %v3611_v11, %v3608_v18 }
  0xee   : > { %6073 = vmatpush3.bf16.msra.mxu1 %v4064_v22  ;;  %6010 = vmatprep.mubr.msk.bf16.mxu1 %vm656_vm3, %v5401_v5  ;;  %v7900_v5 = vpop.f32.mrf.mxu0  ;;  %v3588_v22 = vor.u32 %v3587_v20, %v3584_v17  ;;  %v3630_v17 = vshrl.u32 %v5502_v19, 16  ;;  %v3643_v38 = vshrl.u32 %v7907_v57, 16  ;;  %v7932_v61 = vsel %vm6854_vm7, %v5593_v27, %v4325_v53  ;;  %v5505_v19 = vld [vmem:[%s6524_s7 + $0x3c] sm:$0xf] }
  0xef   : > { %v3622_v41 = vor.u32 %v3621_v51, %v7902_v58  ;;  %v3599_v8 = vrot.slane %v3598_v39, 4  ;;  %v3627_v11 = vrot.slane %v3625_v52, 5  ;;  %v5594_v51 = vrot.slane %v5578_v16, 9  ;;  %v7946_v39 = vld [vmem:[%s6524_s7 + $0x38] sm:$0x1] }
  0xf0   : > { %v7924_v20 = vpop.f32.mrf.mxu0  ;;  %v3589_v18 = vrot.slane %v3588_v22, 4  ;;  %v3613_v12 = vrot.slane %v3612_v34, 4  ;;  %v4335_v22 = vrot.slane %v7897_v63, 5  ;;  %v3645_v52 = vrot.slane %v3643_v38, 4 }
  0xf1   : > { %v3623_v27 = vrot.slane %v3622_v41, 4  ;;  %v3654_v34 = vshrl.u32 %v5505_v19, 16  ;;  %v3657_v16 = vshll.u32 %v5505_v19, 16  ;;  %v7959_v41 = vld [vmem:[%s6524_s7 + $0x40] sm:$0xf] }
  0xf2   : > { %6045 = vmatmul.mubr.msk.bf16.gmra.mxu0 %vm656_vm3, %v6229_v37  ;;  %v7943_v53 = vpop.f32.mrf.mxu0  ;;  %v3594_v63 = vsel %vm6568_vm4, %v3589_v18, %v7893_v26  ;;  %v3618_v26 = vsel %vm6568_vm4, %v3613_v12, %v7902_v58  ;;  %v5579_v18 = vld [vmem:[%s6524_s7 + $0x30] sm:$0xe]  ;;  %v3663_v24 = vshll.u32 %v7959_v41, 16  ;;  %v3667_v33 = vshrl.u32 %v7959_v41, 16 }
  0xf3   : > { %6048 = vmatprep.mubr.msk.bf16.mxu0 %vm656_vm3, %v6230_v44  ;;  %v7915_v37 = vpop.f32.mrf.mxu1  ;;  %v4332_v44 = vrot.slane %v7881_v36, 5  ;;  %v3603_v36 = vrot.slane %v3601_v45, 5  ;;  %v3632_v45 = vrot.slane %v3630_v17, 4  ;;  %v3628_v58 = vsel %vm6568_vm4, %v3623_v27, %v3627_v11 }
  0xf4   : > { %9478 = vst [vmem:[#allocation7_spill] sm:$0xff] %v7915_v37  ;;  %v7988_v12 = vpop.f32.mrf.mxu0  ;;  %v3659_v19 = vrot.slane %v3657_v16, 5  ;;  %v3691_v11 = vshrl.u32 %v7981_v7, 16 }
  0xf5   : > { %6011 = vmatmul.mubr.msk.bf16.gmra.mxu1 %vm656_vm3, %v5402_v48  ;;  %v3639_v48 = vshll.u32 %v7907_v57, 16  ;;  %v7939_v6 = vpop.f32.mrf.mxu1  ;;  %v4334_v4 = vrot.slane %v4332_v44, 4  ;;  %v3604_v17 = vsel %vm6568_vm4, %v3599_v8, %v3603_v36  ;;  %v4339_v36 = vrot.slane %v7907_v57, 5  ;;  %v6234_v8 = vld [vmem:[%s6524_s7 + $0x78] sm:$0xff]  }
  0xf6   : > { %6014 = vmatprep.mubr.msk.bf16.mxu1 %vm656_vm3, %v5403_v40  ;;  %v7936_v40 = vsel %vm6854_vm7, %v4327_v49, %v4328_v46  ;;  %9479 = vst [vmem:[#allocation6_spill] sm:$0xff] %v7939_v6  ;;  %v3635_v49 = vrot.slane %v3633_v10, 5  ;;  %v8002_v27 = vcombine.low %v3594_v63, %v3604_v17  ;;  %v8004_v57 = vcombine.low %v3618_v26, %v3628_v58  ;;  %v8018_v17 = vld [vmem:[%s6524_s7 + $0x58] sm:$0xf]  ;;  %v8024_v58 = vld [vmem:[%s6524_s7 + $0x44] sm:$0x1] }
  0xf7   : > { %v7948_v46 = vrot.slane %v3639_v48, 5  ;;  %v7965_v10 = vpop.f32.mrf.mxu1  ;;  %v7972_v48 = vsel %vm6854_vm7, %v5594_v51, %v4332_v44  ;;  %v7976_v38 = vsel %vm6854_vm7, %v4334_v4, %v4335_v22  ;;  %v3656_v51 = vrot.slane %v3654_v34, 4  ;;  %v5511_v34 = vld [vmem:[%s6524_s7 + $0x54] sm:$0xf] }
  0xf8   : > { %9480 = vst [vmem:[#allocation9_spill] sm:$0xff] %v7965_v10  ;;  %v3636_v44 = vor.u32 %v3635_v49, %v3632_v45  ;;  %v3681_v22 = vshll.u32 %v5508_v3, 16  ;;  %v4341_v13 = vrot.slane %v4339_v36, 4  ;;  %v4342_v63 = vrot.slane %v7946_v39, 5  ;;  %v5580_v49 = vld [vmem:[%s6524_s7 + $0x3c] sm:$0xe] }
  0xf9   : > { %v3646_v4 = vor.u32 %v3645_v52, %v7948_v46  ;;  %v8000_v45 = vpop.f32.mrf.mxu1  ;;  %v5595_v52 = vrot.slane %v5579_v18, 9  ;;  %v3660_v18 = vor.u32 %v3659_v19, %v3656_v51  ;;  %v9483_v6 = vcombine.low %v7713_v28, %v7729_v1 }
  0xfa   : > { %6049 = vmatmul.mubr.msk.bf16.gmra.mxu0 %vm656_vm3, %v6231_v21  ;;  %v3687_v21 = vshll.u32 %v7981_v7, 16  ;;  %9481 = vst [vmem:[#allocation8_spill] sm:$0xff] %v8000_v45  ;;  %v3683_v45 = vrot.slane %v3681_v22, 5  ;;  %v3702_v51 = vshrl.u32 %v5511_v34, 16  ;;  %v3705_v19 = vshll.u32 %v5511_v34, 16 }
  0xfb   : > { %6052 = vmatprep.mubr.msk.bf16.mxu0 %vm656_vm3, %v6232_v60  ;;  %v3649_v60 = vshll.u32 %v7946_v39, 16  ;;  %v8021_v26 = vrot.slane %v3646_v4, 4  ;;  %v3693_v39 = vrot.slane %v3691_v11, 4  ;;  %v8059_v22 = vsel %vm6854_vm7, %v4341_v13, %v4342_v63 }
  0xfc   : > { %v8029_v10 = vrot.slane %v3687_v21, 5  ;;  %v9485_v21 = vcombine.low %v7722_v25, %v7741_v14  ;;  %v4346_v25 = vrot.slane %v7959_v41, 5  ;;  %v6236_v14 = vld [vmem:[%s6524_s7 + $0x90] sm:$0xff]   ;;  %v5596_v1 = vrot.slane %v5580_v49, 9  ;;  %v5514_v41 = vld [vmem:[%s6524_s7 + $0x60] sm:$0xf] }
  0xfd   : > { %6015 = vmatmul.mubr.msk.bf16.gmra.mxu1 %vm656_vm3, %v5404_v35  ;;  %v6233_v35 = vld [vmem:[%s6524_s7 + $0x6c] sm:$0xff]   ;;  %v8014_v62 = vrot.slane %v3649_v60, 5  ;;  %v3704_v37 = vrot.slane %v3702_v51, 4 }
  0xfe   : > { %6018 = vmatprep.mubr.msk.bf16.mxu1 %vm656_vm3, %v5405_v23  ;;  %v3678_v23 = vshrl.u32 %v5508_v3, 16  ;;  %v8012_v3 = vrot.slane %v3636_v44, 4  ;;  %v3669_v44 = vrot.slane %v3667_v33, 4  ;;  %v3715_v33 = vshrl.u32 %v8018_v17, 16 }
  0xff   : > { %v8010_v16 = vpop.f32.mrf.mxu0  ;;  %v3694_v13 = vor.u32 %v3693_v39, %v8029_v10  ;;  %v4353_v39 = vrot.slane %v7981_v7, 5  ;;  %v9489_v7 = vcombine.low %v7733_v43, %v7750_v2  ;;  %v9491_v43 = vcombine.low %v7754_v59, %v7764_v50  ;;  %v6237_v2 = vld [vmem:[%s6524_s7 + $0x9c] sm:$0xff]  }
 0x100   : > { %9482 = vst [vmem:[#allocation11_spill] sm:$0xff] %v8010_v16  ;;  %v3680_v60 = vrot.slane %v3678_v23, 4  ;;  %v6235_v23 = vld [vmem:[%s6524_s7 + $0x84] sm:$0xff]   ;;  %v8086_v16 = vld [vmem:[%s6524_s7 + $0x5c] sm:$0x1]  ;;  %v4360_v59 = vrot.slane %v8018_v17, 5 }
 0x101   : > { %v8047_v28 = vpop.f32.mrf.mxu0 }
 0x102   : > { %6053 = vmatmul.mubr.msk.bf16.gmra.mxu0 %vm656_vm3, %v6233_v35  ;;  %v8026_v35 = vrot.slane %v3663_v24, 5  ;;  %v3711_v24 = vshll.u32 %v8018_v17, 16  ;;  %9486 = vst [vmem:[#allocation15_spill] sm:$0xff] %v8047_v28  ;;  %v3707_v28 = vrot.slane %v3705_v19, 5 }
 0x103   : > { %6056 = vmatprep.mubr.msk.bf16.mxu0 %vm656_vm3, %v6234_v8  ;;  %v8035_v4 = vpop.f32.mrf.mxu1  ;;  %v8038_v8 = vld [vmem:[%s6524_s7 + $0x50] sm:$0x1]  ;;  %v8079_v49 = vpop.f32.mrf.mxu0 }
 0x104   : > { %9484 = vst [vmem:[#allocation10_spill] sm:$0xff] %v8035_v4  ;;  %v3670_v34 = vor.u32 %v3669_v44, %v8026_v35  ;;  %v8069_v4 = vrot.slane %v3660_v18, 4  ;;  %v8076_v11 = vrot.slane %v3711_v24, 5  ;;  %v3717_v44 = vrot.slane %v3715_v33, 4  ;;  %9488 = vst [vmem:[#allocation5_spill] sm:$0xff] %v8079_v49 }
 0x105   : > { %6019 = vmatmul.mubr.msk.bf16.gmra.mxu1 %vm656_vm3, %v9483_v6  ;;  %v8055_v6 = vsel %vm6854_vm7, %v5595_v52, %v4339_v36  ;;  %v3684_v36 = vor.u32 %v3683_v45, %v3680_v60  ;;  %v3697_v52 = vshll.u32 %v8038_v8, 16  ;;  %v8074_v63 = vpop.f32.mrf.mxu1  ;;  %v4348_v18 = vrot.slane %v4346_v25, 4  ;;  %v5581_v24 = vld [vmem:[%s6524_s7 + $0x48] sm:$0xe] }
 0x106   : > { %6022 = vmatprep.mubr.msk.bf16.mxu1 %vm656_vm3, %v9485_v21  ;;  %v3673_v21 = vshll.u32 %v8024_v58, 16  ;;  %9487 = vst [vmem:[#allocation13_spill] sm:$0xff] %v8074_v63  ;;  %v4349_v60 = vrot.slane %v8024_v58, 5  ;;  %v3671_v51 = vrot.slane %v3670_v34, 4  ;;  %v3726_v33 = vshrl.u32 %v5514_v41, 16 }
 0x107   : > { %v8092_v63 = vsel %vm6854_vm7, %v5596_v1, %v4346_v25  ;;  %v3685_v45 = vrot.slane %v3684_v36, 4  ;;  %v3695_v49 = vrot.slane %v3694_v13, 4  ;;  %v3699_v58 = vrot.slane %v3697_v52, 5  ;;  %v8107_v36 = vld [vmem:[%s6524_s7 + $0x64] sm:$0xf]  ;;  %v8114_v13 = vpop.f32.mrf.mxu0 }
 0x108   : > { %v3675_v19 = vrot.slane %v3673_v21, 5  ;;  %v3666_v34 = vsel %vm6568_vm4, %v8069_v4, %v8026_v35  ;;  %v3708_v21 = vor.u32 %v3707_v28, %v3704_v37  ;;  %v3718_v1 = vor.u32 %v3717_v44, %v8076_v11  ;;  %9492 = vst [vmem:[#allocation17_spill] sm:$0xff] %v8114_v13  ;;  %v5582_v28 = vld [vmem:[%s6524_s7 + $0x54] sm:$0xe]  ;;  %v6241_v13 = vld [vmem:[%s6524_s7 + $0xcc] sm:$0xff]  }
 0x109   : > { %v3721_v25 = vshll.u32 %v8086_v16, 16  ;;  %v8118_v52 = vsel %vm6854_vm7, %v4348_v18, %v4349_v60  ;;  %v5597_v35 = vrot.slane %v5581_v24, 9  ;;  %v4355_v37 = vrot.slane %v4353_v39, 4 }
 0x10a   : > { %6057 = vmatmul.mubr.msk.bf16.gmra.mxu0 %vm656_vm3, %v6235_v23  ;;  %v3729_v23 = vshll.u32 %v5514_v41, 16  ;;  %v4356_v4 = vrot.slane %v8038_v8, 5  ;;  %v6238_v41 = vld [vmem:[%s6524_s7 + $0xa8] sm:$0xff]   ;;  %v3676_v44 = vsel %vm6568_vm4, %v3671_v51, %v3675_v19  ;;  %v3728_v50 = vrot.slane %v3726_v33, 4 }
 0x10b   : > { %6060 = vmatprep.mubr.msk.bf16.mxu0 %vm656_vm3, %v6236_v14  ;;  %v8098_v14 = vpop.f32.mrf.mxu1  ;;  %v3700_v18 = vsel %vm6568_vm4, %v3695_v49, %v3699_v58  ;;  %v3735_v60 = vshll.u32 %v8107_v36, 16  ;;  %v3739_v8 = vshrl.u32 %v8107_v36, 16  ;;  %v3719_v51 = vrot.slane %v3718_v1, 4  ;;  %v8136_v33 = vld [vmem:[%s6524_s7 + $0x68] sm:$0x1] }
 0x10c   : > { %9490 = vst [vmem:[#allocation16_spill] sm:$0xff] %v8098_v14  ;;  %v3709_v14 = vrot.slane %v3708_v21, 4  ;;  %v3723_v17 = vrot.slane %v3721_v25, 5  ;;  %v5598_v19 = vrot.slane %v5582_v28, 9  ;;  %v9495_v49 = vsel %vm6568_vm4, %v8021_v26, %v8014_v62  ;;  %v5517_v25 = vld [vmem:[%s6524_s7 + $0x6c] sm:$0xf] }
 0x10d   : > { %6023 = vmatmul.mubr.msk.bf16.gmra.mxu1 %vm656_vm3, %v9489_v7  ;;  %v3731_v7 = vrot.slane %v3729_v23, 5  ;;  %v8133_v24 = vpop.f32.mrf.mxu1  ;;  %v8157_v21 = vsel %vm6854_vm7, %v5597_v35, %v4353_v39  ;;  %v8161_v1 = vsel %vm6854_vm7, %v4355_v37, %v4356_v4  ;;  %v8164_v62 = vcombine.low %v3666_v34, %v3676_v44  ;;  %v5583_v4 = vld [vmem:[%s6524_s7 + $0x60] sm:$0xe]  ;;  %v5523_v44 = vld [vmem:[%s6524_s7 + $0x84] sm:$0xf] }
 0x10e   : > { %6026 = vmatprep.mubr.msk.bf16.mxu1 %vm656_vm3, %v9491_v43  ;;  %v3690_v43 = vsel %vm6568_vm4, %v3685_v45, %v8029_v10  ;;  %9493 = vst [vmem:[#allocation18_spill] sm:$0xff] %v8133_v24  ;;  %v9496_v45 = vsel %vm6568_vm4, %v8012_v3, %v7948_v46  ;;  %v4362_v46 = vrot.slane %v4360_v59, 4  ;;  %v4363_v3 = vrot.slane %v8086_v16, 5 }
 0x10f   : > { %v8151_v23 = vcombine.low %v9496_v45, %v9495_v49  ;;  %9497 = vst [vmem:[#allocation14_spill] sm:$0xff] %v8164_v62  ;;  %v3732_v26 = vor.u32 %v3731_v7, %v3728_v50  ;;  %v8171_v28 = vcombine.low %v3690_v43, %v3700_v18  ;;  %v8173_v39 = vrot.slane %v3735_v60, 5 }
 0x110   : > { %v8139_v10 = vpop.f32.mrf.mxu0  ;;  %v8175_v35 = vrot.slane %v3739_v8, 4  ;;  %v3745_v37 = vshll.u32 %v8136_v33, 16  ;;  %v9499_v34 = vcombine.low %v7772_v54, %v7787_v56  ;;  %v3714_v50 = vsel %vm6568_vm4, %v3709_v14, %v8076_v11  ;;  %v5520_v54 = vld [vmem:[%s6524_s7 + $0x78] sm:$0xf] }
 0x111   : > { %9494 = vst [vmem:[#allocation12_spill] sm:$0xff] %v8139_v10  ;;  %9498 = vst [vmem:[#allocation19_spill] sm:$0xff] %v8171_v28  ;;  %v3724_v7 = vsel %vm6568_vm4, %v3719_v51, %v3723_v17  ;;  %v8195_v43 = vsel %vm6854_vm7, %v5598_v19, %v4360_v59  ;;  %v9501_v56 = vcombine.low %v7779_v29, %v7800_v42  ;;  %v3750_v60 = vshrl.u32 %v5517_v25, 16  ;;  %v8207_v51 = vld [vmem:[%s6524_s7 + $0x7c] sm:$0xf]  ;;  %v6240_v59 = vld [vmem:[%s6524_s7 + $0xc0] sm:$0xff]  }
 0x112   : > { %6061 = vmatmul.mubr.msk.bf16.gmra.mxu0 %vm656_vm3, %v6237_v2  ;;  %v8169_v2 = vld [vmem:[%s6524_s7 + $0x70] sm:$0xf]  ;;  %v8202_v18 = vpop.f32.mrf.mxu0  ;;  %v3753_v8 = vshll.u32 %v5517_v25, 16  ;;  %v8212_v17 = vsel %vm6854_vm7, %v4362_v46, %v4363_v3  ;;  %v8214_v29 = vrot.slane %v3732_v26, 4  ;;  %v5599_v42 = vrot.slane %v5583_v4, 9 }
 0x113   : > { %6064 = vmatprep.mubr.msk.bf16.mxu0 %vm656_vm3, %v6238_v41  ;;  %v6239_v41 = vld [vmem:[%s6524_s7 + $0xb4] sm:$0xff]   ;;  %9502 = vst [vmem:[#allocation21_spill] sm:$0xff] %v8202_v18  ;;  %v3759_v11 = vshll.u32 %v8169_v2, 16  ;;  %v3763_v14 = vshrl.u32 %v8169_v2, 16  ;;  %v4367_v19 = vrot.slane %v8107_v36, 5  ;;  %v8217_v49 = vcombine.low %v3714_v50, %v3724_v7 }
 0x114   : > { %v3742_v45 = vor.u32 %v8175_v35, %v8173_v39  ;;  %v8221_v25 = vrot.slane %v3745_v37, 5  ;;  %v3774_v46 = vshrl.u32 %v5520_v54, 16  ;;  %v3777_v3 = vshll.u32 %v5520_v54, 16  ;;  %v8233_v4 = vld [vmem:[%s6524_s7 + $0x88] sm:$0xf]  ;;  %v8236_v35 = vpop.f32.mrf.mxu0 }
 0x115   : > { %6027 = vmatmul.mubr.msk.bf16.gmra.mxu1 %vm656_vm3, %v9499_v34  ;;  %v8183_v16 = vpop.f32.mrf.mxu1  ;;  %9503 = vst [vmem:[#allocation22_spill] sm:$0xff] %v8217_v49  ;;  %v4370_v34 = vrot.slane %v8136_v33, 5  ;;  %v3783_v36 = vshll.u32 %v8207_v51, 16  ;;  %v3787_v26 = vshrl.u32 %v8207_v51, 16  ;;  %9505 = vst [vmem:[#allocation24_spill] sm:$0xff] %v8236_v35  ;;  %v3752_v33 = vrot.slane %v3750_v60, 4 }
 0x116   : > { %9500 = vst [vmem:[#allocation20_spill] sm:$0xff] %v8183_v16  ;;  %6030 = vmatprep.mubr.msk.bf16.mxu1 %vm656_vm3, %v9501_v56  ;;  %v8225_v56 = vld [vmem:[%s6524_s7 + $0x74] sm:$0x1]  ;;  %v3755_v37 = vrot.slane %v3753_v8, 5  ;;  %v8238_v50 = vrot.slane %v3759_v11, 5  ;;  %v3765_v7 = vrot.slane %v3763_v14, 4  ;;  %v9506_v54 = vcombine.low %v7791_v30, %v7807_v55  ;;  %v8266_v49 = vpop.f32.mrf.mxu0 }
 0x117   : > { %v8228_v58 = vpop.f32.mrf.mxu1  ;;  %v4369_v16 = vrot.slane %v4367_v19, 4  ;;  %v8251_v60 = vld [vmem:[%s6524_s7 + $0x80] sm:$0x1]  ;;  %v8254_v8 = vld [vmem:[%s6524_s7 + $0x6c] sm:$0xe]  ;;  %v3798_v11 = vshrl.u32 %v5523_v44, 16 }
 0x118   : > { %9504 = vst [vmem:[#allocation23_spill] sm:$0xff] %v8228_v58  ;;  %v8247_v58 = vsel %vm6854_vm7, %v5599_v42, %v4367_v19  ;;  %v3801_v14 = vshll.u32 %v5523_v44, 16  ;;  %v3811_v24 = vshrl.u32 %v8233_v4, 16  ;;  %v3776_v19 = vrot.slane %v3774_v46, 4  ;;  %9508 = vst [vmem:[#allocation26_spill] sm:$0xff] %v8266_v49 }
 0x119   : > { %v8262_v42 = vpop.f32.mrf.mxu1  ;;  %v3779_v35 = vrot.slane %v3777_v3, 5  ;;  %v8264_v18 = vrot.slane %v3783_v36, 5  ;;  %v3789_v10 = vrot.slane %v3787_v26, 4  ;;  %v9509_v44 = vcombine.low %v7811_v15, %v7839_v32  ;;  %v8285_v32 = vld [vmem:[%s6524_s7 + $0x8c] sm:$0x1] }
 0x11a   : > { %6065 = vmatmul.mubr.msk.bf16.gmra.mxu0 %vm656_vm3, %v6239_v41  ;;  %v3769_v41 = vshll.u32 %v8225_v56, 16  ;;  %9507 = vst [vmem:[#allocation25_spill] sm:$0xff] %v8262_v42  ;;  %v3756_v30 = vor.u32 %v3755_v37, %v3752_v33  ;;  %v3766_v55 = vor.u32 %v3765_v7, %v8238_v50  ;;  %v3793_v46 = vshll.u32 %v8251_v60, 16  ;;  %v5585_v33 = vld [vmem:[%s6524_s7 + $0x78] sm:$0xe] }
 0x11b   : > { %6068 = vmatprep.mubr.msk.bf16.mxu0 %vm656_vm3, %v6240_v59  ;;  %v3807_v59 = vshll.u32 %v8233_v4, 16  ;;  %v8276_v3 = vrot.slane %v3742_v45, 4  ;;  %v8280_v36 = vsel %vm6854_vm7, %v4369_v16, %v4370_v34  ;;  %v5600_v26 = vrot.slane %v8254_v8, 9  ;;  %v8290_v42 = vpop.f32.mrf.mxu1  ;;  %v5526_v8 = vld [vmem:[%s6524_s7 + $0x90] sm:$0xf] }
 0x11c   : > { %v4381_v15 = vrot.slane %v8207_v51, 5  ;;  %v3800_v37 = vrot.slane %v3798_v11, 4  ;;  %v3803_v7 = vrot.slane %v3801_v14, 5  ;;  %9510 = vst [vmem:[#allocation27_spill] sm:$0xff] %v8290_v42  ;;  %v3771_v45 = vrot.slane %v3769_v41, 5 }
 0x11d   : > { %6031 = vmatmul.mubr.msk.bf16.gmra.mxu1 %vm656_vm3, %v9506_v54  ;;  %v4374_v54 = vrot.slane %v8169_v2, 5  ;;  %v8288_v2 = vrot.slane %v3807_v59, 5  ;;  %v4377_v49 = vrot.slane %v8225_v56, 5  ;;  %v3780_v16 = vor.u32 %v3779_v35, %v3776_v19  ;;  %v8299_v59 = vld [vmem:[%s6524_s7 + $0x94] sm:$0xf] }
 0x11e   : > { %6034 = vmatprep.mubr.msk.bf16.mxu1 %vm656_vm3, %v9509_v44  ;;  %v3813_v44 = vrot.slane %v3811_v24, 4  ;;  %v3790_v34 = vor.u32 %v3789_v10, %v8264_v18  ;;  %v3757_v51 = vrot.slane %v3756_v30, 4  ;;  %v3767_v11 = vrot.slane %v3766_v55, 4 }
 0x11f   : > { %v4376_v62 = vrot.slane %v4374_v54, 4  ;;  %v3795_v14 = vrot.slane %v3793_v46, 5  ;;  %v9511_v24 = vcombine.low %v7932_v61, %v7936_v40  ;;  %v5601_v56 = vrot.slane %v5585_v33, 9 }
 0x120   : > { %v4383_v35 = vrot.slane %v4381_v15, 4  ;;  %v4384_v10 = vrot.slane %v8251_v60, 5  ;;  %v3817_v41 = vshll.u32 %v8285_v32, 16  ;;  %v3814_v30 = vor.u32 %v3813_v44, %v8288_v2 }
 0x121   : > { %v3822_v55 = vshrl.u32 %v5526_v8, 16  ;;  %v3825_v46 = vshll.u32 %v5526_v8, 16  ;;  %v9513_v61 = vcombine.low %v7851_v9, %v7856_v47  ;;  %v3781_v40 = vrot.slane %v3780_v16, 4 }
 0x122   : > { %v8295_v28 = vpop.f32.mrf.mxu0  ;;  %6069 = vmatmul.mubr.msk.bf16.gmra.mxu0 %vm656_vm3, %v6241_v13  ;;  %v3804_v13 = vor.u32 %v3803_v7, %v3800_v37  ;;  %v3791_v33 = vrot.slane %v3790_v34, 4  ;;  %v3831_v60 = vshll.u32 %v8299_v59, 16  ;;  %v3748_v37 = vsel %vm6568_vm4, %v8276_v3, %v8221_v25 }
 0x123   : > { %6108 = vmatprep.mubr.msk.bf16.mxu0 %vm656_vm3, %v9511_v24  ;;  %v3835_v24 = vshrl.u32 %v8299_v59, 16  ;;  %v3762_v9 = vsel %vm6568_vm4, %v3757_v51, %v8238_v50  ;;  %v8331_v47 = vsel %vm6854_vm7, %v5600_v26, %v4374_v54  ;;  %v8335_v7 = vsel %vm6854_vm7, %v4376_v62, %v4377_v49  ;;  %v5586_v54 = vld [vmem:[%s6524_s7 + $0x84] sm:$0xe]  ;;  %v9552_v31 = vld [vmem:[#allocation27_spill] sm:$0xff] }
 0x124   : > { %v8307_v19 = vpop.f32.mrf.mxu0  ;;  %v8343_v25 = vsel %vm6854_vm7, %v5601_v56, %v4381_v15  ;;  %v8347_v50 = vsel %vm6854_vm7, %v4383_v35, %v4384_v10  ;;  %v3819_v3 = vrot.slane %v3817_v41, 5  ;;  %v3805_v62 = vrot.slane %v3804_v13, 4  ;;  %v8371_v13 = vld [vmem:[%s6524_s7 + $0x98] sm:$0x1] }
 0x125   : > { %9512 = vst [vmem:[#allocation28_spill] sm:$0xff] %v8307_v19  ;;  %v8310_v42 = vpop.f32.mrf.mxu1  ;;  %6035 = vmatmul.mubr.msk.bf16.gmra.mxu1 %vm656_vm3, %v9513_v61  ;;  %v3815_v49 = vrot.slane %v3814_v30, 4  ;;  %v3824_v16 = vrot.slane %v3822_v55, 4  ;;  %v3827_v34 = vrot.slane %v3825_v46, 5  ;;  %v3786_v15 = vsel %vm6568_vm4, %v3781_v40, %v8264_v18  ;;  %v5529_v30 = vld [vmem:[%s6524_s7 + $0x9c] sm:$0xf] }
 0x126   : > { %v8318_v19 = vpop.f32.mrf.mxu0  ;;  %6074 = vmatprep.mubr.msk.bf16.mxu1 %vm656_vm3, %v8002_v27  ;;  %v3772_v27 = vsel %vm6568_vm4, %v3767_v11, %v3771_v45  ;;  %v3796_v45 = vsel %vm6568_vm4, %v3791_v33, %v3795_v14  ;;  %v8359_v51 = vrot.slane %v3831_v60, 5  ;;  %v3837_v11 = vrot.slane %v3835_v24, 4  ;;  %v8402_v24 = vld [vmem:[%s6524_s7 + $0xa0] sm:$0xf] }
 0x127   : > { %v8337_v44 = vpop.f32.mrf.mxu1  ;;  %v9514_v35 = vcombine.low %v7972_v48, %v7976_v38  ;;  %v5615_v10 = vcombine.low %v8195_v43, %v8212_v17  ;;  %v5616_v41 = vcombine.low %v8247_v58, %v8280_v36  ;;  %v5602_v18 = vrot.slane %v5586_v54, 9 }
 0x128   : > { %v8350_v26 = vpop.f32.mrf.mxu0  ;;  %v4388_v14 = vrot.slane %v8233_v4, 5  ;;  %v9515_v48 = vcombine.low %v8055_v6, %v8059_v22  ;;  %v9516_v38 = vsel %vm6568_vm4, %v8214_v29, %v8173_v39  ;;  %v8387_v61 = vcombine.low %v3762_v9, %v3772_v27  ;;  %v5587_v29 = vld [vmem:[%s6524_s7 + $0x90] sm:$0xe]  ;;  %v9523_v4 = vld [vmem:[#allocation5_spill] sm:$0xff] }
 0x129   : > { %v8352_v8 = vpop.f32.mrf.mxu1  ;;  %v8385_v46 = vcombine.low %v9516_v38, %v3748_v37  ;;  %v8393_v60 = vcombine.low %v3786_v15, %v3796_v45  ;;  %v3810_v6 = vsel %vm6568_vm4, %v3805_v62, %v8288_v2  ;;  %v3820_v22 = vsel %vm6568_vm4, %v3815_v49, %v3819_v3 }
 0x12a   : > { %v5906_v56 = vpop.f32.mrf.mxu0  ;;  %6109 = vmatmul.mubr.msk.bf16.vlgmr.msra.gmra.mxu0 %vm656_vm3, %v9514_v35  ;;  %v3828_v39 = vor.u32 %v3827_v34, %v3824_v16  ;;  %v3838_v9 = vor.u32 %v3837_v11, %v8359_v51  ;;  %v3841_v27 = vshll.u32 %v8371_v13, 16  ;;  %v3846_v54 = vshrl.u32 %v5529_v30, 16 }
 0x12b   : > { %v8374_v55 = vpop.f32.mrf.mxu1  ;;  %6112 = vmatprep.mubr.msk.bf16.mxu0 %vm656_vm3, %v9515_v48  ;;  %v3849_v15 = vshll.u32 %v5529_v30, 16  ;;  %v8413_v3 = vsel %vm6854_vm7, %v5602_v18, %v4388_v14  ;;  %v4390_v62 = vrot.slane %v4388_v14, 4  ;;  %v4391_v49 = vrot.slane %v8285_v32, 5 }
 0x12c   : > { %v1460_v33 = vpop.f32.mrf.mxu0  ;;  %v5603_v16 = vrot.slane %v5587_v29, 9  ;;  %v4395_v34 = vrot.slane %v8299_v59, 5  ;;  %v3855_v11 = vshll.u32 %v8402_v24, 16  ;;  %v3859_v35 = vshrl.u32 %v8402_v24, 16 }
 0x12d   : > { %v5872_v37 = vpop.f32.mrf.mxu1  ;;  %6075 = vmatmul.mubr.msk.bf16.vlgmr.msra.gmra.mxu1 %vm656_vm3, %v8004_v57  ;;  %v8422_v48 = vcombine.low %v3810_v6, %v3820_v22  ;;  %v8424_v18 = vrot.slane %v3828_v39, 4  ;;  %v3839_v32 = vrot.slane %v3838_v9, 4  ;;  %v3843_v38 = vrot.slane %v3841_v27, 5  ;;  %v5532_v22 = vld [vmem:[%s6524_s7 + $0xa8] sm:$0xf] }
 0x12e   : > { %v1044_v45 = vadd.f32 %v5872_v37, %v7900_v5  ;;  %v5907_v2 = vpop.f32.mrf.mxu0  ;;  %6078 = vmatprep.mubr.msk.bf16.mxu1 %vm656_vm3, %v8151_v23  ;;  %v3848_v29 = vrot.slane %v3846_v54, 4  ;;  %v3851_v59 = vrot.slane %v3849_v15, 5  ;;  %v4398_v6 = vrot.slane %v8371_v13, 5  ;;  %v8450_v27 = vld [vmem:[%s6524_s7 + $0xac] sm:$0xf] }
 0x12f   : > { %v1035_v57 = vpop.f32.mrf.mxu1  ;;  %v3861_v9 = vrot.slane %v3859_v35, 4  ;;  %v9520_v35 = vld [vmem:[#allocation11_spill] sm:$0xff] }
 0x130   : > { %v8419_v5 = vadd.f32 %v5906_v56, %v1044_v45  ;;  %v1036_v23 = vadd.f32 %v1035_v57, %v7924_v20  ;;  %v1463_v30 = vpop.f32.mrf.mxu0  ;;  %v9517_v45 = vcombine.low %v8092_v63, %v8118_v52  ;;  %v8435_v20 = vsel %vm6854_vm7, %v4390_v62, %v4391_v49  ;;  %v5588_v62 = vld [vmem:[%s6524_s7 + $0x9c] sm:$0xe] }
 0x131   : > { %v5873_v14 = vpop.f32.mrf.mxu1  ;;  %v4397_v63 = vrot.slane %v4395_v34, 4  ;;  %v8447_v52 = vrot.slane %v3855_v11, 5  ;;  %v4402_v49 = vrot.slane %v8402_v24, 5  ;;  %v3879_v24 = vshll.u32 %v8450_v27, 16 }
 0x132   : > { %v8426_v37 = vadd.f32 %v1460_v33, %v1036_v23  ;;  %v1047_v40 = vadd.f32 %v5873_v14, %v7943_v53  ;;  %v5910_v56 = vpop.f32.mrf.mxu0  ;;  %6113 = vmatmul.mubr.msk.bf16.gmra.mxu0 %vm656_vm3, %v9517_v45  ;;  %v9518_v33 = vcombine.low %v8157_v21, %v8161_v1  ;;  %v8445_v53 = vsel %vm6854_vm7, %v5603_v16, %v4395_v34  ;;  %v5531_v1 = vld [vmem:[%s6524_s7 + $0xa4] sm:$0x1]  ;;  %v9519_v16 = vld [vmem:[#allocation14_spill] sm:$0xff] }
 0x133   : > { %v1038_v39 = vpop.f32.mrf.mxu1  ;;  %v3834_v21 = vsel %vm6568_vm4, %v8424_v18, %v8359_v51  ;;  %v3870_v34 = vshrl.u32 %v5532_v22, 16  ;;  %v9521_v51 = vld [vmem:[#allocation19_spill] sm:$0xff]  ;;  %v3883_v18 = vshrl.u32 %v8450_v27, 16 }
 0x134   : > { %6116 = vmatprep.mubr.msk.bf16.mxu0 %vm656_vm3, %v9518_v33  ;;  %v8452_v54 = vadd.f32 %v5907_v2, %v1047_v40  ;;  %v1039_v13 = vadd.f32 %v1038_v39, %v7988_v12  ;;  %v1476_v15 = vpop.f32.mrf.mxu0  ;;  %v3844_v40 = vsel %vm6568_vm4, %v3839_v32, %v3843_v38  ;;  %v3852_v2 = vor.u32 %v3851_v59, %v3848_v29  ;;  %v9522_v59 = vld [vmem:[#allocation15_spill] sm:$0xff] }
 0x135   : > { %v5876_v57 = vpop.f32.mrf.mxu1  ;;  %6079 = vmatmul.mubr.msk.bf16.gmra.mxu1 %vm656_vm3, %v9519_v16  ;;  %v3873_v12 = vshll.u32 %v5532_v22, 16  ;;  %v8475_v39 = vsel %vm6854_vm7, %v4397_v63, %v4398_v6  ;;  %v3862_v32 = vor.u32 %v3861_v9, %v8447_v52  ;;  %v3865_v38 = vshll.u32 %v5531_v1, 16 }
 0x136   : > { %v8466_v11 = vadd.f32 %v1463_v30, %v1039_v13  ;;  %v1060_v23 = vadd.f32 %v5876_v57, %v9520_v35  ;;  %v5911_v14 = vpop.f32.mrf.mxu0  ;;  %6082 = vmatprep.mubr.msk.bf16.mxu1 %vm656_vm3, %v9521_v51  ;;  %v5604_v30 = vrot.slane %v5588_v62, 9  ;;  %v4404_v13 = vrot.slane %v4402_v49, 4 }
 0x137   : > { %v1051_v45 = vpop.f32.mrf.mxu1  ;;  %v4405_v57 = vrot.slane %v5531_v1, 5  ;;  %v8483_v51 = vrot.slane %v3852_v2, 4  ;;  %v3872_v6 = vrot.slane %v3870_v34, 4  ;;  %v3875_v63 = vrot.slane %v3873_v12, 5  ;;  %v8493_v1 = vld [vmem:[%s6524_s7 + $0xb0] sm:$0x1] }
 0x138   : > { %v8478_v29 = vadd.f32 %v5910_v56, %v1060_v23  ;;  %v1052_v22 = vadd.f32 %v1051_v45, %v9522_v59  ;;  %v1479_v33 = vpop.f32.mrf.mxu0  ;;  %v8495_v23 = vrot.slane %v3879_v24, 5  ;;  %v3885_v2 = vrot.slane %v3883_v18, 4  ;;  %v9524_v12 = vld [vmem:[#allocation17_spill] sm:$0xff] }
 0x139   : > { %v5877_v16 = vpop.f32.mrf.mxu1  ;;  %v8505_v43 = vrot.slane %v3862_v32, 4  ;;  %v8507_v17 = vrot.slane %v3865_v38, 5  ;;  %v8515_v58 = vsel %vm6854_vm7, %v5604_v30, %v4402_v49  ;;  %v8519_v36 = vsel %vm6854_vm7, %v4404_v13, %v4405_v57  ;;  %v8531_v30 = vld [vmem:[%s6524_s7 + $0xb8] sm:$0xf] }
 0x13a   : > { %v8485_v9 = vadd.f32 %v1476_v15, %v1052_v22  ;;  %v1063_v62 = vadd.f32 %v5877_v16, %v9523_v4  ;;  %v5914_v56 = vpop.f32.mrf.mxu0  ;;  %6117 = vmatmul.mubr.msk.bf16.gmra.mxu0 %vm656_vm3, %v5615_v10  ;;  %v8501_v15 = vcombine.low %v3834_v21, %v3844_v40  ;;  %v5589_v10 = vld [vmem:[%s6524_s7 + $0xa8] sm:$0xe]  ;;  %v3876_v32 = vor.u32 %v3875_v63, %v3872_v6  ;;  %v9526_v22 = vld [vmem:[#allocation12_spill] sm:$0xff] }
 0x13b   : > { %v1054_v45 = vpop.f32.mrf.mxu1  ;;  %6120 = vmatprep.mubr.msk.bf16.mxu0 %vm656_vm3, %v5616_v41  ;;  %v5535_v41 = vld [vmem:[%s6524_s7 + $0xb4] sm:$0xf]  ;;  %v9525_v40 = vld [vmem:[#allocation22_spill] sm:$0xff]  ;;  %v3889_v38 = vshll.u32 %v8493_v1, 16  ;;  %v4409_v49 = vrot.slane %v8450_v27, 5  ;;  %v3886_v16 = vor.u32 %v3885_v2, %v8495_v23  ;;  %v3868_v27 = vsel %vm6568_vm4, %v8505_v43, %v8507_v17 }
 0x13c   : > { %v8510_v34 = vadd.f32 %v5911_v14, %v1063_v62  ;;  %v1055_v24 = vadd.f32 %v1054_v45, %v9524_v12  ;;  %v1492_v18 = vpop.f32.mrf.mxu0  ;;  %v5605_v62 = vrot.slane %v5589_v10, 9  ;;  %v3894_v6 = vshrl.u32 %v5535_v41, 16 }
 0x13d   : > { %v5880_v21 = vpop.f32.mrf.mxu1  ;;  %6083 = vmatmul.mubr.msk.bf16.gmra.mxu1 %vm656_vm3, %v9525_v40  ;;  %v3897_v63 = vshll.u32 %v5535_v41, 16  ;;  %v3903_v2 = vshll.u32 %v8531_v30, 16  ;;  %v3907_v10 = vshrl.u32 %v8531_v30, 16  ;;  %v5538_v40 = vld [vmem:[%s6524_s7 + $0xc0] sm:$0xf]  ;;  %v3877_v4 = vrot.slane %v3876_v32, 4 }
 0x13e   : > { %v8533_v59 = vadd.f32 %v1479_v33, %v1055_v24  ;;  %v1076_v13 = vadd.f32 %v5880_v21, %v9526_v22  ;;  %v5915_v57 = vpop.f32.mrf.mxu0  ;;  %6086 = vmatprep.mubr.msk.bf16.mxu1 %vm656_vm3, %v8385_v46  ;;  %v9528_v24 = vld [vmem:[#allocation21_spill] sm:$0xff]  ;;  %v3891_v43 = vrot.slane %v3889_v38, 5  ;;  %v4411_v17 = vrot.slane %v4409_v49, 4 }
 0x13f   : > { %v1067_v45 = vpop.f32.mrf.mxu1  ;;  %v4412_v33 = vrot.slane %v8493_v1, 5  ;;  %v8561_v14 = vsel %vm6854_vm7, %v5605_v62, %v4409_v49  ;;  %v8564_v32 = vld [vmem:[%s6524_s7 + $0xc4] sm:$0xf]  ;;  %v9532_v1 = vcombine.low %v8343_v25, %v8347_v50  ;;  %v8576_v62 = vrot.slane %v3903_v2, 5 }
 0x140   : > { %v8545_v12 = vadd.f32 %v5914_v56, %v1076_v13  ;;  %v1068_v21 = vadd.f32 %v1067_v45, %v9528_v24  ;;  %v1495_v46 = vpop.f32.mrf.mxu0  ;;  %v9530_v56 = vld [vmem:[#allocation24_spill] sm:$0xff]  ;;  %v9531_v45 = vcombine.low %v8331_v47, %v8335_v7  ;;  %v3887_v24 = vrot.slane %v3886_v16, 4  ;;  %v9533_v16 = vld [vmem:[#allocation26_spill] sm:$0xff] }
 0x141   : > { %v5881_v22 = vpop.f32.mrf.mxu1  ;;  %v3918_v47 = vshrl.u32 %v5538_v40, 16  ;;  %v3921_v7 = vshll.u32 %v5538_v40, 16  ;;  %v3882_v25 = vsel %vm6568_vm4, %v3877_v4, %v8495_v23  ;;  %v8585_v50 = vsel %vm6854_vm7, %v4411_v17, %v4412_v33  ;;  %v5590_v40 = vld [vmem:[%s6524_s7 + $0xb4] sm:$0xe] }
 0x142   : > { %9527 = vst [vmem:[#allocation14_spill] sm:$0xff] %v8545_v12  ;;  %v8552_v35 = vadd.f32 %v1492_v18, %v1068_v21  ;;  %v1079_v41 = vadd.f32 %v5881_v22, %v9530_v56  ;;  %v5918_v13 = vpop.f32.mrf.mxu0  ;;  %6121 = vmatmul.mubr.msk.bf16.gmra.mxu0 %vm656_vm3, %v9531_v45  ;;  %v8571_v18 = vld [vmem:[%s6524_s7 + $0xbc] sm:$0x1]  ;;  %v3896_v21 = vrot.slane %v3894_v6, 4  ;;  %v3899_v22 = vrot.slane %v3897_v63, 5 }
 0x143   : > { %v1070_v38 = vpop.f32.mrf.mxu1  ;;  %6124 = vmatprep.mubr.msk.bf16.mxu0 %vm656_vm3, %v9532_v1  ;;  %v3931_v6 = vshrl.u32 %v8564_v32, 16  ;;  %v3913_v23 = vshll.u32 %v8571_v18, 16  ;;  %v4416_v17 = vrot.slane %v8531_v30, 5  ;;  %v9534_v1 = vld [vmem:[#allocation28_spill] sm:$0xff] }
 0x144   : > { %9529 = vst [vmem:[#allocation11_spill] sm:$0xff] %v8552_v35  ;;  %v8573_v56 = vadd.f32 %v5915_v57, %v1079_v41  ;;  %v1071_v45 = vadd.f32 %v1070_v38, %v9533_v16  ;;  %v1508_v49 = vpop.f32.mrf.mxu0  ;;  %v3909_v35 = vrot.slane %v3907_v10, 4  ;;  %v3927_v57 = vshll.u32 %v8564_v32, 16 }
 0x145   : > { %v5884_v12 = vpop.f32.mrf.mxu1  ;;  %6087 = vmatmul.mubr.msk.bf16.gmra.mxu1 %vm656_vm3, %v8387_v61  ;;  %v3892_v61 = vsel %vm6568_vm4, %v3887_v24, %v3891_v43  ;;  %v3900_v33 = vor.u32 %v3899_v22, %v3896_v21  ;;  %v3920_v41 = vrot.slane %v3918_v47, 4  ;;  %v3923_v38 = vrot.slane %v3921_v7, 5 }
 0x146   : > { %v8589_v63 = vadd.f32 %v1495_v46, %v1071_v45  ;;  %v1092_v2 = vadd.f32 %v5884_v12, %v8295_v28  ;;  %v5919_v10 = vpop.f32.mrf.mxu0  ;;  %6090 = vmatprep.mubr.msk.bf16.mxu1 %vm656_vm3, %v8393_v60  ;;  %v9535_v60 = vsel %vm6568_vm4, %v8483_v51, %v8447_v52  ;;  %v3910_v24 = vor.u32 %v3909_v35, %v8576_v62 }
 0x147   : > { %v1083_v4 = vpop.f32.mrf.mxu1  ;;  %v8607_v43 = vcombine.low %v9535_v60, %v3868_v27  ;;  %v8610_v30 = vcombine.low %v3882_v25, %v3892_v61  ;;  %v8614_v22 = vrot.slane %v3927_v57, 5  ;;  %v3933_v47 = vrot.slane %v3931_v6, 4  ;;  %v5540_v27 = vld [vmem:[%s6524_s7 + $0xc8] sm:$0x1] }
 0x148   : > { %v8599_v46 = vadd.f32 %v5918_v13, %v1092_v2  ;;  %v1084_v28 = vadd.f32 %v1083_v4, %v9534_v1  ;;  %v1511_v12 = vpop.f32.mrf.mxu0  ;;  %v5622_v13 = vcombine.low %v8561_v14, %v8585_v50  ;;  %v9536_v52 = vcombine.low %v8413_v3, %v8435_v20  ;;  %v5541_v14 = vld [vmem:[%s6524_s7 + $0xcc] sm:$0xf]  ;;  %v8635_v20 = vld [vmem:[%s6524_s7 + $0xd0] sm:$0xf]  ;;  %v5591_v4 = vld [vmem:[%s6524_s7 + $0xc0] sm:$0xe] }
 0x149   : > { %v5885_v21 = vpop.f32.mrf.mxu1  ;;  %v8623_v35 = vrot.slane %v3913_v23, 5  ;;  %v5606_v51 = vrot.slane %v5590_v40, 9  ;;  %v9537_v50 = vcombine.low %v8445_v53, %v8475_v39  ;;  %v4419_v57 = vrot.slane %v8571_v18, 5 }
 0x14a   : > { %v8616_v7 = vadd.f32 %v1508_v49, %v1084_v28  ;;  %v1095_v16 = vadd.f32 %v5885_v21, %v8318_v19  ;;  %v5922_v45 = vpop.f32.mrf.mxu0  ;;  %6125 = vmatmul.mubr.msk.bf16.gmra.mxu0 %vm656_vm3, %v9536_v52  ;;  %v8631_v49 = vrot.slane %v3900_v33, 4  ;;  %v4418_v19 = vrot.slane %v4416_v17, 4 }
 0x14b   : > { %v1086_v25 = vpop.f32.mrf.mxu1  ;;  %6128 = vmatprep.mubr.msk.bf16.mxu0 %vm656_vm3, %v9537_v50  ;;  %v3924_v3 = vor.u32 %v3923_v38, %v3920_v41  ;;  %v8640_v23 = vrot.slane %v3910_v24, 4  ;;  %v4423_v53 = vrot.slane %v8564_v32, 5  ;;  %v3934_v33 = vor.u32 %v3933_v47, %v8614_v22 }
 0x14c   : > { %v8637_v6 = vadd.f32 %v5919_v10, %v1095_v16  ;;  %v1087_v2 = vadd.f32 %v1086_v25, %v8350_v26  ;;  %v1524_v61 = vpop.f32.mrf.mxu0  ;;  %v3937_v18 = vshll.u32 %v5540_v27, 16  ;;  %v3942_v40 = vshrl.u32 %v5541_v14, 16  ;;  %v9540_v10 = vld [vmem:[#allocation7_spill] sm:$0xff]  ;;  %v9541_v16 = vld [vmem:[#allocation6_spill] sm:$0xff] }
 0x14d   : > { %v5888_v39 = vpop.f32.mrf.mxu1  ;;  %6091 = vmatmul.mubr.msk.bf16.gmra.mxu1 %vm656_vm3, %v8422_v48  ;;  %v3945_v41 = vshll.u32 %v5541_v14, 16  ;;  %v3951_v28 = vshll.u32 %v8635_v20, 16  ;;  %v3955_v32 = vshrl.u32 %v8635_v20, 16  ;;  %v4417_v48 = vsel %vm6854_vm7, %v5606_v51, %v4416_v17  ;;  %v9542_v17 = vld [vmem:[#allocation9_spill] sm:$0xff] }
 0x14e   : > { %9538 = vst [vmem:[#allocation19_spill] sm:$0xff] %v8637_v6  ;;  %v8647_v38 = vadd.f32 %v1511_v12, %v1087_v2  ;;  %v1108_v1 = vadd.f32 %v5888_v39, %v9540_v10  ;;  %v5923_v26 = vpop.f32.mrf.mxu0  ;;  %6094 = vmatprep.mubr.msk.bf16.mxu1 %vm656_vm3, %v8501_v15  ;;  %v4420_v24 = vsel %vm6854_vm7, %v4418_v19, %v4419_v57  ;;  %v3925_v21 = vrot.slane %v3924_v3, 4 }
 0x14f   : > { %v1099_v60 = vpop.f32.mrf.mxu1  ;;  %v5607_v12 = vrot.slane %v5591_v4, 9  ;;  %v4425_v25 = vrot.slane %v4423_v53, 4  ;;  %v4426_v15 = vrot.slane %v5540_v27, 5  ;;  %v3935_v2 = vrot.slane %v3934_v33, 4  ;;  %v5543_v33 = vld [vmem:[%s6524_s7 + $0xd4] sm:$0x1] }
 0x150   : > { %9539 = vst [vmem:[#allocation15_spill] sm:$0xff] %v8647_v38  ;;  %v8658_v47 = vadd.f32 %v5922_v45, %v1108_v1  ;;  %v1100_v52 = vadd.f32 %v1099_v60, %v9541_v16  ;;  %v1527_v14 = vpop.f32.mrf.mxu0  ;;  %v3939_v39 = vrot.slane %v3937_v18, 5  ;;  %v3944_v10 = vrot.slane %v3942_v40, 4  ;;  %v9544_v18 = vld [vmem:[#allocation8_spill] sm:$0xff] }
 0x151   : > { %v5889_v50 = vpop.f32.mrf.mxu1  ;;  %v3947_v38 = vrot.slane %v3945_v41, 5  ;;  %v9543_v45 = vcombine.low %v8515_v58, %v8519_v36  ;;  %v8668_v57 = vrot.slane %v3951_v28, 5  ;;  %v3957_v27 = vrot.slane %v3955_v32, 4 }
 0x152   : > { %v8661_v6 = vadd.f32 %v1524_v61, %v1100_v52  ;;  %v1111_v51 = vadd.f32 %v5889_v50, %v9542_v17  ;;  %v5926_v19 = vpop.f32.mrf.mxu0  ;;  %v3906_v61 = vsel %vm6568_vm4, %v8631_v49, %v8576_v62  ;;  %v3916_v4 = vsel %vm6568_vm4, %v8640_v23, %v8623_v35  ;;  %v5592_v62 = vld [vmem:[%s6524_s7 + $0xcc] sm:$0xe]  ;;  %s5680_s7 = sshll.u32 %s6478_s16, 12  ;;  %s9321_s16 = scalar_lea.sflag [#allocation3], %s161_s4 }
 0x153   : > { %6129 = vmatmul.mubr.msk.bf16.gmra.mxu0 %vm656_vm3, %v9543_v45  ;;  %v1102_v3 = vpop.f32.mrf.mxu1  ;;  %v4430_v58 = vrot.slane %v8635_v20, 5  ;;  %v4427_v1 = vsel %vm6854_vm7, %v4425_v25, %v4426_v15  ;;  %v5623_v35 = vcombine.low %v4417_v48, %v4420_v24  ;;  %v3930_v20 = vsel %vm6568_vm4, %v3925_v21, %v8614_v22  ;;  %v9546_v25 = vld [vmem:[#allocation13_spill] sm:$0xff]  ;;  %s9313_s11 = scalar_lea.hbm %s9364_s3, %s5680_s7 }
 0x154   : > { %6132 = vmatprep.mubr.msk.bf16.mxu0 %vm656_vm3, %v5622_v13  ;;  %v8681_v36 = vadd.f32 %v5923_v26, %v1111_v51  ;;  %v1103_v40 = vadd.f32 %v1102_v3, %v9544_v18  ;;  %v1540_v41 = vpop.f32.mrf.mxu0  ;;  %v4424_v13 = vsel %vm6854_vm7, %v5607_v12, %v4423_v53  ;;  %v3940_v23 = vsel %vm6568_vm4, %v3935_v2, %v3939_v39  ;;  %v9545_v53 = vld [vmem:[#allocation10_spill] sm:$0xff] }
 0x155   : > { %v5892_v49 = vpop.f32.mrf.mxu1  ;;  %6095 = vmatmul.mubr.msk.bf16.gmra.mxu1 %vm656_vm3, %v8607_v43  ;;  %v3948_v26 = vor.u32 %v3947_v38, %v3944_v10  ;;  %v3958_v12 = vor.u32 %v3957_v27, %v8668_v57  ;;  %v3961_v43 = vshll.u32 %v5543_v33, 16  ;;  %v5624_v24 = vcombine.low %v4424_v13, %v4427_v1 }
 0x156   : > { %v8696_v28 = vadd.f32 %v1527_v14, %v1103_v40  ;;  %v1124_v32 = vadd.f32 %v5892_v49, %v9545_v53  ;;  %v5927_v60 = vpop.f32.mrf.mxu0  ;;  %6098 = vmatprep.mubr.msk.bf16.mxu1 %vm656_vm3, %v8610_v30  ;;  %v5608_v16 = vrot.slane %v5592_v62, 9  ;;  %v4432_v52 = vrot.slane %v4430_v58, 4  ;;  %v9547_v30 = vld [vmem:[#allocation16_spill] sm:$0xff] }
 0x157   : > { %v1115_v48 = vpop.f32.mrf.mxu1  ;;  %v4433_v22 = vrot.slane %v5543_v33, 5  ;;  %v5558_v50 = vcombine.low %v3906_v61, %v3916_v4  ;;  %v5559_v2 = vcombine.low %v3930_v20, %v3940_v23  ;;  %v3949_v39 = vrot.slane %v3948_v26, 4  ;;  %v9548_v33 = vld [vmem:[#allocation18_spill] sm:$0xff]  ;;  %v9549_v62 = vld [vmem:[#allocation20_spill] sm:$0xff]  ;;  %v9550_v26 = vld [vmem:[#allocation23_spill] sm:$0xff] }
 0x158   : > { %v8702_v21 = vadd.f32 %v5926_v19, %v1124_v32  ;;  %v1116_v38 = vadd.f32 %v1115_v48, %v9546_v25  ;;  %v1543_v14 = vpop.f32.mrf.mxu0  ;;  %v3959_v45 = vrot.slane %v3958_v12, 4  ;;  %v3963_v27 = vrot.slane %v3961_v43, 5  ;;  %v9551_v43 = vld [vmem:[#allocation25_spill] sm:$0xff] }
 0x159   : > { %v5893_v15 = vpop.f32.mrf.mxu1  ;;  %v4431_v19 = vsel %vm6854_vm7, %v5608_v16, %v4430_v58  ;;  %v4434_v61 = vsel %vm6854_vm7, %v4432_v52, %v4433_v22  ;;  %v3954_v13 = vsel %vm6568_vm4, %v3949_v39, %v8668_v57 }
 0x15a   : > { %v8705_v10 = vadd.f32 %v1540_v41, %v1116_v38  ;;  %v1127_v17 = vadd.f32 %v5893_v15, %v9547_v30  ;;  %v5930_v51 = vpop.f32.mrf.mxu0  ;;  %v3964_v0 = vsel %vm6568_vm4, %v3959_v45, %v3963_v27 }
 0x15b   : > { %6133 = vmatmul.mubr.msk.bf16.gmra.mxu0 %vm656_vm3, %v5623_v35  ;;  %v1118_v3 = vpop.f32.mrf.mxu1  ;;  %v5625_v35 = vcombine.low %v4431_v19, %v4434_v61  ;;  %v5560_v12 = vcombine.low %v3954_v13, %v3964_v0 }
 0x15c   : > { %6136 = vmatprep.mubr.msk.bf16.mxu0 %vm656_vm3, %v5624_v24  ;;  %v8714_v4 = vadd.f32 %v5927_v60, %v1127_v17  ;;  %v1119_v18 = vadd.f32 %v1118_v3, %v9548_v33  ;;  %v1556_v40 = vpop.f32.mrf.mxu0 }
 0x15d   : > { %v5896_v41 = vpop.f32.mrf.mxu1  ;;  %6099 = vmatmul.mubr.msk.bf16.gmra.mxu1 %vm656_vm3, %v5558_v50 }
 0x15e   : > { %v8721_v1 = vadd.f32 %v1543_v14, %v1119_v18  ;;  %v1140_v49 = vadd.f32 %v5896_v41, %v9549_v62  ;;  %v5931_v58 = vpop.f32.mrf.mxu0  ;;  %6102 = vmatprep.mubr.msk.bf16.mxu1 %vm656_vm3, %v5559_v2 }
 0x15f   : > { %v1131_v20 = vpop.f32.mrf.mxu1 }
 0x160   : > { %v8727_v23 = vadd.f32 %v5930_v51, %v1140_v49  ;;  %v1132_v53 = vadd.f32 %v1131_v20, %v9550_v26  ;;  %v1559_v32 = vpop.f32.mrf.mxu0 }
 0x161   : > { %v5897_v60 = vpop.f32.mrf.mxu1 }
 0x162   : > { %v8730_v57 = vadd.f32 %v1556_v40, %v1132_v53  ;;  %v1143_v48 = vadd.f32 %v5897_v60, %v9551_v43  ;;  %v5934_v24 = vpop.f32.mrf.mxu0 }
 0x163   : > { %6137 = vmatmul.mubr.msk.bf16.gmra.mxu0 %vm656_vm3, %v5625_v35  ;;  %v1134_v16 = vpop.f32.mrf.mxu1 }
 0x164   : > { %v8734_v52 = vadd.f32 %v5931_v58, %v1143_v48  ;;  %v1135_v22 = vadd.f32 %v1134_v16, %v9552_v31  ;;  %v1572_v25 = vpop.f32.mrf.mxu0 }
 0x165   : > { %v5900_v38 = vpop.f32.mrf.mxu1  ;;  %6103 = vmatmul.mubr.msk.bf16.gmra.mxu1 %vm656_vm3, %v5560_v12 }
 0x166   : > { %v8738_v14 = vadd.f32 %v1559_v32, %v1135_v22  ;;  %v1156_v15 = vadd.f32 %v5900_v38, %v8310_v42  ;;  %v5935_v50 = vpop.f32.mrf.mxu0 }
 0x167   : > { %v1147_v2 = vpop.f32.mrf.mxu1 }
 0x168   : > { %v8741_v39 = vadd.f32 %v5934_v24, %v1156_v15  ;;  %v1148_v30 = vadd.f32 %v1147_v2, %v8337_v44  ;;  %v1575_v17 = vpop.f32.mrf.mxu0 }
 0x169   : > { %v5901_v51 = vpop.f32.mrf.mxu1 }
 0x16a   : > { %v8744_v45 = vadd.f32 %v1572_v25, %v1148_v30  ;;  %v1159_v27 = vadd.f32 %v5901_v51, %v8352_v8  ;;  %v5974_v3 = vpop.f32.mrf.mxu0  ;;  %v9553_v30 = vld [vmem:[#allocation14_spill] sm:$0xff] }
 0x16b   : > { %v1150_v19 = vpop.f32.mrf.mxu1 }
 0x16c   : > { %v8747_v61 = vadd.f32 %v5935_v50, %v1159_v27  ;;  %v1151_v33 = vadd.f32 %v1150_v19, %v8374_v55  ;;  %v2545_v18 = vpop.f32.mrf.mxu0 }
 0x16d   : > { %v5940_v42 = vpop.f32.mrf.mxu1 }
 0x16e   : > { %v8750_v40 = vadd.f32 %v1575_v17, %v1151_v33  ;;  %v1948_v41 = vadd.f32 %v5940_v42, %v8419_v5  ;;  %v5975_v13 = vpop.f32.mrf.mxu0 }
 0x16f   : > { %v1819_v44 = vpop.f32.mrf.mxu1 }
 0x170   : > { %v8753_v62 = vadd.f32 %v5974_v3, %v1948_v41  ;;  %v1946_v49 = vadd.f32 %v1819_v44, %v8426_v37  ;;  %v2548_v58 = vpop.f32.mrf.mxu0  ;;  %v9554_v3 = vld [vmem:[#allocation11_spill] sm:$0xff] }
 0x171   : > { %v5941_v8 = vpop.f32.mrf.mxu1 }
 0x172   : > { %v8756_v0 = vadd.f32 %v2545_v18, %v1946_v49  ;;  %v1949_v35 = vadd.f32 %v5941_v8, %v8452_v54  ;;  %v5978_v20 = vpop.f32.mrf.mxu0 }
 0x173   : > { %v1822_v55 = vpop.f32.mrf.mxu1 }
 0x174   : > { %v8759_v26 = vadd.f32 %v5975_v13, %v1949_v35  ;;  %v1947_v53 = vadd.f32 %v1822_v55, %v8466_v11  ;;  %v2561_v32 = vpop.f32.mrf.mxu0 }
 0x175   : > { %v5944_v5 = vpop.f32.mrf.mxu1 }
 0x176   : > { %v8762_v60 = vadd.f32 %v2548_v58, %v1947_v53  ;;  %v1952_v12 = vadd.f32 %v5944_v5, %v8478_v29  ;;  %v5979_v43 = vpop.f32.mrf.mxu0 }
 0x177   : > { %v1835_v37 = vpop.f32.mrf.mxu1 }
 0x178   : > { %v8765_v48 = vadd.f32 %v5978_v20, %v1952_v12  ;;  %v1950_v24 = vadd.f32 %v1835_v37, %v8485_v9  ;;  %v2564_v16 = vpop.f32.mrf.mxu0 }
 0x179   : > { %v5945_v54 = vpop.f32.mrf.mxu1 }
 0x17a   : > { %v8768_v31 = vadd.f32 %v2561_v32, %v1950_v24  ;;  %v1953_v22 = vadd.f32 %v5945_v54, %v8510_v34  ;;  %v5982_v25 = vpop.f32.mrf.mxu0  ;;  %v9556_v54 = vld [vmem:[#allocation15_spill] sm:$0xff] }
 0x17b   : > { %v1838_v11 = vpop.f32.mrf.mxu1 }
 0x17c   : > { %v8771_v38 = vadd.f32 %v5979_v43, %v1953_v22  ;;  %v1951_v15 = vadd.f32 %v1838_v11, %v8533_v59  ;;  %v2577_v50 = vpop.f32.mrf.mxu0  ;;  %v9555_v43 = vld [vmem:[#allocation19_spill] sm:$0xff] }
 0x17d   : > { %v5948_v29 = vpop.f32.mrf.mxu1 }
 0x17e   : > { %v8774_v2 = vadd.f32 %v2564_v16, %v1951_v15  ;;  %v1956_v17 = vadd.f32 %v5948_v29, %v9553_v30  ;;  %v5983_v51 = vpop.f32.mrf.mxu0 }
 0x17f   : > { %v1851_v9 = vpop.f32.mrf.mxu1 }
 0x180   : > { %v8777_v27 = vadd.f32 %v5982_v25, %v1956_v17  ;;  %v1954_v19 = vadd.f32 %v1851_v9, %v9554_v3  ;;  %v2580_v33 = vpop.f32.mrf.mxu0 }
 0x181   : > { %v5949_v34 = vpop.f32.mrf.mxu1 }
 0x182   : > { %v8780_v18 = vadd.f32 %v2577_v50, %v1954_v19  ;;  %v1957_v42 = vadd.f32 %v5949_v34, %v8573_v56  ;;  %v5986_v41 = vpop.f32.mrf.mxu0 }
 0x183   : > { %v1854_v59 = vpop.f32.mrf.mxu1 }
 0x184   : > { %v8783_v13 = vadd.f32 %v5983_v51, %v1957_v42  ;;  %v1955_v44 = vadd.f32 %v1854_v59, %v8589_v63  ;;  %v2593_v49 = vpop.f32.mrf.mxu0 }
 0x185   : > { %v5952_v58 = vpop.f32.mrf.mxu1 }
 0x186   : > { %v8786_v8 = vadd.f32 %v2580_v33, %v1955_v44  ;;  %v1960_v35 = vadd.f32 %v5952_v58, %v8599_v46  ;;  %v5987_v20 = vpop.f32.mrf.mxu0 }
 0x187   : > { %v1867_v55 = vpop.f32.mrf.mxu1 }
 0x188   : > { %v8789_v53 = vadd.f32 %v5986_v41, %v1960_v35  ;;  %v1958_v32 = vadd.f32 %v1867_v55, %v8616_v7  ;;  %v2596_v5 = vpop.f32.mrf.mxu0 }
 0x189   : > { %v5953_v56 = vpop.f32.mrf.mxu1 }
 0x18a   : > { %v8792_v12 = vadd.f32 %v2593_v49, %v1958_v32  ;;  %v1961_v37 = vadd.f32 %v5953_v56, %v9555_v43  ;;  %v5990_v24 = vpop.f32.mrf.mxu0 }
 0x18b   : > { %v1870_v63 = vpop.f32.mrf.mxu1 }
 0x18c   : > { %v8795_v16 = vadd.f32 %v5987_v20, %v1961_v37  ;;  %v1959_v22 = vadd.f32 %v1870_v63, %v9556_v54  ;;  %v2609_v25 = vpop.f32.mrf.mxu0 }
 0x18d   : > { %v5956_v46 = vpop.f32.mrf.mxu1 }
 0x18e   : > { %v8798_v11 = vadd.f32 %v2596_v5, %v1959_v22  ;;  %v1964_v15 = vadd.f32 %v5956_v46, %v8658_v47  ;;  %v5991_v50 = vpop.f32.mrf.mxu0 }
 0x18f   : > { %v1883_v7 = vpop.f32.mrf.mxu1 }
 0x190   : > { %v8801_v29 = vadd.f32 %v5990_v24, %v1964_v15  ;;  %v1962_v30 = vadd.f32 %v1883_v7, %v8661_v6  ;;  %v2612_v17 = vpop.f32.mrf.mxu0 }
 0x191   : > { %v5957_v51 = vpop.f32.mrf.mxu1 }
 0x192   : > { %v8804_v9 = vadd.f32 %v2609_v25, %v1962_v30  ;;  %v1965_v3 = vadd.f32 %v5957_v51, %v8681_v36  ;;  %v5994_v19 = vpop.f32.mrf.mxu0 }
 0x193   : > { %v1886_v33 = vpop.f32.mrf.mxu1 }
 0x194   : > { %v8807_v34 = vadd.f32 %v5991_v50, %v1965_v3  ;;  %v1963_v42 = vadd.f32 %v1886_v33, %v8696_v28  ;;  %v2625_v41 = vpop.f32.mrf.mxu0 }
 0x195   : > { %v5960_v47 = vpop.f32.mrf.mxu1 }
 0x196   : > { %v8810_v59 = vadd.f32 %v2612_v17, %v1963_v42  ;;  %v1968_v44 = vadd.f32 %v5960_v47, %v8702_v21  ;;  %v5995_v49 = vpop.f32.mrf.mxu0 }
 0x197   : > { %v1899_v6 = vpop.f32.mrf.mxu1 }
 0x198   : > { %9557 = vst [vmem:[#allocation5_spill] sm:$0xff] %v8810_v59  ;;  %v8813_v58 = vadd.f32 %v5994_v19, %v1968_v44  ;;  %v1966_v35 = vadd.f32 %v1899_v6, %v8705_v10  ;;  %v2628_v20 = vpop.f32.mrf.mxu0 }
 0x199   : > { %v5961_v36 = vpop.f32.mrf.mxu1 }
 0x19a   : > { %9558 = vst [vmem:[#allocation17_spill] sm:$0xff] %v8813_v58  ;;  %v8816_v55 = vadd.f32 %v2625_v41, %v1966_v35  ;;  %v1969_v32 = vadd.f32 %v5961_v36, %v8714_v4  ;;  %v5998_v5 = vpop.f32.mrf.mxu0 }
 0x19b   : > { %v1902_v28 = vpop.f32.mrf.mxu1 }
 0x19c   : > { %9559 = vst [vmem:[#allocation22_spill] sm:$0xff] %v8816_v55  ;;  %v8819_v56 = vadd.f32 %v5995_v49, %v1969_v32  ;;  %v1967_v43 = vadd.f32 %v1902_v28, %v8721_v1  ;;  %v2641_v37 = vpop.f32.mrf.mxu0 }
 0x19d   : > { %v5964_v21 = vpop.f32.mrf.mxu1 }
 0x19e   : > { %9560 = vst [vmem:[#allocation12_spill] sm:$0xff] %v8819_v56  ;;  %v8822_v24 = vadd.f32 %v2628_v20, %v1967_v43  ;;  %v1972_v63 = vadd.f32 %v5964_v21, %v8727_v23  ;;  %v5999_v54 = vpop.f32.mrf.mxu0 }
 0x19f   : > { %v1915_v10 = vpop.f32.mrf.mxu1 }
 0x1a0   : > { %9561 = vst [vmem:[#allocation21_spill] sm:$0xff] %v8822_v24  ;;  %v8825_v22 = vadd.f32 %v5998_v5, %v1972_v63  ;;  %v1970_v25 = vadd.f32 %v1915_v10, %v8730_v57  ;;  %v2644_v46 = vpop.f32.mrf.mxu0 }
 0x1a1   : > { %v5965_v4 = vpop.f32.mrf.mxu1 }
 0x1a2   : > { %9562 = vst [vmem:[#allocation24_spill] sm:$0xff] %v8825_v22  ;;  %v8828_v15 = vadd.f32 %v2641_v37, %v1970_v25  ;;  %v1973_v50 = vadd.f32 %v5965_v4, %v8734_v52  ;;  %v6002_v7 = vpop.f32.mrf.mxu0 }
 0x1a3   : > { %v1918_v1 = vpop.f32.mrf.mxu1 }
 0x1a4   : > { %9563 = vst [vmem:[#allocation26_spill] sm:$0xff] %v8828_v15  ;;  %v8831_v30 = vadd.f32 %v5999_v54, %v1973_v50  ;;  %v1971_v17 = vadd.f32 %v1918_v1, %v8738_v14  ;;  %v2657_v51 = vpop.f32.mrf.mxu0 }
 0x1a5   : > { %v5968_v23 = vpop.f32.mrf.mxu1 }
 0x1a6   : > { %9564 = vst [vmem:[#allocation28_spill] sm:$0xff] %v8831_v30  ;;  %v8834_v3 = vadd.f32 %v2644_v46, %v1971_v17  ;;  %v1976_v19 = vadd.f32 %v5968_v23, %v8741_v39  ;;  %v6003_v33 = vpop.f32.mrf.mxu0 }
 0x1a7   : > { %v1931_v57 = vpop.f32.mrf.mxu1 }
 0x1a8   : > { %9565 = vst [vmem:[#allocation7_spill] sm:$0xff] %v8834_v3  ;;  %v8837_v42 = vadd.f32 %v6002_v7, %v1976_v19  ;;  %v1974_v41 = vadd.f32 %v1931_v57, %v8744_v45  ;;  %v2660_v47 = vpop.f32.mrf.mxu0 }
 0x1a9   : > { %v5969_v52 = vpop.f32.mrf.mxu1 }
 0x1aa   : > { %9566 = vst [vmem:[#allocation6_spill] sm:$0xff] %v8837_v42  ;;  %v8840_v44 = vadd.f32 %v2657_v51, %v1974_v41  ;;  %v1977_v49 = vadd.f32 %v5969_v52, %v8747_v61  ;;  %v8843_v6 = vpop.f32.mrf.mxu0 }
 0x1ab   : > { %v1934_v14 = vpop.f32.mrf.mxu1 }
 0x1ac   : > { %9567 = vst [vmem:[#allocation9_spill] sm:$0xff] %v8840_v44  ;;  %v8845_v35 = vadd.f32 %v6003_v33, %v1977_v49  ;;  %v1975_v20 = vadd.f32 %v1934_v14, %v8750_v40  ;;  %v8848_v39 = vpop.f32.mrf.mxu0 }
 0x1ad   : > { %v6008_v36 = vpop.f32.mrf.mxu1 }
 0x1ae   : > { %9568 = vst [vmem:[#allocation8_spill] sm:$0xff] %v8845_v35  ;;  %v8850_v32 = vadd.f32 %v2660_v47, %v1975_v20  ;;  %v8852_v5 = vpop.f32.mrf.mxu0 }
 0x1af   : > { %v3015_v45 = vpop.f32.mrf.mxu1 }
 0x1b0   : > { %v8854_v28 = vpop.f32.mrf.mxu0 }
 0x1b1   : > { %v6009_v43 = vpop.f32.mrf.mxu1 }
 0x1b2   : > { %v8856_v37 = vpop.f32.mrf.mxu0 }
 0x1b3   : > { %v3018_v61 = vpop.f32.mrf.mxu1 }
 0x1b4   : > { %v8858_v21 = vpop.f32.mrf.mxu0 }
 0x1b5   : > { %v6012_v63 = vpop.f32.mrf.mxu1 }
 0x1b6   : > { %v8860_v54 = vpop.f32.mrf.mxu0 }
 0x1b7   : > { %v3031_v40 = vpop.f32.mrf.mxu1 }
 0x1b8   : > { %v8862_v10 = vpop.f32.mrf.mxu0 }
 0x1b9   : > { %v6013_v25 = vpop.f32.mrf.mxu1 }
 0x1ba   : > { %v8864_v46 = vpop.f32.mrf.mxu0 }
 0x1bb   : > { %v3034_v4 = vpop.f32.mrf.mxu1 }
 0x1bc   : > { %v8866_v50 = vpop.f32.mrf.mxu0 }
 0x1bd   : > { %v8868_v7 = vpop.f32.mrf.mxu1 }
 0x1be   : > { %v8870_v1 = vpop.f32.mrf.mxu0 }
 0x1bf   : > { %v8872_v17 = vpop.f32.mrf.mxu1 }
 0x1c0   : > { %v8874_v51 = vpop.f32.mrf.mxu0 }
 0x1c1   : > { %v6017_v23 = vpop.f32.mrf.mxu1 }
 0x1c2   : > { %v8876_v19 = vpop.f32.mrf.mxu0 }
 0x1c3   : > { %v3050_v33 = vpop.f32.mrf.mxu1 }
 0x1c4   : > { %v8878_v57 = vpop.f32.mrf.mxu0 }
 0x1c5   : > { %v8880_v41 = vpop.f32.mrf.mxu1 }
 0x1c6   : > { %v8882_v47 = vpop.f32.mrf.mxu0 }
 0x1c7   : > { %9569 = vst [vmem:[#allocation10_spill] sm:$0xff] %v8882_v47  ;;  %v8884_v52 = vpop.f32.mrf.mxu1 }
 0x1c8   : > { %v8886_v49 = vpop.f32.mrf.mxu0 }
 0x1c9   : > { %9570 = vst [vmem:[#allocation13_spill] sm:$0xff] %v8886_v49  ;;  %v8888_v14 = vpop.f32.mrf.mxu1 }
 0x1ca   : > { %v8890_v20 = vpop.f32.mrf.mxu0 }
 0x1cb   : > { %9571 = vst [vmem:[#allocation16_spill] sm:$0xff] %v8890_v20  ;;  %v8892_v35 = vpop.f32.mrf.mxu1 }
 0x1cc   : > { %v8894_v44 = vpop.f32.mrf.mxu0 }
 0x1cd   : > { %9572 = vst [vmem:[#allocation18_spill] sm:$0xff] %v8894_v44  ;;  %v8896_v42 = vpop.f32.mrf.mxu1 }
 0x1ce   : > { %v8898_v3 = vpop.f32.mrf.mxu0 }
 0x1cf   : > { %9573 = vst [vmem:[#allocation20_spill] sm:$0xff] %v8898_v3  ;;  %v8900_v30 = vpop.f32.mrf.mxu1 }
 0x1d0   : > { %v8902_v15 = vpop.f32.mrf.mxu0 }
 0x1d1   : > { %9574 = vst [vmem:[#allocation23_spill] sm:$0xff] %v8902_v15  ;;  %v8904_v22 = vpop.f32.mrf.mxu1 }
 0x1d2   : > { %9575 = vst [vmem:[#allocation25_spill] sm:$0xff] %v8904_v22  ;;  %v8906_v24 = vpop.f32.mrf.mxu0 }
 0x1d3   : > { %9576 = vst [vmem:[#allocation27_spill] sm:$0xff] %v8906_v24  ;;  %v8908_v56 = vpop.f32.mrf.mxu1 }
 0x1d4   : > { %9577 = vst [vmem:[#allocation14_spill] sm:$0xff] %v8908_v56  ;;  %v8910_v55 = vpop.f32.mrf.mxu0 }
 0x1d5   : > { %9578 = vst [vmem:[#allocation11_spill] sm:$0xff] %v8910_v55  ;;  %v8912_v58 = vpop.f32.mrf.mxu1 }
 0x1d6   : > { %9579 = vst [vmem:[#allocation19_spill] sm:$0xff] %v8912_v58  ;;  %v8914_v20 = vpop.f32.mrf.mxu0 }
 0x1d7   : > { %9580 = vst [vmem:[#allocation15_spill] sm:$0xff] %v8914_v20  ;;  %v8916_v44 = vpop.f32.mrf.mxu1 }
 0x1d8   : > { %9581 = vst [vmem:[#allocation29_spill] sm:$0xff] %v8916_v44  ;;  %v8918_v59 = vpop.f32.mrf.mxu0 }
 0x1d9   : > { %9582 = vst [vmem:[#allocation30_spill] sm:$0xff] %v8918_v59  ;;  %v8920_v3 = vpop.f32.mrf.mxu1 }
 0x1da   : > { %9583 = vst [vmem:[#allocation31_spill] sm:$0xff] %v8920_v3  ;;  %v8922_v49 = vpop.f32.mrf.mxu0 }
 0x1db   : > { %9584 = vst [vmem:[#allocation32_spill] sm:$0xff] %v8922_v49  ;;  %v8924_v15 = vpop.f32.mrf.mxu1 }
 0x1dc   : > { %9585 = vst [vmem:[#allocation33_spill] sm:$0xff] %v8924_v15  ;;  %v8926_v47 = vpop.f32.mrf.mxu0 }
 0x1dd   : > { %9586 = vst [vmem:[#allocation34_spill] sm:$0xff] %v8926_v47  ;;  %v8928_v24 = vpop.f32.mrf.mxu1 }
 0x1de   : > { %9587 = vst [vmem:[#allocation35_spill] sm:$0xff] %v8928_v24  ;;  %v8930_v56 = vpop.f32.mrf.mxu0 }
 0x1df   : > { %9588 = vst [vmem:[#allocation36_spill] sm:$0xff] %v8930_v56  ;;  %v8932_v55 = vpop.f32.mrf.mxu1  ;;  %v3144_v56 = vadd.f32 %v6008_v36, %v8753_v62  ;;  %v3146_v36 = vadd.f32 %v3031_v40, %v8768_v31  ;;  %v3151_v31 = vadd.f32 %v3050_v33, %v8786_v8  ;;  %v3154_v8 = vadd.f32 %v8884_v52, %v8792_v12 }
 0x1e0   : > { %9589 = vst [vmem:[#allocation37_spill] sm:$0xff] %v8932_v55  ;;  %v8934_v58 = vpop.f32.mrf.mxu0  ;;  %v3142_v55 = vadd.f32 %v3015_v45, %v8756_v0  ;;  %v3149_v0 = vadd.f32 %v6013_v25, %v8771_v38  ;;  %v8975_v38 = vld [vmem:[%s9363_s2] ss:$0 sm:$0xff] }
 0x1e1   : > { %9590 = vst [vmem:[#allocation38_spill] sm:$0xff] %v8934_v58  ;;  %v8936_v20 = vpop.f32.mrf.mxu1 }
 0x1e2   : > { %9591 = vst [vmem:[#allocation39_spill] sm:$0xff] %v8936_v20  ;;  %v8938_v44 = vpop.f32.mrf.mxu0  ;;  %v3145_v20 = vadd.f32 %v6009_v43, %v8759_v26  ;;  %v3501_v62 = vadd.f32 %v8848_v39, %v3142_v55  ;;  %v3147_v43 = vadd.f32 %v3034_v4, %v8774_v2  ;;  %v3153_v55 = vadd.f32 %v6017_v23, %v8783_v13 }
 0x1e3   : > { %9592 = vst [vmem:[#allocation40_spill] sm:$0xff] %v8938_v44  ;;  %v8940_v59 = vpop.f32.mrf.mxu1  ;;  %v3505_v39 = vadd.f32 %v8858_v21, %v3146_v36  ;;  %v3156_v13 = vadd.f32 %v8880_v41, %v8789_v53  ;;  %v8997_v53 = vadd.f32 %v8874_v51, %v3151_v31 }
 0x1e4   : > { %9593 = vst [vmem:[#allocation41_spill] sm:$0xff] %v8940_v59  ;;  %v8942_v3 = vpop.f32.mrf.mxu0  ;;  %v3503_v59 = vadd.f32 %v8843_v6, %v3144_v56  ;;  %v3504_v26 = vadd.f32 %v8852_v5, %v3145_v20  ;;  %v3506_v5 = vadd.f32 %v8862_v10, %v3147_v43 }
 0x1e5   : > { %9594 = vst [vmem:[#allocation42_spill] sm:$0xff] %v8942_v3  ;;  %v8944_v49 = vpop.f32.mrf.mxu1  ;;  %v3143_v3 = vadd.f32 %v3018_v61, %v8762_v60 }
 0x1e6   : > { %9595 = vst [vmem:[#allocation43_spill] sm:$0xff] %v8944_v49  ;;  %v8946_v15 = vpop.f32.mrf.mxu0  ;;  %v3148_v49 = vadd.f32 %v6012_v63, %v8765_v48  ;;  %v3152_v48 = vadd.f32 %v8868_v7, %v8777_v27  ;;  %v8994_v63 = vadd.f32 %v8870_v1, %v3153_v55  ;;  %v3157_v7 = vadd.f32 %v8888_v14, %v8795_v16  ;;  %v9599_v16 = vld [vmem:[#allocation25_spill] sm:$0xff]  ;;  %v9605_v55 = vld [vmem:[#allocation18_spill] sm:$0xff] }
 0x1e7   : > { %9596 = vst [vmem:[#allocation44_spill] sm:$0xff] %v8946_v15  ;;  %v8948_v47 = vpop.f32.mrf.mxu1  ;;  %v3155_v1 = vadd.f32 %v8892_v35, %v8798_v11 }
 0x1e8   : > { %9597 = vst [vmem:[#allocation45_spill] sm:$0xff] %v8948_v47  ;;  %v3489_v24 = vpop.f32.mrf.mxu0  ;;  %v3511_v61 = vadd.f32 %v8864_v46, %v3152_v48  ;;  %v9004_v46 = vadd.f32 %v8876_v19, %v3156_v13  ;;  %v3160_v19 = vadd.f32 %v8896_v42, %v8801_v29  ;;  %v9601_v29 = vld [vmem:[#allocation13_spill] sm:$0xff]  ;;  %v9604_v48 = vld [vmem:[#allocation16_spill] sm:$0xff]  ;;  %v9607_v13 = vld [vmem:[#allocation23_spill] sm:$0xff] }
 0x1e9   : > { %v8952_v58 = vpop.f32.mrf.mxu1  ;;  %v9031_v42 = vadd.f32 %v9601_v29, %v3155_v1  ;;  %v9618_v29 = vld [vmem:[#allocation27_spill] sm:$0xff] }
 0x1ea   : > { %9598 = vst [vmem:[#allocation46_spill] sm:$0xff] %v8952_v58  ;;  %v6110_v44 = vpop.f32.mrf.mxu0 }
 0x1eb   : > { %v3130_v22 = vpop.f32.mrf.mxu1 }
 0x1ec   : > { %v3171_v15 = vadd.f32 %v3130_v22, %v8850_v32  ;;  %v4570_v47 = vpop.f32.mrf.mxu0  ;;  %v3150_v22 = vadd.f32 %v8872_v17, %v8780_v18  ;;  %v3508_v18 = vadd.f32 %v8860_v54, %v3149_v0 }
 0x1ed   : > { %v6076_v45 = vpop.f32.mrf.mxu1 }
 0x1ee   : > { %v8964_v58 = vadd.f32 %v3489_v24, %v3171_v15  ;;  %v4229_v56 = vadd.f32 %v6076_v45, %v3503_v59  ;;  %v6111_v60 = vpop.f32.mrf.mxu0  ;;  %v3502_v24 = vadd.f32 %v8854_v28, %v3143_v3  ;;  %v3507_v59 = vadd.f32 %v8856_v37, %v3148_v49 }
 0x1ef   : > { %v4100_v2 = vpop.f32.mrf.mxu1  ;;  %v8991_v21 = vadd.f32 %v8866_v50, %v3150_v22  ;;  %v9007_v50 = vadd.f32 %v8878_v57, %v3154_v8  ;;  %v3158_v57 = vadd.f32 %v8900_v30, %v8804_v9  ;;  %v9602_v9 = vld [vmem:[#allocation5_spill] sm:$0xff]  ;;  %v9603_v30 = vld [vmem:[#allocation14_spill] sm:$0xff]  ;;  %v9037_v22 = vadd.f32 %v9604_v48, %v3160_v19 }
 0x1f0   : > { %v4699_v15 = vadd.f32 %v6110_v44, %v4229_v56  ;;  %v4227_v6 = vadd.f32 %v4100_v2, %v3501_v62  ;;  %v4573_v27 = vpop.f32.mrf.mxu0  ;;  %v9600_v62 = vld [vmem:[#allocation10_spill] sm:$0xff]  ;;  %v3159_v0 = vadd.f32 %v9603_v30, %v9602_v9  ;;  %v9606_v2 = vld [vmem:[#allocation20_spill] sm:$0xff]  ;;  %v9614_v19 = vld [vmem:[#allocation21_spill] sm:$0xff] }
 0x1f1   : > { %v6077_v32 = vpop.f32.mrf.mxu1  ;;  %v9028_v36 = vadd.f32 %v9600_v62, %v3157_v7  ;;  %v9040_v31 = vadd.f32 %v9605_v55, %v3158_v57  ;;  %v9615_v57 = vld [vmem:[#allocation33_spill] sm:$0xff]  ;;  %v9619_v30 = vld [vmem:[#allocation11_spill] sm:$0xff] }
 0x1f2   : > { %v8987_v3 = vadd.f32 %v8975_v38, %v4699_v15  ;;  %v4697_v28 = vadd.f32 %v4570_v47, %v4227_v6  ;;  %v4230_v44 = vadd.f32 %v6077_v32, %v3504_v26  ;;  %v6114_v37 = vpop.f32.mrf.mxu0  ;;  %v3161_v47 = vadd.f32 %v9599_v16, %v8807_v34  ;;  %v9608_v32 = vld [vmem:[#allocation17_spill] sm:$0xff] }
 0x1f3   : > { %v4103_v12 = vpop.f32.mrf.mxu1  ;;  %v9052_v8 = vadd.f32 %v9607_v13, %v3159_v0  ;;  %v3163_v16 = vadd.f32 %v9615_v57, %v9614_v19  ;;  %v9623_v13 = vld [vmem:[#allocation30_spill] sm:$0xff] }
 0x1f4   : > { %v5645_v54 = vmul.f32 -1.442695, %v8987_v3  ;;  %v9001_v40 = vadd.f32 %v8975_v38, %v4697_v28  ;;  %v4700_v10 = vadd.f32 %v6111_v60, %v4230_v44  ;;  %v4228_v25 = vadd.f32 %v4103_v12, %v3502_v24  ;;  %v4586_v4 = vpop.f32.mrf.mxu0  ;;  %v9609_v28 = vld [vmem:[#allocation19_spill] sm:$0xff]  ;;  %v9611_v12 = vld [vmem:[#allocation29_spill] sm:$0xff] }
 0x1f5   : > { %v6080_v17 = vpop.f32.mrf.mxu1  ;;  %v9043_v24 = vadd.f32 %v9606_v2, %v3161_v47  ;;  %v3164_v44 = vadd.f32 %v9609_v28, %v9608_v32  ;;  %v9616_v47 = vld [vmem:[#allocation24_spill] sm:$0xff]  ;;  %v9091_v32 = vadd.f32 %v9623_v13, %v3163_v16 }
 0x1f6   : > { %6242 = vpow2.f32 %v5645_v54  ;;  %v5643_v51 = vmul.f32 -1.442695, %v9001_v40  ;;  %v9015_v23 = vadd.f32 %v8975_v38, %v4700_v10  ;;  %v4698_v33 = vadd.f32 %v4573_v27, %v4228_v25  ;;  %v6115_v41 = vpop.f32.mrf.mxu0  ;;  %v9624_v28 = vld [vmem:[#allocation32_spill] sm:$0xff] }
 0x1f7   : > { %v4233_v52 = vadd.f32 %v6080_v17, %v3507_v59  ;;  %v4116_v11 = vpop.f32.mrf.mxu1  ;;  %v9074_v9 = vadd.f32 %v9618_v29, %v3164_v44 }
 0x1f8   : > { %6244 = vpow2.f32 %v5643_v51  ;;  %v5646_v35 = vmul.f32 -1.442695, %v9015_v23  ;;  %v9025_v49 = vadd.f32 %v8975_v38, %v4698_v33  ;;  %v4231_v14 = vadd.f32 %v4116_v11, %v3505_v39  ;;  %v4589_v20 = vpop.f32.mrf.mxu0  ;;  %v9612_v51 = vld [vmem:[#allocation12_spill] sm:$0xff]  ;;  %v9613_v33 = vld [vmem:[#allocation31_spill] sm:$0xff] }
 0x1f9   : > { %v4703_v34 = vadd.f32 %v6114_v37, %v4233_v52  ;;  %v6081_v45 = vpop.f32.mrf.mxu1  ;;  %v9610_v37 = vld [vmem:[#allocation22_spill] sm:$0xff]  ;;  %v9617_v52 = vld [vmem:[#allocation35_spill] sm:$0xff] }
 0x1fa   : > { %6246 = vpow2.f32 %v5646_v35  ;;  %v5644_v26 = vmul.f32 -1.442695, %v9025_v49  ;;  %v4701_v43 = vadd.f32 %v4586_v4, %v4231_v14  ;;  %v4234_v56 = vadd.f32 %v6081_v45, %v3508_v18  ;;  %v6118_v60 = vpop.f32.mrf.mxu0  ;;  %v9621_v45 = vld [vmem:[#allocation37_spill] sm:$0xff] }
 0x1fb   : > { %v9046_v59 = vadd.f32 %v8975_v38, %v4703_v34  ;;  %v4119_v15 = vpop.f32.mrf.mxu1  ;;  %v3162_v54 = vadd.f32 %v9611_v12, %v9610_v37  ;;  %v3168_v11 = vadd.f32 %v9617_v52, %v9616_v47  ;;  %v9620_v34 = vld [vmem:[#allocation26_spill] sm:$0xff] }
 0x1fc   : > { %6248 = vpow2.f32 %v5644_v26  ;;  %v9049_v6 = vadd.f32 %v8975_v38, %v4701_v43  ;;  %v4704_v27 = vadd.f32 %v6115_v41, %v4234_v56  ;;  %v4232_v39 = vadd.f32 %v4119_v15, %v3506_v5  ;;  %v4602_v18 = vpop.f32.mrf.mxu0 }
 0x1fd   : > { %v5649_v10 = vmul.f32 -1.442695, %v9046_v59  ;;  %v6084_v25 = vpop.f32.mrf.mxu1  ;;  %v3165_v41 = vadd.f32 %v9613_v33, %v9612_v51  ;;  %v9077_v0 = vadd.f32 %v9619_v30, %v3162_v54  ;;  %v3166_v26 = vadd.f32 %v9621_v45, %v9620_v34  ;;  %v9627_v51 = vld [vmem:[#allocation39_spill] sm:$0xff] }
 0x1fe   : > { %v5647_v4 = vmul.f32 -1.442695, %v9049_v6  ;;  %v9061_v7 = vadd.f32 %v8975_v38, %v4704_v27  ;;  %v4702_v1 = vadd.f32 %v4589_v20, %v4232_v39  ;;  %v4237_v5 = vadd.f32 %v6084_v25, %v3511_v61  ;;  %v6119_v17 = vpop.f32.mrf.mxu0  ;;  %v9622_v27 = vld [vmem:[#allocation15_spill] sm:$0xff] }
 0x1ff   : > { %6250 = vpow2.f32 %v5649_v10  ;;  %v4132_v35 = vpop.f32.mrf.mxu1  ;;  %v9088_v39 = vadd.f32 %v9622_v27, %v3165_v41  ;;  %v9094_v44 = vadd.f32 %v9624_v28, %v3168_v11  ;;  %v9628_v11 = vld [vmem:[#allocation7_spill] sm:$0xff]  ;;  %v9631_v28 = vld [vmem:[#allocation38_spill] sm:$0xff] }
 0x200   : > { %6252 = vpow2.f32 %v5647_v4  ;;  %v5650_v14 = vmul.f32 -1.442695, %v9061_v7  ;;  %v9071_v62 = vadd.f32 %v8975_v38, %v4702_v1  ;;  %v4707_v20 = vadd.f32 %v6118_v60, %v4237_v5  ;;  %v4605_v61 = vpop.f32.mrf.mxu0  ;;  %v9625_v4 = vld [vmem:[#allocation34_spill] sm:$0xff]  ;;  %v9626_v5 = vld [vmem:[#allocation28_spill] sm:$0xff] }
 0x201   : > { %v4235_v43 = vadd.f32 %v4132_v35, %v8991_v21  ;;  %v6085_v56 = vpop.f32.mrf.mxu1  ;;  %v9098_v1 = vadd.f32 %v9625_v4, %v3166_v26  ;;  %v3169_v33 = vadd.f32 %v9627_v51, %v9626_v5  ;;  %v9629_v35 = vld [vmem:[#allocation41_spill] sm:$0xff] }
 0x202   : > { %6254 = vpow2.f32 %v5650_v14  ;;  %v5648_v48 = vmul.f32 -1.442695, %v9071_v62  ;;  %v9084_v55 = vadd.f32 %v8975_v38, %v4707_v20  ;;  %v4238_v60 = vadd.f32 %v6085_v56, %v8994_v63  ;;  %v6122_v2 = vpop.f32.mrf.mxu0  ;;  %v9630_v56 = vld [vmem:[#allocation36_spill] sm:$0xff] }
 0x203   : > { %v6243_v15 = vpop.eup %6242  ;;  %v4705_v21 = vadd.f32 %v4602_v18, %v4235_v43  ;;  %v4135_v37 = vpop.f32.mrf.mxu1  ;;  %v3167_v14 = vadd.f32 %v9629_v35, %v9628_v11  ;;  %v9634_v35 = vld [vmem:[#allocation9_spill] sm:$0xff] }
 0x204   : > { %v4866_v12 = vadd.f32 1.0, %v6243_v15  ;;  %6256 = vpow2.f32 %v5648_v48  ;;  %v5653_v54 = vmul.f32 -1.442695, %v9084_v55  ;;  %v4708_v10 = vadd.f32 %v6119_v17, %v4238_v60  ;;  %v4618_v25 = vpop.f32.mrf.mxu0 }
 0x205   : > { %v6245_v63 = vpop.eup %6244  ;;  %v9103_v41 = vadd.f32 %v8975_v38, %v4705_v21  ;;  %v4236_v19 = vadd.f32 %v4135_v37, %v8997_v53  ;;  %v6088_v18 = vpop.f32.mrf.mxu1  ;;  %v9115_v48 = vadd.f32 %v9630_v56, %v3169_v33  ;;  %v9126_v21 = vadd.f32 %v9631_v28, %v3167_v14  ;;  %v9632_v33 = vld [vmem:[#allocation6_spill] sm:$0xff]  ;;  %v9635_v14 = vld [vmem:[#allocation45_spill] sm:$0xff] }
 0x206   : > { %6258 = vrcp.f32 %v4866_v12  ;;  %v4864_v57 = vadd.f32 1.0, %v6245_v63  ;;  %v9107_v16 = vadd.f32 %v8975_v38, %v4708_v10  ;;  %v4241_v17 = vadd.f32 %v6088_v18, %v9004_v46  ;;  %v6123_v47 = vpop.f32.mrf.mxu0 }
 0x207   : > { %v6247_v52 = vpop.eup %6246  ;;  %6260 = vpow2.f32 %v5653_v54  ;;  %v5651_v20 = vmul.f32 -1.442695, %v9103_v41  ;;  %v4706_v29 = vadd.f32 %v4605_v61, %v4236_v19  ;;  %v4148_v30 = vpop.f32.mrf.mxu1 }
 0x208   : > { %6262 = vrcp.f32 %v4864_v57  ;;  %v4867_v53 = vadd.f32 1.0, %v6247_v52  ;;  %v5654_v34 = vmul.f32 -1.442695, %v9107_v16  ;;  %v4711_v45 = vadd.f32 %v6122_v2, %v4241_v17  ;;  %v4621_v26 = vpop.f32.mrf.mxu0 }
 0x209   : > { %v6249_v43 = vpop.eup %6248  ;;  %6264 = vpow2.f32 %v5651_v20  ;;  %v9118_v46 = vadd.f32 %v8975_v38, %v4706_v29  ;;  %v4239_v60 = vadd.f32 %v4148_v30, %v9007_v50  ;;  %v6089_v15 = vpop.f32.mrf.mxu1  ;;  %v3170_v20 = vadd.f32 %v9635_v14, %v9634_v35 }
 0x20a   : > { %6266 = vrcp.f32 %v4867_v53  ;;  %v4865_v61 = vadd.f32 1.0, %v6249_v43  ;;  %v9122_v27 = vadd.f32 %v8975_v38, %v4711_v45  ;;  %v4242_v2 = vadd.f32 %v6089_v15, %v9028_v36  ;;  %v6126_v13 = vpop.f32.mrf.mxu0  ;;  %v9633_v36 = vld [vmem:[#allocation43_spill] sm:$0xff] }
 0x20b   : > { %6268 = vpow2.f32 %v5654_v34  ;;  %v5652_v37 = vmul.f32 -1.442695, %v9118_v46  ;;  %v4709_v12 = vadd.f32 %v4618_v25, %v4239_v60  ;;  %v4151_v54 = vpop.f32.mrf.mxu1  ;;  %v3172_v19 = vadd.f32 %v9633_v36, %v9632_v33  ;;  %v9636_v60 = vld [vmem:[#allocation40_spill] sm:$0xff] }
 0x20c   : > { %v6251_v10 = vpop.eup %6250  ;;  %6270 = vrcp.f32 %v4865_v61  ;;  %v5657_v50 = vmul.f32 -1.442695, %v9122_v27  ;;  %v4712_v63 = vadd.f32 %v6123_v47, %v4242_v2  ;;  %v4240_v4 = vadd.f32 %v4151_v54, %v9031_v42  ;;  %v4634_v5 = vpop.f32.mrf.mxu0 }
 0x20d   : > { %v6253_v51 = vpop.eup %6252  ;;  %v4870_v18 = vadd.f32 1.0, %v6251_v10  ;;  %6272 = vpow2.f32 %v5652_v37  ;;  %v9135_v57 = vadd.f32 %v8975_v38, %v4709_v12  ;;  %v6092_v25 = vpop.f32.mrf.mxu1  ;;  %v9153_v15 = vadd.f32 %v9636_v60, %v3172_v19 }
 0x20e   : > { %v4868_v17 = vadd.f32 1.0, %v6253_v51  ;;  %6274 = vpow2.f32 %v5657_v50  ;;  %v9138_v52 = vadd.f32 %v8975_v38, %v4712_v63  ;;  %v4710_v47 = vadd.f32 %v4621_v26, %v4240_v4  ;;  %v6127_v42 = vpop.f32.mrf.mxu0  ;;  %v9637_v50 = vld [vmem:[#allocation42_spill] sm:$0xff] }
 0x20f   : > { %v6255_v11 = vpop.eup %6254  ;;  %6276 = vrcp.f32 %v4870_v18  ;;  %v5655_v29 = vmul.f32 -1.442695, %v9135_v57  ;;  %v4245_v30 = vadd.f32 %v6092_v25, %v9037_v22  ;;  %v4164_v53 = vpop.f32.mrf.mxu1  ;;  %v9159_v63 = vadd.f32 %v9637_v50, %v3170_v20 }
 0x210   : > { %6278 = vrcp.f32 %v4868_v17  ;;  %v4871_v34 = vadd.f32 1.0, %v6255_v11  ;;  %v5658_v45 = vmul.f32 -1.442695, %v9138_v52  ;;  %v9150_v26 = vadd.f32 %v8975_v38, %v4710_v47  ;;  %v4637_v43 = vpop.f32.mrf.mxu0 }
 0x211   : > { %v6257_v56 = vpop.eup %6256  ;;  %6280 = vpow2.f32 %v5655_v29  ;;  %v4715_v61 = vadd.f32 %v6126_v13, %v4245_v30  ;;  %v4243_v22 = vadd.f32 %v4164_v53, %v9040_v31  ;;  %v6093_v2 = vpop.f32.mrf.mxu1  ;;  %v9638_v29 = vld [vmem:[#allocation8_spill] sm:$0xff]  ;;  %v9639_v30 = vld [vmem:[#allocation46_spill] sm:$0xff] }
 0x212   : > { %6282 = vrcp.f32 %v4871_v34  ;;  %v4869_v28 = vadd.f32 1.0, %v6257_v56  ;;  %v5656_v37 = vmul.f32 -1.442695, %v9150_v26  ;;  %v4246_v12 = vadd.f32 %v6093_v2, %v9043_v24 }
 0x213   : > { %v6130_v54 = vpop.f32.mrf.mxu0  ;;  %v6259_v10 = vpop.eup %6258  ;;  %6284 = vpow2.f32 %v5658_v45  ;;  %v9162_v4 = vadd.f32 %v8975_v38, %v4715_v61  ;;  %v4713_v13 = vadd.f32 %v4634_v5, %v4243_v22  ;;  %v9181_v53 = vadd.f32 %v9639_v30, %v9638_v29 }
 0x214   : > { %v4167_v51 = vpop.f32.mrf.mxu1  ;;  %v6261_v31 = vpop.eup %6260  ;;  %v4962_v33 = vmul.f32 %v6259_v10, %v8987_v3  ;;  %6286 = vrcp.f32 %v4869_v28  ;;  %v4716_v36 = vadd.f32 %v6127_v42, %v4246_v12 }
 0x215   : > { %v4244_v19 = vadd.f32 %v4167_v51, %v9052_v8  ;;  %v4650_v24 = vpop.f32.mrf.mxu0  ;;  %v6263_v18 = vpop.eup %6262  ;;  %v4874_v25 = vadd.f32 1.0, %v6261_v31  ;;  %6288 = vpow2.f32 %v5656_v37  ;;  %v5661_v17 = vmul.f32 -1.442695, %v9162_v4 }
 0x216   : > { %v9168_v47 = vadd.f32 %v8975_v38, %v4713_v13  ;;  %v6096_v11 = vpop.f32.mrf.mxu1  ;;  %v6265_v35 = vpop.eup %6264  ;;  %4994 = vst [vmem:[%s9171_s6 + $0x10] sm:$0xff] %v4962_v33  ;;  %v4960_v3 = vmul.f32 %v6263_v18, %v9001_v40  ;;  %v9176_v8 = vadd.f32 %v8975_v38, %v4716_v36 }
 0x217   : > { %v4714_v5 = vadd.f32 %v4637_v43, %v4244_v19  ;;  %v4249_v42 = vadd.f32 %v6096_v11, %v9074_v9  ;;  %v6131_v14 = vpop.f32.mrf.mxu0  ;;  %v6267_v20 = vpop.eup %6266  ;;  %6290 = vrcp.f32 %v4874_v25  ;;  %v4872_v34 = vadd.f32 1.0, %v6265_v35 }
 0x218   : > { %v5659_v45 = vmul.f32 -1.442695, %v9168_v47  ;;  %v4180_v56 = vpop.f32.mrf.mxu1  ;;  %v6269_v60 = vpop.eup %6268  ;;  %4992 = vst [vmem:[%s9171_s6] sm:$0xff] %v4960_v3  ;;  %v4963_v40 = vmul.f32 %v6267_v20, %v9015_v23  ;;  %6292 = vpow2.f32 %v5661_v17  ;;  %v5662_v43 = vmul.f32 -1.442695, %v9176_v8 }
 0x219   : > { %v9188_v9 = vadd.f32 %v8975_v38, %v4714_v5  ;;  %v4653_v61 = vpop.f32.mrf.mxu0  ;;  %v6271_v22 = vpop.eup %6270  ;;  %6294 = vrcp.f32 %v4872_v34  ;;  %v4875_v2 = vadd.f32 1.0, %v6269_v60  ;;  %v4719_v28 = vadd.f32 %v6130_v54, %v4249_v42 }
 0x21a   : > { %v4247_v37 = vadd.f32 %v4180_v56, %v9077_v0  ;;  %v6097_v12 = vpop.f32.mrf.mxu1  ;;  %v6273_v10 = vpop.eup %6272  ;;  %4995 = vst [vmem:[%s9171_s6 + $0x18] sm:$0xff] %v4963_v40  ;;  %v4961_v50 = vmul.f32 %v6271_v22, %v9025_v49  ;;  %6296 = vpow2.f32 %v5659_v45 }
 0x21b   : > { %v5660_v23 = vmul.f32 -1.442695, %v9188_v9  ;;  %v4250_v13 = vadd.f32 %v6097_v12, %v9088_v39  ;;  %v6134_v51 = vpop.f32.mrf.mxu0  ;;  %v6275_v31 = vpop.eup %6274  ;;  %6298 = vrcp.f32 %v4875_v2  ;;  %v4873_v33 = vadd.f32 1.0, %v6273_v10 }
 0x21c   : > { %v9196_v36 = vadd.f32 %v8975_v38, %v4719_v28  ;;  %v4717_v54 = vadd.f32 %v4650_v24, %v4247_v37  ;;  %v4183_v0 = vpop.f32.mrf.mxu1  ;;  %v6277_v19 = vpop.eup %6276  ;;  %4993 = vst [vmem:[%s9171_s6 + $0x8] sm:$0xff] %v4961_v50  ;;  %v4878_v18 = vadd.f32 1.0, %v6275_v31  ;;  %6300 = vpow2.f32 %v5662_v43 }
 0x21d   : > { %v4720_v25 = vadd.f32 %v6131_v14, %v4250_v13  ;;  %v4248_v49 = vadd.f32 %v4183_v0, %v9091_v32  ;;  %v4666_v17 = vpop.f32.mrf.mxu0  ;;  %v6279_v11 = vpop.eup %6278  ;;  %v4966_v39 = vmul.f32 %v6277_v19, %v9046_v59  ;;  %6302 = vrcp.f32 %v4873_v33  ;;  %v9640_v33 = vld [vmem:[#allocation44_spill] sm:$0xff] }
 0x21e   : > { %v5665_v35 = vmul.f32 -1.442695, %v9196_v36  ;;  %v9203_v3 = vadd.f32 %v8975_v38, %v4717_v54  ;;  %v6100_v24 = vpop.f32.mrf.mxu1  ;;  %v6281_v5 = vpop.eup %6280  ;;  %v4964_v42 = vmul.f32 %v6279_v11, %v9049_v6  ;;  %6304 = vrcp.f32 %v4878_v18 }
 0x21f   : > { %v9207_v14 = vadd.f32 %v8975_v38, %v4720_v25  ;;  %v4718_v32 = vadd.f32 %v4653_v61, %v4248_v49  ;;  %v6135_v20 = vpop.f32.mrf.mxu0  ;;  %v6283_v29 = vpop.eup %6282  ;;  %4998 = vst [vmem:[%s9171_s6 + $0x30] sm:$0xff] %v4966_v39  ;;  %v4876_v59 = vadd.f32 1.0, %v6281_v5  ;;  %6306 = vpow2.f32 %v5660_v23 }
 0x220   : > { %v5663_v30 = vmul.f32 -1.442695, %v9203_v3  ;;  %v4253_v34 = vadd.f32 %v6100_v24, %v9094_v44  ;;  %v4196_v45 = vpop.f32.mrf.mxu1  ;;  %v6285_v56 = vpop.eup %6284  ;;  %4996 = vst [vmem:[%s9171_s6 + $0x20] sm:$0xff] %v4964_v42  ;;  %v4967_v6 = vmul.f32 %v6283_v29, %v9061_v7  ;;  %6308 = vpow2.f32 %v5665_v35 }
 0x221   : > { %v5666_v60 = vmul.f32 -1.442695, %v9207_v14  ;;  %v9216_v40 = vadd.f32 %v8975_v38, %v4718_v32  ;;  %v4669_v43 = vpop.f32.mrf.mxu0  ;;  %v6287_v61 = vpop.eup %6286  ;;  %6310 = vrcp.f32 %v4876_v59  ;;  %v4879_v22 = vadd.f32 1.0, %v6285_v56 }
 0x222   : > { %v4723_v2 = vadd.f32 %v6134_v51, %v4253_v34  ;;  %v4251_v28 = vadd.f32 %v4196_v45, %v9098_v1  ;;  %v6101_v44 = vpop.f32.mrf.mxu1  ;;  %v6289_v37 = vpop.eup %6288  ;;  %4999 = vst [vmem:[%s9171_s6 + $0x38] sm:$0xff] %v4967_v6  ;;  %v4965_v12 = vmul.f32 %v6287_v61, %v9071_v62  ;;  %6312 = vpow2.f32 %v5663_v30 }
 0x223   : > { %v5664_v7 = vmul.f32 -1.442695, %v9216_v40  ;;  %v4254_v10 = vadd.f32 %v6101_v44, %v9115_v48  ;;  %v6138_v50 = vpop.f32.mrf.mxu0  ;;  %6314 = vrcp.f32 %v4879_v22  ;;  %v4877_v23 = vadd.f32 1.0, %v6289_v37 }
 0x224   : > { %v9224_v13 = vadd.f32 %v8975_v38, %v4723_v2  ;;  %v4721_v51 = vadd.f32 %v4666_v17, %v4251_v28  ;;  %v4199_v31 = vpop.f32.mrf.mxu1  ;;  %v6291_v1 = vpop.eup %6290  ;;  %v3532_v54 = vadd.f32 %v9640_v33, %v9181_v53  ;;  %4997 = vst [vmem:[%s9171_s6 + $0x28] sm:$0xff] %v4965_v12  ;;  %6316 = vpow2.f32 %v5666_v60 }
 0x225   : > { %v4724_v62 = vadd.f32 %v6135_v20, %v4254_v10  ;;  %v4252_v0 = vadd.f32 %v4199_v31, %v9126_v21  ;;  %v6293_v19 = vpop.eup %6292  ;;  %v4970_v48 = vmul.f32 %v6291_v1, %v9084_v55  ;;  %6318 = vrcp.f32 %v4877_v23  ;;  %v4682_v17 = vpop.f32.mrf.mxu0 }
 0x226   : > { %v5669_v18 = vmul.f32 -1.442695, %v9224_v13  ;;  %v9233_v25 = vadd.f32 %v8975_v38, %v4721_v51  ;;  %v6104_v49 = vpop.f32.mrf.mxu1  ;;  %v6295_v11 = vpop.eup %6294  ;;  %v4882_v39 = vadd.f32 1.0, %v6293_v19  ;;  %6320 = vpow2.f32 %v5664_v7 }
 0x227   : > { %v9236_v53 = vadd.f32 %v8975_v38, %v4724_v62  ;;  %v4722_v35 = vadd.f32 %v4669_v43, %v4252_v0  ;;  %v6297_v21 = vpop.eup %6296  ;;  %5002 = vst [vmem:[%s9171_s6 + $0x50] sm:$0xff] %v4970_v48  ;;  %v4968_v55 = vmul.f32 %v6295_v11, %v9103_v41  ;;  %v4257_v5 = vadd.f32 %v6104_v49, %v9153_v15  ;;  %v6139_v15 = vpop.f32.mrf.mxu0 }
 0x228   : > { %6322 = vpow2.f32 %v5669_v18  ;;  %v5667_v24 = vmul.f32 -1.442695, %v9233_v25  ;;  %v4212_v42 = vpop.f32.mrf.mxu1  ;;  %v6299_v32 = vpop.eup %6298  ;;  %v4880_v20 = vadd.f32 1.0, %v6297_v21 }
 0x229   : > { %6324 = vrcp.f32 %v4882_v39  ;;  %v5670_v29 = vmul.f32 -1.442695, %v9236_v53  ;;  %v9244_v59 = vadd.f32 %v8975_v38, %v4722_v35  ;;  %v6301_v30 = vpop.eup %6300  ;;  %5000 = vst [vmem:[%s9171_s6 + $0x40] sm:$0xff] %v4968_v55  ;;  %v4971_v34 = vmul.f32 %v6299_v32, %v9107_v16  ;;  %v4685_v51 = vpop.f32.mrf.mxu0 }
 0x22a   : > { %6326 = vpow2.f32 %v5667_v24  ;;  %v4727_v41 = vadd.f32 %v6138_v50, %v4257_v5  ;;  %v4255_v45 = vadd.f32 %v4212_v42, %v9159_v63  ;;  %v6105_v56 = vpop.f32.mrf.mxu1  ;;  %v6303_v6 = vpop.eup %6302  ;;  %v4883_v60 = vadd.f32 1.0, %v6301_v30 }
 0x22b   : > { %6328 = vrcp.f32 %v4880_v20  ;;  %v5668_v43 = vmul.f32 -1.442695, %v9244_v59  ;;  %v4258_v61 = vadd.f32 %v6105_v56, %v3532_v54  ;;  %v6305_v22 = vpop.eup %6304  ;;  %5003 = vst [vmem:[%s9171_s6 + $0x58] sm:$0xff] %v4971_v34  ;;  %v4969_v2 = vmul.f32 %v6303_v6, %v9118_v46 }
 0x22c   : > { %6330 = vpow2.f32 %v5670_v29  ;;  %v9253_v16 = vadd.f32 %v8975_v38, %v4727_v41  ;;  %v4725_v28 = vadd.f32 %v4682_v17, %v4255_v45  ;;  %v4215_v63 = vpop.f32.mrf.mxu1  ;;  %v6307_v44 = vpop.eup %6306  ;;  %v4974_v37 = vmul.f32 %v6305_v22, %v9122_v27 }
 0x22d   : > { %6332 = vrcp.f32 %v4883_v60  ;;  %v4728_v12 = vadd.f32 %v6139_v15, %v4258_v61  ;;  %v4256_v7 = vadd.f32 %v4215_v63, %v8964_v58  ;;  %v6309_v10 = vpop.eup %6308  ;;  %5001 = vst [vmem:[%s9171_s6 + $0x48] sm:$0xff] %v4969_v2  ;;  %v4881_v50 = vadd.f32 1.0, %v6307_v44 }
 0x22e   : > { %6334 = vpow2.f32 %v5668_v43  ;;  %v5673_v46 = vmul.f32 -1.442695, %v9253_v16  ;;  %v9260_v23 = vadd.f32 %v8975_v38, %v4725_v28  ;;  %v6311_v31 = vpop.eup %6310  ;;  %5006 = vst [vmem:[%s9171_s6 + $0x70] sm:$0xff] %v4974_v37  ;;  %v4886_v1 = vadd.f32 1.0, %v6309_v10 }
 0x22f   : > { %v9264_v27 = vadd.f32 %v8975_v38, %v4728_v12  ;;  %v4726_v33 = vadd.f32 %v4685_v51, %v4256_v7  ;;  %v6313_v54 = vpop.eup %6312  ;;  %v4972_v58 = vmul.f32 %v6311_v31, %v9135_v57  ;;  %6336 = vrcp.f32 %v4881_v50 }
 0x230   : > { %v5671_v62 = vmul.f32 -1.442695, %v9260_v23  ;;  %v6315_v0 = vpop.eup %6314  ;;  %6338 = vrcp.f32 %v4886_v1  ;;  %v4884_v19 = vadd.f32 1.0, %v6313_v54 }
 0x231   : > { %v9269_v48 = vadd.f32 %v8975_v38, %v4726_v33  ;;  %v6317_v18 = vpop.eup %6316  ;;  %5004 = vst [vmem:[%s9171_s6 + $0x60] sm:$0xff] %v4972_v58  ;;  %v4975_v49 = vmul.f32 %v6315_v0, %v9138_v52  ;;  %6340 = vpow2.f32 %v5673_v46  ;;  %v5674_v17 = vmul.f32 -1.442695, %v9264_v27 }
 0x232   : > { %v6319_v11 = vpop.eup %6318  ;;  %6342 = vrcp.f32 %v4884_v19  ;;  %v4887_v57 = vadd.f32 1.0, %v6317_v18 }
 0x233   : > { %v6321_v39 = vpop.eup %6320  ;;  %5007 = vst [vmem:[%s9171_s6 + $0x78] sm:$0xff] %v4975_v49  ;;  %v4973_v35 = vmul.f32 %v6319_v11, %v9150_v26  ;;  %6344 = vpow2.f32 %v5671_v62  ;;  %v5672_v55 = vmul.f32 -1.442695, %v9269_v48 }
 0x234   : > { %6346 = vrcp.f32 %v4887_v57  ;;  %v4885_v38 = vadd.f32 1.0, %v6321_v39 }
 0x235   : > { %v6323_v21 = vpop.eup %6322  ;;  %5005 = vst [vmem:[%s9171_s6 + $0x68] sm:$0xff] %v4973_v35  ;;  %6348 = vpow2.f32 %v5674_v17 }
 0x236   : > { %v6325_v24 = vpop.eup %6324  ;;  %v4890_v52 = vadd.f32 1.0, %v6323_v21  ;;  %6350 = vrcp.f32 %v4885_v38 }
 0x237   : > { %v6327_v5 = vpop.eup %6326  ;;  %v4978_v42 = vmul.f32 %v6325_v24, %v9162_v4 }
 0x238   : > { %v6329_v32 = vpop.eup %6328  ;;  %6352 = vrcp.f32 %v4890_v52  ;;  %v4888_v26 = vadd.f32 1.0, %v6327_v5 }
 0x239   : > { %v6331_v20 = vpop.eup %6330  ;;  %5010 = vst [vmem:[%s9171_s6 + $0x90] sm:$0xff] %v4978_v42  ;;  %v4976_v29 = vmul.f32 %v6329_v32, %v9168_v47  ;;  %6354 = vpow2.f32 %v5672_v55 }
 0x23a   : > { %v6333_v30 = vpop.eup %6332  ;;  %6356 = vrcp.f32 %v4888_v26  ;;  %v4891_v34 = vadd.f32 1.0, %v6331_v20 }
 0x23b   : > { %v6335_v41 = vpop.eup %6334  ;;  %5008 = vst [vmem:[%s9171_s6 + $0x80] sm:$0xff] %v4976_v29  ;;  %v4979_v45 = vmul.f32 %v6333_v30, %v9176_v8 }
 0x23c   : > { %6358 = vrcp.f32 %v4891_v34  ;;  %v4889_v4 = vadd.f32 1.0, %v6335_v41  ;;  %v6337_v56 = vpop.eup %6336 }
 0x23d   : > { %5011 = vst [vmem:[%s9171_s6 + $0x98] sm:$0xff] %v4979_v45  ;;  %v6339_v15 = vpop.eup %6338  ;;  %v4977_v6 = vmul.f32 %v6337_v56, %v9188_v9 }
 0x23e   : > { %6360 = vrcp.f32 %v4889_v4  ;;  %v6341_v47 = vpop.eup %6340  ;;  %v4982_v60 = vmul.f32 %v6339_v15, %v9196_v36 }
 0x23f   : > { %v6343_v43 = vpop.eup %6342  ;;  %5009 = vst [vmem:[%s9171_s6 + $0x88] sm:$0xff] %v4977_v6  ;;  %v4894_v61 = vadd.f32 1.0, %v6341_v47 }
 0x240   : > { %v6345_v22 = vpop.eup %6344  ;;  %5014 = vst [vmem:[%s9171_s6 + $0xb0] sm:$0xff] %v4982_v60  ;;  %v4980_v8 = vmul.f32 %v6343_v43, %v9203_v3 }
 0x241   : > { %v6347_v2 = vpop.eup %6346  ;;  %6362 = vrcp.f32 %v4894_v61  ;;  %v4892_v28 = vadd.f32 1.0, %v6345_v22 }
 0x242   : > { %v6349_v63 = vpop.eup %6348  ;;  %5012 = vst [vmem:[%s9171_s6 + $0xa0] sm:$0xff] %v4980_v8  ;;  %v4983_v9 = vmul.f32 %v6347_v2, %v9207_v14 }
 0x243   : > { %v6351_v44 = vpop.eup %6350  ;;  %6364 = vrcp.f32 %v4892_v28  ;;  %v4895_v36 = vadd.f32 1.0, %v6349_v63 }
 0x244   : > { %5015 = vst [vmem:[%s9171_s6 + $0xb8] sm:$0xff] %v4983_v9  ;;  %v4981_v12 = vmul.f32 %v6351_v44, %v9216_v40 }
 0x245   : > { %v6353_v37 = vpop.eup %6352  ;;  %6366 = vrcp.f32 %v4895_v36 }
 0x246   : > { %v6355_v3 = vpop.eup %6354  ;;  %v4986_v7 = vmul.f32 %v6353_v37, %v9224_v13  ;;  %5013 = vst [vmem:[%s9171_s6 + $0xa8] sm:$0xff] %v4981_v12 }
 0x247   : > { %v6357_v10 = vpop.eup %6356  ;;  %v4893_v50 = vadd.f32 1.0, %v6355_v3 }
 0x248   : > { %5018 = vst [vmem:[%s9171_s6 + $0xd0] sm:$0xff] %v4986_v7  ;;  %v4984_v14 = vmul.f32 %v6357_v10, %v9233_v25 }
 0x249   : > { %v6359_v46 = vpop.eup %6358  ;;  %6368 = vrcp.f32 %v4893_v50 }
 0x24a   : > { %5016 = vst [vmem:[%s9171_s6 + $0xc0] sm:$0xff] %v4984_v14  ;;  %v4987_v40 = vmul.f32 %v6359_v46, %v9236_v53 }
 0x24b   : > { %v6361_v51 = vpop.eup %6360 }
 0x24c   : > { %5019 = vst [vmem:[%s9171_s6 + $0xd8] sm:$0xff] %v4987_v40  ;;  %v4985_v13 = vmul.f32 %v6361_v51, %v9244_v59 }
 0x24e   : > { %5017 = vst [vmem:[%s9171_s6 + $0xc8] sm:$0xff] %v4985_v13  ;;  %v6363_v31 = vpop.eup %6362 }
 0x24f   : > { %v4990_v1 = vmul.f32 %v6363_v31, %v9253_v16 }
 0x250   : > { %v6365_v33 = vpop.eup %6364 }
 0x251   : > { %5022 = vst [vmem:[%s9171_s6 + $0xf0] sm:$0xff] %v4990_v1  ;;  %v4988_v25 = vmul.f32 %v6365_v33, %v9260_v23 }
 0x252   : > { %v6367_v54 = vpop.eup %6366 }
 0x253   : > { %5020 = vst [vmem:[%s9171_s6 + $0xe0] sm:$0xff] %v4988_v25  ;;  %v4991_v53 = vmul.f32 %v6367_v54, %v9264_v27 }
 0x255   : > { %5023 = vst [vmem:[%s9171_s6 + $0xf8] sm:$0xff] %v4991_v53 }
 0x256   : > { %v6369_v58 = vpop.eup %6368 }
 0x257   : > { %v4989_v59 = vmul.f32 %v6369_v58, %v9269_v48 }
 0x259   : > { %5021 = vst [vmem:[%s9171_s6 + $0xe8] sm:$0xff] %v4989_v59 }
 0x25a   : > { %6385 = shalt.err (!%p6382_p3)
}
 0x25b   : > { %s6386_s25 = scalar_lea.hbm %s9313_s11, 4096  ;;  %s6390_s28 = scalar_lea.hbm %s9364_s3, 8192 }
 0x25c   : > { %p6387_p4 = scmp.ne.s32.totalorder %s9313_s11, %s6386_s25  ;;  %p6391_p9 = scmp.lt.s32.totalorder %s9313_s11, %s9364_s3 }
 0x25d   : > { %p6392_p10 = scmp.lt.s32.totalorder %s6390_s28, %s6386_s25 }
 0x25e   : > { %p6388_p7 = pnand %p6387_p4, %p6495_p5 }
 0x25f   : > { %p6393_p11 = por %p6392_p10, %p6391_p9 }
 0x260   : > { %p6389_p8 = pneg %p6388_p7 }
 0x262   : > { %p6394_p12 = pnand %p6393_p11, %p6389_p8 }
 0x264   : > { %6397 = shalt.err (!%p6394_p12)
}
 0x265   : > { %s6435_s4 = smov 128   ;;  %s6436_s5 = smov 8  }
 0x266   : > { %6153 = dma.vmem_to_hbm [thread:$0]  (%p6495_p5), %s9315_s8, 4096, %s9313_s11, %s9321_s16, %s6435_s4, %s6435_s4, %s6436_s5  }
 0x267 PF: > { %p6159_p13 = scmp.ge.s32.totalorder %s6432_s15, 2  ;;  %s5053_s6 = sand.u32 1, %s6420_s12  }
 0x268   : > { %s5054_s7 = scalar_lea.sflag [#allocation3], %s5053_s6 }
 0x269   : > { %p6156_p0 = pnand %p6159_p13, %p6499_p6 }
 0x26b   : > { %p6157_p1 = pneg %p6156_p0 }
 0x26d   : > { %6415 = dma.done.wait (%p6157_p1), %s5054_s7, 4096  }
 0x26e   : > { %6417 = vsyncadd (%p6157_p1), %s5054_s7, 4294963200  ;;  %p13_p2 = scmp.ge.s32.totalorder %s6482_s18, 4   ;;  %s9641_s12 = smov %s6424_s13 }
 0x26f   : > { %s9642_s13 = smov %s6428_s14  ;;  %s9643_s14 = smov %s6493_s21 }
 0x270   : > { %s9644_s15 = smov %s6482_s18  ;;  %15 = sbr.rel (!%p13_p2) target bundleno = 3 (0x3), region = 77 }
 0x275   :  { %5059 = vsyncpa [#allocation3], 1 }
 0x276   :  { %5061 = vsyncpa [#allocation3 + $0x1], 1 }

</bundles_post_ra>
